<compile_context>
chip_gen: v5e
topology: v5e:2x2
jax: 0.10.0
libtpu: 0.0.40
codegen_flags: <defaults>
</compile_context>

<pallas_src>
import functools

import jax
import jax.numpy as jnp
from jax.experimental import pallas as pl
from jax.experimental.pallas import tpu as pltpu

LANE = 128


def _round_up(n, m):
    return (n + m - 1) // m * m


# ----------------------------------------------------------------------------
# Pallas kernel: fused 2-layer GCN decoder for one graph (weights resident).
# ----------------------------------------------------------------------------
def _decoder_kernel(a_ref, x_ref, w1_ref, b1_ref, w2_ref, b2_ref, o_ref):
    a = a_ref[...]                                                  # [N, N]  bf16
    # layer 1: GCNDeconv(400 -> 1600, hidden padded to 1664)
    #   (A @ x) @ W1  -- both MXU passes are bf16 x bf16, f32 accumulate.
    ax = jnp.dot(a, x_ref[...], preferred_element_type=jnp.float32)   # [N, K]  f32
    h = jnp.dot(ax.astype(jnp.bfloat16), w1_ref[...],
                preferred_element_type=jnp.float32) + b1_ref[...]     # [N, Hp] f32
    h = jnp.maximum(h, 0.0)                                           # f32 on VPU
    # layer 2: GCNDeconv(1600 -> num_features), A @ (h @ W2)
    hw2 = jnp.dot(h.astype(jnp.bfloat16), w2_ref[...],
                  preferred_element_type=jnp.float32)                 # [N, F]  f32
    o_ref[...] = (jnp.dot(a, hw2.astype(jnp.bfloat16),
                          preferred_element_type=jnp.float32)
                  + b2_ref[...]).astype(o_ref.dtype)


@jax.jit
def decoder_forward(a_hat, x, w1, b1, w2, b2):
    """Batched decoder forward.

    a_hat: [B, N, N] (or [N, N]) normalized adjacency.
    x:     [B, N, IN] (or [N, IN]) node features.
    w1, b1, w2, b2: packed parameters from pack_decoder_params.
    Returns [B, N, F] (or [N, F]) float32.
    """
    single = a_hat.ndim == 2
    if single:
        a_hat, x = a_hat[None], x[None]
    a_hat = a_hat.astype(jnp.bfloat16)
    x = x.astype(jnp.bfloat16)

    batch, n, _ = a_hat.shape
    in_dim = x.shape[-1]
    hid_p = w1.shape[1]
    f = w2.shape[1]

    flops = 2 * batch * n * (n * in_dim + in_dim * hid_p + hid_p * f + n * f)
    bytes_accessed = (
        sum(int(v.size) * v.dtype.itemsize for v in (w1, b1, w2, b2))
        + sum(int(v.size) * v.dtype.itemsize for v in (a_hat, x))
        + batch * n * f * 4)

    out = pl.pallas_call(
        _decoder_kernel,
        out_shape=jax.ShapeDtypeStruct((batch, n, f), jnp.float32),
        grid=(batch,),
        in_specs=[
            # per-graph activations, streamed each grid step
            pl.BlockSpec((pl.Squeezed(), n, n), lambda b: (b, 0, 0)),       # A_hat
            pl.BlockSpec((pl.Squeezed(), n, in_dim), lambda b: (b, 0, 0)),  # x
            # weights: constant index_map -> DMA'd once, VMEM-resident
            pl.BlockSpec((in_dim, hid_p), lambda b: (0, 0)),                # W1
            pl.BlockSpec((1, hid_p), lambda b: (0, 0)),                     # b1
            pl.BlockSpec((hid_p, f), lambda b: (0, 0)),                     # W2
            pl.BlockSpec((1, f), lambda b: (0, 0)),                         # b2
        ],
        out_specs=pl.BlockSpec((pl.Squeezed(), n, f), lambda b: (b, 0, 0)),
        compiler_params=pltpu.CompilerParams(
            dimension_semantics=("parallel",),
            vmem_limit_bytes=32 * 1024 * 1024),
        cost_estimate=pl.CostEstimate(flops=flops, transcendentals=0,
                                      bytes_accessed=bytes_accessed),
    )(a_hat, x, w1, b1, w2, b2)
    return out[0] if single else out


# ----------------------------------------------------------------------------
# Parameter packing: pad the hidden dim to a 128-lane multiple (1600 -> 1664)
# and cast weights to bf16 ONCE so they rest in HBM in the streamed form.
# The output-feature dim is deliberately left unpadded.  Zero padding is
# exact: padded b1 entries are 0 and ReLU(0)=0, so padded hidden columns
# contribute nothing through the zero rows of W2.
# ----------------------------------------------------------------------------
def pack_decoder_params(w1, b1, w2, b2):
    in_dim, hid = w1.shape
    hid2, out_dim = w2.shape
    assert hid2 == hid
    hid_p = _round_up(hid, LANE)
    w1_p = jnp.zeros((in_dim, hid_p), jnp.float32).at[:, :hid].set(w1)
    b1_p = jnp.zeros((1, hid_p), jnp.float32).at[:, :hid].set(b1.reshape(1, -1))
    w2_p = jnp.zeros((hid_p, out_dim), jnp.float32).at[:hid, :].set(w2)
    b2_p = b2.reshape(1, -1).astype(jnp.float32)
    return (w1_p.astype(jnp.bfloat16), b1_p,
            w2_p.astype(jnp.bfloat16), b2_p)


# ----------------------------------------------------------------------------
# Glue: normalized adjacency (GCN, improved=True -> self-loop weight = 2).
# TODO(synk): the edge_index scatter-add has no clean in-kernel Pallas
# equivalent, so the dense A_hat is built in plain JAX outside the kernel.
# ----------------------------------------------------------------------------
def normalized_adjacency(edge_index, num_nodes, improved=True):
    src = edge_index[0]
    dst = edge_index[1]
    a = jnp.zeros((num_nodes, num_nodes), jnp.float32)
    # message flows src -> dst, aggregation at dst:  out = A_hat @ x
    a = a.at[dst, src].add(1.0)
    fill = 2.0 if improved else 1.0
    a = a + fill * jnp.eye(num_nodes, dtype=jnp.float32)
    deg = a.sum(axis=1)
    d_inv_sqrt = jnp.where(deg > 0, 1.0 / jnp.sqrt(deg), 0.0)
    return d_inv_sqrt[:, None] * a * d_inv_sqrt[None, :]


def glorot(key, shape):
    fan_in, fan_out = shape
    limit = jnp.sqrt(6.0 / (fan_in + fan_out))
    return jax.random.uniform(key, shape, jnp.float32, -limit, limit)


if __name__ == "__main__":
    # Sizes implied by the module: conv1: 400 -> 1600, conv2: 1600 -> num_features
    NUM_GRAPHS = 2
    NUM_NODES = 8
    IN_DIM = 400
    HID_DIM = 1600
    NUM_FEATURES = 16

    key = jax.random.PRNGKey(0)
    k_x, k_w1, k_w2 = jax.random.split(key, 3)

    # node features for a small batch of graphs (streamed to the kernel as bf16)
    x_f32 = jax.random.normal(k_x, (NUM_GRAPHS, NUM_NODES, IN_DIM), jnp.float32)
    x = x_f32.astype(jnp.bfloat16)

    # two small deterministic graphs: rings with different strides
    def ring_edges(stride):
        src = jnp.arange(NUM_NODES, dtype=jnp.int32)
        dst = (src + stride) % NUM_NODES
        return jnp.stack([jnp.concatenate([src, dst]),
                          jnp.concatenate([dst, src])], axis=0)  # [2, E]

    a_hats_f32 = jnp.stack(
        [normalized_adjacency(ring_edges(1), NUM_NODES, improved=True),
         normalized_adjacency(ring_edges(3), NUM_NODES, improved=True)], axis=0)
    a_hats = a_hats_f32.astype(jnp.bfloat16)

    # deterministic parameters (synthetic; no checkpoint load)
    w1 = glorot(k_w1, (IN_DIM, HID_DIM))
    b1 = jnp.zeros((HID_DIM,), jnp.float32)
    w2 = glorot(k_w2, (HID_DIM, NUM_FEATURES))
    b2 = jnp.zeros((NUM_FEATURES,), jnp.float32)
    w1_p, b1_p, w2_p, b2_p = pack_decoder_params(w1, b1, w2, b2)

    out = decoder_forward(a_hats, x, w1_p, b1_p, w2_p, b2_p)
    out = jax.block_until_ready(out)
    assert out.shape == (NUM_GRAPHS, NUM_NODES, NUM_FEATURES)

    hi = functools.partial(jnp.einsum, precision=jax.lax.Precision.HIGHEST)
    bf = lambda v: v.astype(jnp.bfloat16).astype(jnp.float32)

    # Reference 1: same bf16 rounding points as the kernel, f32 math (tight).
    af = a_hats.astype(jnp.float32)
    xf = x.astype(jnp.float32)
    w1f = w1_p.astype(jnp.float32)
    w2f = w2_p.astype(jnp.float32)
    ax_r = bf(hi("bij,bjk->bik", af, xf))
    h_r = jnp.maximum(hi("bij,jk->bik", ax_r, w1f) + b1_p, 0.0)
    hw2_r = bf(hi("bij,jk->bik", bf(h_r), w2f))
    out_r = hi("bij,bjk->bik", af, hw2_r) + b2_p
    assert jnp.allclose(out, out_r, atol=1e-2, rtol=1e-2)

    # Reference 2: original full-f32 module semantics A @ (x @ W1) ... (loose
    # sanity check on the accumulated bf16 streaming/reordering error).
    h_f32 = jnp.maximum(
        hi("bij,bjk->bik", a_hats_f32, hi("bij,jk->bik", x_f32, w1))
        + b1[None, None, :], 0.0)
    out_f32 = (hi("bij,bjk->bik", a_hats_f32, hi("bij,jk->bik", h_f32, w2))
               + b2[None, None, :])
    assert jnp.allclose(out, out_f32, atol=7e-2, rtol=7e-2)

    print("KERNEL_OK")
</pallas_src>

<mosaic_0001>
module attributes {stable_mosaic.version = 11 : i64} {
  func.func @_decoder_kernel(%arg0: i32, %arg1: memref<1x8x8xbf16, #tpu.memory_space<vmem>>, %arg2: memref<1x8x400xbf16, #tpu.memory_space<vmem>>, %arg3: memref<400x1664xbf16, #tpu.memory_space<vmem>>, %arg4: memref<1x1664xf32, #tpu.memory_space<vmem>>, %arg5: memref<1664x16xbf16, #tpu.memory_space<vmem>>, %arg6: memref<1x16xf32, #tpu.memory_space<vmem>>, %arg7: memref<1x8x16xf32, #tpu.memory_space<vmem>>) attributes {dimension_semantics = [#tpu.dimension_semantics<parallel>], iteration_bounds = array<i64: 2>, scalar_prefetch = 0 : i64, scratch_operands = 0 : i64, tpu.core_type = #tpu.core_type<tc>, window_params = [{transform_indices = @transform_0, window_bounds = array<i64: 1, 8, 8>}, {transform_indices = @transform_1, window_bounds = array<i64: 1, 8, 400>}, {pipeline_mode = #tpu.pipeline_mode<synchronous>, transform_indices = @transform_2, window_bounds = array<i64: 400, 1664>}, {pipeline_mode = #tpu.pipeline_mode<synchronous>, transform_indices = @transform_3, window_bounds = array<i64: 1, 1664>}, {pipeline_mode = #tpu.pipeline_mode<synchronous>, transform_indices = @transform_4, window_bounds = array<i64: 1664, 16>}, {pipeline_mode = #tpu.pipeline_mode<synchronous>, transform_indices = @transform_5, window_bounds = array<i64: 1, 16>}, {transform_indices = @transform_6, window_bounds = array<i64: 1, 8, 16>}]} {
    %c0 = arith.constant 0 : index
    %c0_0 = arith.constant 0 : index
    %c0_1 = arith.constant 0 : index
    %0 = vector.load %arg1[%c0, %c0_0, %c0_1] : memref<1x8x8xbf16, #tpu.memory_space<vmem>>, vector<1x8x8xbf16>
    %1 = vector.shape_cast %0 : vector<1x8x8xbf16> to vector<8x8xbf16>
    %c0_2 = arith.constant 0 : index
    %c0_3 = arith.constant 0 : index
    %c0_4 = arith.constant 0 : index
    %2 = vector.load %arg2[%c0_2, %c0_3, %c0_4] : memref<1x8x400xbf16, #tpu.memory_space<vmem>>, vector<1x8x400xbf16>
    %3 = vector.shape_cast %2 : vector<1x8x400xbf16> to vector<8x400xbf16>
    %cst = arith.constant dense<0.000000e+00> : vector<8x400xf32>
    %4 = tpu.matmul %1, %3, %cst {dimension_numbers = #tpu.dot_dimension_numbers<[1], [0], [0], [1], [0, 0, 1, 1], [], []>} : vector<8x8xbf16>, vector<8x400xbf16>, vector<8x400xf32> -> vector<8x400xf32>
    %5 = arith.truncf %4 : vector<8x400xf32> to vector<8x400xbf16>
    %c0_5 = arith.constant 0 : index
    %c0_6 = arith.constant 0 : index
    %6 = vector.load %arg3[%c0_5, %c0_6] : memref<400x1664xbf16, #tpu.memory_space<vmem>>, vector<400x1664xbf16>
    %cst_7 = arith.constant dense<0.000000e+00> : vector<8x1664xf32>
    %7 = tpu.matmul %5, %6, %cst_7 {dimension_numbers = #tpu.dot_dimension_numbers<[1], [0], [0], [1], [0, 0, 1, 1], [], []>} : vector<8x400xbf16>, vector<400x1664xbf16>, vector<8x1664xf32> -> vector<8x1664xf32>
    %c0_8 = arith.constant 0 : index
    %c0_9 = arith.constant 0 : index
    %8 = vector.load %arg4[%c0_8, %c0_9] : memref<1x1664xf32, #tpu.memory_space<vmem>>, vector<1x1664xf32>
    %9 = vector.broadcast %8 : vector<1x1664xf32> to vector<8x1664xf32>
    %10 = arith.addf %7, %9 : vector<8x1664xf32>
    %cst_10 = arith.constant 0.000000e+00 : f32
    %11 = vector.broadcast %cst_10 : f32 to vector<8x1664xf32>
    %12 = arith.maximumf %10, %11 : vector<8x1664xf32>
    %13 = arith.truncf %12 : vector<8x1664xf32> to vector<8x1664xbf16>
    %c0_11 = arith.constant 0 : index
    %c0_12 = arith.constant 0 : index
    %14 = vector.load %arg5[%c0_11, %c0_12] : memref<1664x16xbf16, #tpu.memory_space<vmem>>, vector<1664x16xbf16>
    %cst_13 = arith.constant dense<0.000000e+00> : vector<8x16xf32>
    %15 = tpu.matmul %13, %14, %cst_13 {dimension_numbers = #tpu.dot_dimension_numbers<[1], [0], [0], [1], [0, 0, 1, 1], [], []>} : vector<8x1664xbf16>, vector<1664x16xbf16>, vector<8x16xf32> -> vector<8x16xf32>
    %16 = arith.truncf %15 : vector<8x16xf32> to vector<8x16xbf16>
    %cst_14 = arith.constant dense<0.000000e+00> : vector<8x16xf32>
    %17 = tpu.matmul %1, %16, %cst_14 {dimension_numbers = #tpu.dot_dimension_numbers<[1], [0], [0], [1], [0, 0, 1, 1], [], []>} : vector<8x8xbf16>, vector<8x16xbf16>, vector<8x16xf32> -> vector<8x16xf32>
    %c0_15 = arith.constant 0 : index
    %c0_16 = arith.constant 0 : index
    %18 = vector.load %arg6[%c0_15, %c0_16] : memref<1x16xf32, #tpu.memory_space<vmem>>, vector<1x16xf32>
    %19 = vector.broadcast %18 : vector<1x16xf32> to vector<8x16xf32>
    %20 = arith.addf %17, %19 : vector<8x16xf32>
    %c0_17 = arith.constant 0 : index
    %c0_18 = arith.constant 0 : index
    %c0_19 = arith.constant 0 : index
    %21 = vector.load %arg7[%c0_17, %c0_18, %c0_19] : memref<1x8x16xf32, #tpu.memory_space<vmem>>, vector<1x8x16xf32>
    %22 = vector.shape_cast %21 : vector<1x8x16xf32> to vector<8x16xf32>
    %23 = vector.shape_cast %20 : vector<8x16xf32> to vector<1x8x16xf32>
    tpu.vector_store %arg7[%c0_17, %c0_18, %c0_19], %23 {strides = array<i32>} : memref<1x8x16xf32, #tpu.memory_space<vmem>>, vector<1x8x16xf32>,
    return
  }
  func.func @transform_0(%arg0: i32) -> (i32, i32, i32) {
    %c0_i32 = arith.constant 0 : i32
    %c0_i32_0 = arith.constant 0 : i32
    %c0_i32_1 = arith.constant 0 : i32
    return %arg0, %c0_i32, %c0_i32_0 : i32, i32, i32
  }
  func.func @transform_1(%arg0: i32) -> (i32, i32, i32) {
    %c0_i32 = arith.constant 0 : i32
    %c0_i32_0 = arith.constant 0 : i32
    %c0_i32_1 = arith.constant 0 : i32
    return %arg0, %c0_i32, %c0_i32_0 : i32, i32, i32
  }
  func.func @transform_2(%arg0: i32) -> (i32, i32) {
    %c0_i32 = arith.constant 0 : i32
    %c0_i32_0 = arith.constant 0 : i32
    %c0_i32_1 = arith.constant 0 : i32
    return %c0_i32, %c0_i32_0 : i32, i32
  }
  func.func @transform_3(%arg0: i32) -> (i32, i32) {
    %c0_i32 = arith.constant 0 : i32
    %c0_i32_0 = arith.constant 0 : i32
    %c0_i32_1 = arith.constant 0 : i32
    return %c0_i32, %c0_i32_0 : i32, i32
  }
  func.func @transform_4(%arg0: i32) -> (i32, i32) {
    %c0_i32 = arith.constant 0 : i32
    %c0_i32_0 = arith.constant 0 : i32
    %c0_i32_1 = arith.constant 0 : i32
    return %c0_i32, %c0_i32_0 : i32, i32
  }
  func.func @transform_5(%arg0: i32) -> (i32, i32) {
    %c0_i32 = arith.constant 0 : i32
    %c0_i32_0 = arith.constant 0 : i32
    %c0_i32_1 = arith.constant 0 : i32
    return %c0_i32, %c0_i32_0 : i32, i32
  }
  func.func @transform_6(%arg0: i32) -> (i32, i32, i32) {
    %c0_i32 = arith.constant 0 : i32
    %c0_i32_0 = arith.constant 0 : i32
    %c0_i32_1 = arith.constant 0 : i32
    return %arg0, %c0_i32, %c0_i32_0 : i32, i32, i32
  }
}

</mosaic_0001>

<bundles_post_ra>
// kernel: decoder_forward.1
= control target key start
LH: loop header
LB: loop body
LE: loop exit
PB: predicated region body
PF: predicated region fallthrough
CT: control target
= control target key end

     0   :  { %s7576_s0 = inlined_call_operand.hbm [shape: bf16[2,8,8], index: 0, kind: input, shape index: {}]   ;;  %s7577_s1 = inlined_call_operand.hbm [shape: bf16[2,8,400], index: 1, kind: input, shape index: {}]   ;;  %s7578_s2 = inlined_call_operand.hbm [shape: bf16[400,1664], index: 2, kind: input, shape index: {}]   ;;  %s7579_s3 = inlined_call_operand.hbm [shape: f32[1,1664], index: 3, kind: input, shape index: {}]   ;;  %s7580_s4 = inlined_call_operand.vmem [shape: bf16[1664,16], index: 4, kind: input, shape index: {}]   ;;  %s7581_s5 = inlined_call_operand.hbm [shape: f32[1,16], index: 5, kind: input, shape index: {}]   ;;  %s7582_s6 = inlined_call_operand.hbm [shape: f32[2,8,16], index: 6, kind: output, shape index: {}]  }
   0x1   :  { %7584 = sst [smem:[#allocation19_spill]] %s7578_s2 }
   0x2   :  { %7585 = sst [smem:[#allocation20_spill]] %s7579_s3 }
   0x3   :  { %7586 = sst [smem:[#allocation21_spill]] %s7581_s5 }
   0x4   :  { %11 = vsyncpa [#allocation3], 0 }
   0x5   :  { %13 = vsyncpa [#allocation3 + $0x1], 0 }
   0x6   :  { %14 = vsyncpa [#allocation6], 0 }
   0x7   :  { %16 = vsyncpa [#allocation6 + $0x1], 0 }
   0x8   :  { %17 = vsyncpa [#allocation9], 0 }
   0x9   :  { %18 = vsyncpa [#allocation4], 0 }
   0xa   :  { %20 = vsyncpa [#allocation4 + $0x1], 0  ;;  %s6880_s21 = smov 0   ;;  %s6882_s22 = smov 0  }
   0xb   :  { %s6884_s23 = smov 0   ;;  %s6886_s24 = smov 0  }
   0xc LB: > { %7587 = sst [smem:[#allocation17_spill]] %s6834_s23  ;;  %s6904_s28 = sadd.s32 4294967295, %s6838_s24   ;;  %s6838_s24 = sphi %s6886_s24, %s7604_s24   ;;  %s6834_s23 = sphi %s6884_s23, %s7601_s23   ;;  %s6830_s22 = sphi %s6882_s22, %s7603_s22   ;;  %s6826_s21 = sphi %s6880_s21, %s7602_s21  }
   0xd   : > { %s7588_s2 = sld [smem:[#allocation19_spill]]  ;;  %p4338_p0 = scmp.ge.s32.totalorder %s6838_s24, 1 }
   0xe   : > { %p47_p1 = scmp.eq.s32.totalorder %s6904_s28, 0  ;;  %p193_p2 = scmp.lt.s32.totalorder %s6838_s24, 3 }
   0xf   : > { %s6840_s30 = smov [#allocation7]   ;;  %s7590_s3 = sld [smem:[#allocation20_spill]] }
  0x10   : > { %p6909_p3 = pnand %p4338_p0, %p193_p2  ;;  %s206_s7 = sshll.u32 %s6840_s30, 4  ;;  %s207_s7 = int_to_ptr.vmem [resolvable:$true] %s206_s7 }
  0x11   : > { %s7592_s5 = sld [smem:[#allocation21_spill]]  ;;  %s6841_s15 = smov [#allocation8]  }
  0x12   : > { %p6541_p4 = pneg %p6909_p3  ;;  %s221_s16 = sshll.u32 %s6841_s15, 4  ;;  %s222_s16 = int_to_ptr.vmem [resolvable:$true] %s221_s16 }
  0x13   : > { %s204_s27 = sshll.u32 %s7588_s2, 4  ;;  %s6842_s17 = smov 832   ;;  %s205_s27 = int_to_ptr.hbm [resolvable:$true] %s204_s27 }
  0x14   : > { %p6921_p6 = pnand %p6541_p4, %p47_p1  ;;  %s6843_s18 = smov 52  }
  0x15   : > { %s219_s10 = sshll.u32 %s7590_s3, 4  ;;  %s6844_s19 = smov [#allocation10]   ;;  %s220_s10 = int_to_ptr.hbm [resolvable:$true] %s219_s10 }
  0x16   : > { %6544 = dma.hbm_to_vmem [thread:$0]  (!%p6921_p6), %s205_s27, 41600, %s207_s7, [#allocation6], %s6842_s17, %s6842_s17, %s6843_s18  }
  0x17   : > { %s234_s14 = sshll.u32 %s7592_s5, 4  ;;  %s236_s20 = sshll.u32 %s6844_s19, 4  ;;  %s235_s14 = int_to_ptr.hbm [resolvable:$true] %s234_s14  ;;  %s237_s20 = int_to_ptr.vmem [resolvable:$true] %s236_s20 }
  0x18   : > { %6547 = dma.hbm_to_vmem [thread:$0]  (!%p6921_p6), %s220_s10, 208, %s222_s16, [#allocation9]  }
  0x19   : > { %6550 = dma.hbm_to_vmem [thread:$0]  (!%p6921_p6), %s235_s14, 16, %s237_s20, [#allocation9]  }
  0x1a   : > { %s4337_s25 = sadd.s32 4294967294, %s6838_s24   ;;  %s6936_s26 = sadd.s32 1, %s6838_s24  }
  0x1b   : > { %s33_s30 = sadd.s32 1, %s6834_s23  ;;  %s30_s27 = ssub.s32 %s6838_s24, %s6936_s26 }
  0x1c   : > { %p40_p7 = scmp.ne.s32.totalorder %s6834_s23, %s6830_s22  ;;  %p31_p8 = scmp.eq.s32.totalorder %s30_s27, 0 }
  0x1d   : > { %p41_p9 = scmp.eq.s32.totalorder %s6838_s24, 0  ;;  %p46_p10 = scmp.ne.s32.totalorder %s6830_s22, %s6826_s21 }
  0x1e   : > { %p180_p11 = scmp.eq.s32.totalorder %s6904_s28, 1  ;;  %p186_p2 = scmp.eq.s32.totalorder %s4337_s25, 1 }
  0x1f   : > { %s6948_s7 = scalar_select %p31_p8, %s6834_s23, %s33_s30  }
  0x20   : > { %p6950_p12 = por %p41_p9, %p40_p7  ;;  %p6956_p13 = por %p47_p1, %p46_p10 }
  0x21   : > { %7593 = sst [smem:[#allocation18_spill]] %s6948_s7  ;;  %p6960_p0 = por %p180_p11, %p40_p7 }
  0x22   : > { %p6565_p4 = scmp.lt.s32.totalorder %s6838_s24, 2  ;;  %s6966_s11 = sand.u32 1, %s6834_s23  }
  0x23   : > { %p6968_p6 = por %p186_p2, %p46_p10  ;;  %s4343_s13 = sshll.u32 %s6966_s11, 2 }
  0x24   : > { %s4344_s14 = sshll.u32 %s6838_s24, 2  ;;  %s251_s19 = scalar_lea.vmem [#allocation2], %s4343_s13 }
  0x25   : > { %s255_s17 = scalar_lea.hbm %s7576_s0, %s4344_s14  ;;  %s259_s20 = sshll.u32 %s251_s19, 4  ;;  %s260_s20 = int_to_ptr.vmem [resolvable:$true] %s259_s20 }
  0x26   : > { %s257_s18 = sshll.u32 %s255_s17, 4  ;;  %p6979_p7 = pnand %p6565_p4, %p6950_p12  ;;  %s258_s18 = int_to_ptr.hbm [resolvable:$true] %s257_s18 }
  0x27   : > { %s266_s30 = sand.u32 1, %s6838_s24   ;;  %s4345_s27 = sshll.u32 %s6966_s11, 4 }
  0x28   : > { %s248_s2 = scalar_lea.sflag [#allocation3], %s6966_s11  ;;  %s6700_s3 = sshra.s32 %s258_s18, 4  ;;  %s6701_s3 = int_to_ptr.hbm [resolvable:$true] %s6700_s3 }
  0x29   : > { %s6702_s5 = scalar_lea.hbm %s6701_s3, 4  ;;  %p6704_p9 = pneg %p6979_p7 }
  0x2a   : > { %p6703_p8 = scmp.ne.s32.totalorder %s6701_s3, %s6702_s5  ;;  %s6707_s14 = scalar_lea.hbm %s7576_s0, 8 }
  0x2b   : > { %p6708_p12 = scmp.lt.s32.totalorder %s6701_s3, %s7576_s0  ;;  %p6709_p2 = scmp.lt.s32.totalorder %s6707_s14, %s6702_s5 }
  0x2c   : > { %p6705_p10 = pnand %p6704_p9, %p6703_p8 }
  0x2d   : > { %p6710_p4 = por %p6709_p2, %p6708_p12 }
  0x2e   : > { %p6706_p11 = pneg %p6705_p10 }
  0x30   : > { %p6711_p5 = pnand %p6710_p4, %p6706_p11 }
  0x32   : > { %6714 = shalt.err (!%p6711_p5)
}
  0x33   : > { %6554 = dma.hbm_to_vmem [thread:$0]  (!%p6979_p7), %s258_s18, 64, %s260_s20, %s248_s2  }
  0x34   : > { %s6093_s11 = sshll.u32 %s6838_s24, 4  ;;  %s270_s17 = scalar_lea.vmem [#allocation5], %s4345_s27 }
  0x35   : > { %s279_s19 = sshll.u32 %s270_s17, 4  ;;  %s275_s8 = scalar_lea.hbm %s7577_s1, %s6093_s11  ;;  %s280_s19 = int_to_ptr.vmem [resolvable:$true] %s279_s19 }
  0x36   : > { %s277_s13 = sshll.u32 %s275_s8, 4  ;;  %s267_s3 = scalar_lea.sflag [#allocation6], %s266_s30  ;;  %s278_s13 = int_to_ptr.hbm [resolvable:$true] %s277_s13 }
  0x37   : > { %s6730_s5 = sshra.s32 %s278_s13, 4  ;;  %s6737_s20 = scalar_lea.hbm %s7577_s1, 32  ;;  %s6731_s5 = int_to_ptr.hbm [resolvable:$true] %s6730_s5 }
  0x38   : > { %s6732_s14 = scalar_lea.hbm %s6731_s5, 16  ;;  %p6738_p11 = scmp.lt.s32.totalorder %s6731_s5, %s7577_s1 }
  0x39   : > { %p6733_p5 = scmp.ne.s32.totalorder %s6731_s5, %s6732_s14  ;;  %p6739_p12 = scmp.lt.s32.totalorder %s6737_s20, %s6732_s14 }
  0x3b   : > { %p6735_p8 = pnand %p6733_p5, %p6704_p9  ;;  %p6740_p2 = por %p6739_p12, %p6738_p11 }
  0x3d   : > { %p6736_p10 = pneg %p6735_p8 }
  0x3f   : > { %p6741_p4 = pnand %p6740_p2, %p6736_p10 }
  0x41   : > { %6744 = shalt.err (!%p6741_p4)
}
  0x42   : > { %6557 = dma.hbm_to_vmem [thread:$0]  (!%p6979_p7), %s278_s13, 256, %s280_s19, %s267_s3  }
  0x43   : > { %288 = sbr.rel (%p6909_p3) target bundleno = 936 (0x3a8), region = 44  ;;  %s7017_s23 = sand.u32 (!%p6909_p3), 1, %s6830_s22  }
  0x44   : > { %s4349_s7 = sshll.u32 (!%p6909_p3), %s7017_s23, 2  ;;  %s291_s30 = scalar_lea.sflag (!%p6909_p3), [#allocation3], %s7017_s23 }
  0x45   : > { %s7021_s16 = scalar_lea.vmem (!%p6909_p3), [#allocation2], %s4349_s7 }
  0x48   : > { %6805 = dma.done.wait (%p6956_p13), %s291_s30, 64  }
  0x49   : > { %6807 = vsyncadd (%p6956_p13), %s291_s30, 4294967232  ;;  %s300_s29 = sand.u32 1, %s6904_s28   ;;  %s4350_s25 = sshll.u32 %s7017_s23, 4 }
  0x4a   : > { %s301_s11 = scalar_lea.sflag [#allocation6], %s300_s29  ;;  %s304_s17 = scalar_lea.vmem [#allocation5], %s4350_s25 }
  0x4b   : > { %6809 = dma.done.wait (%p6956_p13), %s301_s11, 256  }
  0x4c   : > { %6811 = vsyncadd (%p6956_p13), %s301_s11, 4294967040 }
  0x4d   : > { %6813 = dma.done.wait (%p47_p1), [#allocation6], 41600  }
  0x4e   : > { %6815 = vsyncadd (%p47_p1), [#allocation6], 4294925696 }
  0x4f   : > { %6817 = dma.done.wait (%p47_p1), [#allocation9], 224  }
  0x50   : > { %6819 = vsyncadd (%p47_p1), [#allocation9], 4294967072  ;;  %v356_v0 = vld [vmem:[%s304_s17] sm:$0xff]  ;;  %v357_v1 = vld [vmem:[%s304_s17 + $0x8] sm:$0xff]  ;;  %vm372_vm0 = vcmask 1043456   ;;  %vm368_vm1 = vcmask 64512  }
  0x51   : > { %v360_v2 = vunpack.c.l.b16 %v356_v0  ;;  %v361_v3 = vunpack.c.h.b16 %v356_v0  ;;  %v362_v4 = vunpack.c.l.b16 %v357_v1  ;;  %v363_v5 = vunpack.c.h.b16 %v357_v1  ;;  %v4725_v6 = vld [vmem:[#allocation7 + $0x2d8] sm:$0xf]  ;;  %v6191_v7 = vld [vmem:[#allocation7 + $0x308] sm:$0xf0]  ;;  %v4673_v14 = vld [vmem:[#allocation7 + $0x270] sm:$0xf] }
  0x52   : > { %v5141_v12 = vld [vmem:[#allocation7 + $0x618] sm:$0xf]  ;;  %v4726_v13 = vor.u32 %v6191_v7, %v4725_v6  ;;  %v6178_v15 = vld [vmem:[#allocation7 + $0x2a0] sm:$0xf0]  ;;  %v6295_v16 = vld [vmem:[#allocation7 + $0x648] sm:$0xf0] }
  0x53   : > { %v364_v8 = vpack.c.b16 %v360_v2, %v360_v2  ;;  %v365_v9 = vpack.c.b16 %v361_v3, %v361_v3  ;;  %v366_v10 = vpack.c.b16 %v362_v4, %v362_v4  ;;  %v367_v11 = vpack.c.b16 %v363_v5, %v363_v5  ;;  %v5089_v21 = vld [vmem:[#allocation7 + $0x5b0] sm:$0xf]  ;;  %v355_v22 = vld [vmem:[%s7021_s16] sm:$0xf]  ;;  %v6282_v24 = vld [vmem:[#allocation7 + $0x5e0] sm:$0xf0] }
  0x54   : > { %v5142_v23 = vor.u32 %v6295_v16, %v5141_v12  ;;  %v4674_v25 = vor.u32 %v6178_v15, %v4673_v14  ;;  %v4621_v26 = vld [vmem:[#allocation7 + $0x208] sm:$0xf]  ;;  %v5090_v27 = vor.u32 %v6282_v24, %v5089_v21  ;;  %v6165_v28 = vld [vmem:[#allocation7 + $0x238] sm:$0xf0]  ;;  %v4569_v31 = vld [vmem:[#allocation7 + $0x1a0] sm:$0xf] }
  0x55   : > { %v374_v17 = vsel %vm372_vm0, %v364_v8, 0  ;;  %v377_v18 = vsel %vm372_vm0, %v365_v9, 0  ;;  %v380_v19 = vsel %vm372_vm0, %v366_v10, 0  ;;  %v383_v20 = vsel %vm372_vm0, %v367_v11, 0  ;;  %v5037_v29 = vld [vmem:[#allocation7 + $0x548] sm:$0xf] }
  0x56   : > { %392 = vmatpush.bf16.msra.mxu0 %v374_v17  ;;  %405 = vmatpush.bf16.msra.mxu1 %v377_v18  ;;  %v6269_v30 = vld [vmem:[#allocation7 + $0x578] sm:$0xf0]  ;;  %v5557_v32 = vld [vmem:[#allocation7 + $0x958] sm:$0xf]  ;;  %v6399_v33 = vld [vmem:[#allocation7 + $0x988] sm:$0xf0]  ;;  %v4622_v34 = vor.u32 %v6165_v28, %v4621_v26 }
  0x57   : > { %418 = vmatpush.bf16.msra.mxu2 %v380_v19  ;;  %431 = vmatpush.bf16.msra.mxu3 %v383_v20  ;;  %v6152_v35 = vld [vmem:[#allocation7 + $0x1d0] sm:$0xf0]  ;;  %v5038_v36 = vor.u32 %v6269_v30, %v5037_v29  ;;  %v4985_v37 = vld [vmem:[#allocation7 + $0x4e0] sm:$0xf]  ;;  %v5558_v39 = vor.u32 %v6399_v33, %v5557_v32  ;;  %v6185_v42 = vld [vmem:[#allocation7 + $0x2dc] sm:$0xf] }
  0x58   : > { %v6256_v38 = vld [vmem:[#allocation7 + $0x510] sm:$0xf0]  ;;  %v5609_v40 = vld [vmem:[#allocation7 + $0x9c0] sm:$0xf]  ;;  %v4727_v44 = vld [vmem:[#allocation7 + $0x30c] sm:$0xf0]  ;;  %v4570_v51 = vor.u32 %v6152_v35, %v4569_v31 }
  0x59   : > { %4355 = vmatmul.msk.bf16.vlgmr.msra.gmra.mxu0 %vm368_vm1, %v355_v22  ;;  %4356 = vmatmul.msk.bf16.vlgmr.msra.gmra.mxu1 %vm368_vm1, %v355_v22  ;;  %v6412_v41 = vld [vmem:[#allocation7 + $0x9f0] sm:$0xf0]  ;;  %v5505_v45 = vld [vmem:[#allocation7 + $0x8f0] sm:$0xf]  ;;  %v6386_v46 = vld [vmem:[#allocation7 + $0x920] sm:$0xf0]  ;;  %v4730_v49 = vor.u32 %v6185_v42, %v4727_v44  ;;  %v4986_v52 = vor.u32 %v6256_v38, %v4985_v37 }
  0x5a   : > { %2475 = vmatpush.bf16.msrb.mxu0 %v4726_v13  ;;  %2488 = vmatpush.bf16.msrb.mxu1 %v5142_v23  ;;  %v5610_v43 = vor.u32 %v6412_v41, %v5609_v40  ;;  %v4517_v47 = vld [vmem:[#allocation7 + $0x138] sm:$0xf]  ;;  %v6139_v48 = vld [vmem:[#allocation7 + $0x168] sm:$0xf0]  ;;  %v5506_v50 = vor.u32 %v6386_v46, %v5505_v45  ;;  %v6172_v54 = vld [vmem:[#allocation7 + $0x274] sm:$0xf] }
  0x5b   : > { %4357 = vmatmul.msk.bf16.vlgmr.msra.gmra.mxu2 %vm368_vm1, %v355_v22  ;;  %4358 = vmatmul.msk.bf16.vlgmr.msra.gmra.mxu3 %vm368_vm1, %v355_v22  ;;  %v4933_v53 = vld [vmem:[#allocation7 + $0x478] sm:$0xf]  ;;  %v4675_v55 = vld [vmem:[#allocation7 + $0x2a4] sm:$0xf0]  ;;  %v6243_v56 = vld [vmem:[#allocation7 + $0x4a8] sm:$0xf0]  ;;  %v4518_v63 = vor.u32 %v6139_v48, %v4517_v47 }
  0x5c   : > { %2501 = vmatpush.bf16.msrb.mxu2 %v5558_v39  ;;  %2521 = vmatpush.bf16.msrb.mxu3 %v5610_v43  ;;  %v5453_v57 = vld [vmem:[#allocation7 + $0x888] sm:$0xf]  ;;  %v6373_v58 = vld [vmem:[#allocation7 + $0x8b8] sm:$0xf0]  ;;  %v4678_v59 = vor.u32 %v6172_v54, %v4675_v55  ;;  %v4465_v61 = vld [vmem:[#allocation7 + $0xd0] sm:$0xf]  ;;  %v4934_v0 = vor.u32 %v6243_v56, %v4933_v53 }
  0x5d   : > { %v5454_v60 = vor.u32 %v6373_v58, %v5453_v57  ;;  %v6159_v62 = vld [vmem:[#allocation7 + $0x20c] sm:$0xf]  ;;  %v4623_v1 = vld [vmem:[#allocation7 + $0x23c] sm:$0xf0]  ;;  %v6360_v3 = vld [vmem:[#allocation7 + $0x850] sm:$0xf0] }
  0x5e   : > { %2476 = vmatpush.bf16.msrb.mxu0 %v4674_v25  ;;  %2489 = vmatpush.bf16.msrb.mxu1 %v5090_v27  ;;  %v5401_v2 = vld [vmem:[#allocation7 + $0x820] sm:$0xf]  ;;  %v6126_v4 = vld [vmem:[#allocation7 + $0x100] sm:$0xf0]  ;;  %v4881_v5 = vld [vmem:[#allocation7 + $0x410] sm:$0xf]  ;;  %v4626_v7 = vor.u32 %v6159_v62, %v4623_v1 }
  0x5f   : > { %v6230_v6 = vld [vmem:[#allocation7 + $0x440] sm:$0xf0]  ;;  %v5402_v8 = vor.u32 %v6360_v3, %v5401_v2  ;;  %v4571_v10 = vld [vmem:[#allocation7 + $0x1d4] sm:$0xf0]  ;;  %v6347_v12 = vld [vmem:[#allocation7 + $0x7e8] sm:$0xf0]  ;;  %v4466_v13 = vor.u32 %v6126_v4, %v4465_v61 }
  0x60   : > { %2527 = vmatpush.bf16.msra.mxu3 %v4730_v49  ;;  %2502 = vmatpush.bf16.msrb.mxu2 %v5506_v50  ;;  %v6146_v9 = vld [vmem:[#allocation7 + $0x1a4] sm:$0xf]  ;;  %v5349_v11 = vld [vmem:[#allocation7 + $0x7b8] sm:$0xf]  ;;  %v4413_v14 = vld [vmem:[#allocation7 + $0x68] sm:$0xf]  ;;  %v4882_v15 = vor.u32 %v6230_v6, %v4881_v5 }
  0x61   : > { %v6113_v16 = vld [vmem:[#allocation7 + $0x98] sm:$0xf0]  ;;  %v4829_v17 = vld [vmem:[#allocation7 + $0x3a8] sm:$0xf]  ;;  %v4574_v19 = vor.u32 %v6146_v9, %v4571_v10  ;;  %v5350_v20 = vor.u32 %v6347_v12, %v5349_v11  ;;  %v4519_v22 = vld [vmem:[#allocation7 + $0x16c] sm:$0xf0] }
  0x62   : > { %2477 = vmatpush.bf16.msrb.mxu0 %v4622_v34  ;;  %2490 = vmatpush.bf16.msrb.mxu1 %v5038_v36  ;;  %v6217_v18 = vld [vmem:[#allocation7 + $0x3d8] sm:$0xf0]  ;;  %v5297_v23 = vld [vmem:[#allocation7 + $0x750] sm:$0xf]  ;;  %v6334_v24 = vld [vmem:[#allocation7 + $0x780] sm:$0xf0]  ;;  %v4414_v25 = vor.u32 %v6113_v16, %v4413_v14 }
  0x63   : > { %v6133_v21 = vld [vmem:[#allocation7 + $0x13c] sm:$0xf]  ;;  %v4361_v26 = vld [vmem:[#allocation7] sm:$0xf]  ;;  %v6100_v27 = vld [vmem:[#allocation7 + $0x30] sm:$0xf0]  ;;  %v4830_v28 = vor.u32 %v6217_v18, %v4829_v17  ;;  %v5298_v36 = vor.u32 %v6334_v24, %v5297_v23 }
  0x64   : > { %2528 = vmatpush.bf16.msra.mxu3 %v4678_v59  ;;  %2503 = vmatpush.bf16.msrb.mxu2 %v5454_v60  ;;  %v6289_v29 = vld [vmem:[#allocation7 + $0x61c] sm:$0xf]  ;;  %v4777_v30 = vld [vmem:[#allocation7 + $0x340] sm:$0xf]  ;;  %v6204_v31 = vld [vmem:[#allocation7 + $0x370] sm:$0xf0]  ;;  %v4522_v35 = vor.u32 %v6133_v21, %v4519_v22  ;;  %v4362_v37 = vor.u32 %v6100_v27, %v4361_v26 }
  0x65   : > { %v5143_v32 = vld [vmem:[#allocation7 + $0x64c] sm:$0xf0]  ;;  %v6393_v33 = vld [vmem:[#allocation7 + $0x95c] sm:$0xf]  ;;  %v4778_v38 = vor.u32 %v6204_v31, %v4777_v30  ;;  %v6276_v40 = vld [vmem:[#allocation7 + $0x5b4] sm:$0xf] }
  0x66   : > { %2478 = vmatpush.bf16.msrb.mxu0 %v4570_v51  ;;  %2491 = vmatpush.bf16.msrb.mxu1 %v4986_v52  ;;  %v5559_v34 = vld [vmem:[#allocation7 + $0x98c] sm:$0xf0]  ;;  %v5146_v39 = vor.u32 %v6289_v29, %v5143_v32  ;;  %v5091_v42 = vld [vmem:[#allocation7 + $0x5e4] sm:$0xf0]  ;;  %v6380_v43 = vld [vmem:[#allocation7 + $0x8f4] sm:$0xf] }
  0x67   : > { %v5562_v41 = vor.u32 %v6393_v33, %v5559_v34  ;;  %v5507_v44 = vld [vmem:[#allocation7 + $0x924] sm:$0xf0]  ;;  %v5094_v45 = vor.u32 %v6276_v40, %v5091_v42  ;;  %v6263_v46 = vld [vmem:[#allocation7 + $0x54c] sm:$0xf]  ;;  %v5039_v48 = vld [vmem:[#allocation7 + $0x57c] sm:$0xf0] }
  0x68   : > { %2529 = vmatpush.bf16.msra.mxu3 %v4626_v7  ;;  %2504 = vmatpush.bf16.msrb.mxu2 %v5402_v8  ;;  %v5510_v47 = vor.u32 %v6380_v43, %v5507_v44  ;;  %v6367_v49 = vld [vmem:[#allocation7 + $0x88c] sm:$0xf]  ;;  %v5455_v50 = vld [vmem:[#allocation7 + $0x8bc] sm:$0xf0]  ;;  %v5042_v51 = vor.u32 %v6263_v46, %v5039_v48  ;;  %v6250_v52 = vld [vmem:[#allocation7 + $0x4e4] sm:$0xf] }
  0x69   : > { %v5458_v53 = vor.u32 %v6367_v49, %v5455_v50  ;;  %v4987_v54 = vld [vmem:[#allocation7 + $0x514] sm:$0xf0]  ;;  %v6354_v55 = vld [vmem:[#allocation7 + $0x824] sm:$0xf]  ;;  %v6237_v59 = vld [vmem:[#allocation7 + $0x47c] sm:$0xf] }
  0x6a   : > { %2479 = vmatpush.bf16.msrb.mxu0 %v4518_v63  ;;  %2492 = vmatpush.bf16.msrb.mxu1 %v4934_v0  ;;  %v5403_v56 = vld [vmem:[#allocation7 + $0x854] sm:$0xf0]  ;;  %v4990_v57 = vor.u32 %v6250_v52, %v4987_v54  ;;  %v4935_v60 = vld [vmem:[#allocation7 + $0x4ac] sm:$0xf0]  ;;  %v6224_v62 = vld [vmem:[#allocation7 + $0x414] sm:$0xf] }
  0x6b   : > { %v5406_v58 = vor.u32 %v6354_v55, %v5403_v56  ;;  %v4938_v61 = vor.u32 %v6237_v59, %v4935_v60  ;;  %v4883_v63 = vld [vmem:[#allocation7 + $0x444] sm:$0xf0]  ;;  %v6211_v1 = vld [vmem:[#allocation7 + $0x3ac] sm:$0xf]  ;;  %v4831_v2 = vld [vmem:[#allocation7 + $0x3dc] sm:$0xf0] }
  0x6c   : > { %2530 = vmatpush.bf16.msra.mxu3 %v4574_v19  ;;  %2505 = vmatpush.bf16.msrb.mxu2 %v5350_v20  ;;  %v4886_v0 = vor.u32 %v6224_v62, %v4883_v63  ;;  %v4834_v3 = vor.u32 %v6211_v1, %v4831_v2  ;;  %v6120_v4 = vld [vmem:[#allocation7 + $0xd4] sm:$0xf]  ;;  %v4467_v5 = vld [vmem:[#allocation7 + $0x104] sm:$0xf0]  ;;  %v6321_v8 = vld [vmem:[#allocation7 + $0x718] sm:$0xf0] }
  0x6d   : > { %v4470_v6 = vor.u32 %v6120_v4, %v4467_v5  ;;  %v5245_v7 = vld [vmem:[#allocation7 + $0x6e8] sm:$0xf]  ;;  %v6198_v10 = vld [vmem:[#allocation7 + $0x344] sm:$0xf]  ;;  %v4779_v11 = vld [vmem:[#allocation7 + $0x374] sm:$0xf0] }
  0x6e   : > { %2480 = vmatpush.bf16.msrb.mxu0 %v4466_v13  ;;  %2493 = vmatpush.bf16.msrb.mxu1 %v4882_v15  ;;  %v5246_v9 = vor.u32 %v6321_v8, %v5245_v7  ;;  %v4782_v12 = vor.u32 %v6198_v10, %v4779_v11  ;;  %v6341_v13 = vld [vmem:[#allocation7 + $0x7bc] sm:$0xf]  ;;  %v5351_v14 = vld [vmem:[#allocation7 + $0x7ec] sm:$0xf0]  ;;  %v6107_v16 = vld [vmem:[#allocation7 + $0x6c] sm:$0xf] }
  0x6f   : > { %v5354_v15 = vor.u32 %v6341_v13, %v5351_v14  ;;  %v4415_v17 = vld [vmem:[#allocation7 + $0x9c] sm:$0xf0]  ;;  %v6308_v20 = vld [vmem:[#allocation7 + $0x6b0] sm:$0xf0]  ;;  %v5299_v23 = vld [vmem:[#allocation7 + $0x784] sm:$0xf0] }
  0x70   : > { %2531 = vmatpush.bf16.msra.mxu3 %v4522_v35  ;;  %2506 = vmatpush.bf16.msrb.mxu2 %v5298_v36  ;;  %v4418_v18 = vor.u32 %v6107_v16, %v4415_v17  ;;  %v5193_v19 = vld [vmem:[#allocation7 + $0x680] sm:$0xf]  ;;  %v6328_v22 = vld [vmem:[#allocation7 + $0x754] sm:$0xf]  ;;  %v4363_v26 = vld [vmem:[#allocation7 + $0x34] sm:$0xf0] }
  0x71   : > { %v5194_v21 = vor.u32 %v6308_v20, %v5193_v19  ;;  %v5302_v24 = vor.u32 %v6328_v22, %v5299_v23  ;;  %v5611_v29 = vld [vmem:[#allocation7 + $0x9f4] sm:$0xf0]  ;;  %v6315_v31 = vld [vmem:[#allocation7 + $0x6ec] sm:$0xf]  ;;  %v5247_v32 = vld [vmem:[#allocation7 + $0x71c] sm:$0xf0] }
  0x72   : > { %2481 = vmatpush.bf16.msrb.mxu0 %v4414_v25  ;;  %2494 = vmatpush.bf16.msrb.mxu1 %v4830_v28  ;;  %v6094_v25 = vld [vmem:[#allocation7 + $0x4] sm:$0xf]  ;;  %v5250_v33 = vor.u32 %v6315_v31, %v5247_v32  ;;  %v5195_v35 = vld [vmem:[#allocation7 + $0x6b4] sm:$0xf0]  ;;  %v6413_v40 = vld [vmem:[#allocation7 + $0x9f8] sm:$0xf0] }
  0x73   : > { %v4366_v27 = vor.u32 %v6094_v25, %v4363_v26  ;;  %v6406_v28 = vld [vmem:[#allocation7 + $0x9c4] sm:$0xf]  ;;  %v6387_v48 = vld [vmem:[#allocation7 + $0x928] sm:$0xf0]  ;;  %v4733_v49 = vld [vmem:[#allocation7 + $0x2e0] sm:$0xf] }
  0x74   : > { %2532 = vmatpush.bf16.msra.mxu3 %v4470_v6  ;;  %2507 = vmatpush.bf16.msrb.mxu2 %v5246_v9  ;;  %v5614_v30 = vor.u32 %v6406_v28, %v5611_v29  ;;  %v6302_v34 = vld [vmem:[#allocation7 + $0x684] sm:$0xf]  ;;  %v5149_v52 = vld [vmem:[#allocation7 + $0x620] sm:$0xf]  ;;  %v5461_v54 = vld [vmem:[#allocation7 + $0x890] sm:$0xf] }
  0x75   : > { %v5198_v36 = vor.u32 %v6302_v34, %v5195_v35  ;;  %v6374_v55 = vld [vmem:[#allocation7 + $0x8c0] sm:$0xf0]  ;;  %vm2471_vm2 = vcmask 130048   ;;  %v4681_v60 = vld [vmem:[#allocation7 + $0x278] sm:$0xf]  ;;  %s6090_s27 = sshll.u32 %s6904_s28, 3 }
  0x76   : > { %2482 = vmatpush.bf16.msrb.mxu0 %v4362_v37  ;;  %2495 = vmatpush.bf16.msrb.mxu1 %v4778_v38  ;;  %v5565_v37 = vld [vmem:[#allocation7 + $0x960] sm:$0xf]  ;;  %v6400_v38 = vld [vmem:[#allocation7 + $0x990] sm:$0xf0]  ;;  %v5462_v63 = vor.u32 %v6374_v55, %v5461_v54  ;;  %v5097_v1 = vld [vmem:[#allocation7 + $0x5b8] sm:$0xf]  ;;  %s4211_s29 = scalar_lea.hbm %s7582_s6, %s6090_s27 }
  0x77   : > { %v5566_v43 = vor.u32 %v6400_v38, %v5565_v37  ;;  %v6283_v2 = vld [vmem:[#allocation7 + $0x5e8] sm:$0xf0]  ;;  %v5409_v5 = vld [vmem:[#allocation7 + $0x828] sm:$0xf]  ;;  %v6361_v6 = vld [vmem:[#allocation7 + $0x858] sm:$0xf0] }
  0x78   : > { %2533 = vmatpush.bf16.msra.mxu3 %v4418_v18  ;;  %2508 = vmatpush.bf16.msrb.mxu2 %v5194_v21  ;;  %v5098_v8 = vor.u32 %v6283_v2, %v5097_v1  ;;  %v4629_v9 = vld [vmem:[#allocation7 + $0x210] sm:$0xf]  ;;  %v5410_v10 = vor.u32 %v6361_v6, %v5409_v5  ;;  %v6166_v11 = vld [vmem:[#allocation7 + $0x240] sm:$0xf0]  ;;  %v5357_v14 = vld [vmem:[#allocation7 + $0x7c0] sm:$0xf] }
  0x79   : > { %v6270_v13 = vld [vmem:[#allocation7 + $0x580] sm:$0xf0]  ;;  %v4735_v17 = vld [vmem:[#allocation7 + $0x314] sm:$0xf0]  ;;  %v4630_v19 = vor.u32 %v6166_v11, %v4629_v9  ;;  %v4577_v22 = vld [vmem:[#allocation7 + $0x1a8] sm:$0xf] }
  0x7a   : > { %2540 = vmatpush.bf16.msra.mxu0 %v5146_v39  ;;  %2553 = vmatpush.bf16.msra.mxu1 %v5562_v41  ;;  %v5617_v39 = vld [vmem:[#allocation7 + $0x9c8] sm:$0xf]  ;;  %v6186_v16 = vld [vmem:[#allocation7 + $0x2e4] sm:$0xf]  ;;  %v6153_v23 = vld [vmem:[#allocation7 + $0x1d8] sm:$0xf0] }
  0x7b   : > { %v5618_v44 = vor.u32 %v6413_v40, %v5617_v39  ;;  %v6257_v25 = vld [vmem:[#allocation7 + $0x518] sm:$0xf0]  ;;  %v5305_v28 = vld [vmem:[#allocation7 + $0x758] sm:$0xf]  ;;  %v6335_v29 = vld [vmem:[#allocation7 + $0x788] sm:$0xf0]  ;;  %v4578_v32 = vor.u32 %v6153_v23, %v4577_v22 }
  0x7c   : > { %2534 = vmatpush.bf16.msra.mxu3 %v4366_v27  ;;  %2573 = vmatpush.bf16.msra.mxu2 %v5614_v30  ;;  %v4738_v27 = vor.u32 %v6186_v16, %v4735_v17  ;;  %v6173_v30 = vld [vmem:[#allocation7 + $0x27c] sm:$0xf]  ;;  %v4683_v31 = vld [vmem:[#allocation7 + $0x2ac] sm:$0xf0]  ;;  %v4525_v34 = vld [vmem:[#allocation7 + $0x140] sm:$0xf]  ;;  %v5306_v38 = vor.u32 %v6335_v29, %v5305_v28 }
  0x7d   : > { %v6140_v35 = vld [vmem:[#allocation7 + $0x170] sm:$0xf0]  ;;  %v4686_v39 = vor.u32 %v6173_v30, %v4683_v31  ;;  %v5253_v40 = vld [vmem:[#allocation7 + $0x6f0] sm:$0xf]  ;;  %v5201_v54 = vld [vmem:[#allocation7 + $0x688] sm:$0xf] }
  0x7e   : > { %2541 = vmatpush.bf16.msra.mxu0 %v5094_v45  ;;  %2554 = vmatpush.bf16.msra.mxu1 %v5510_v47  ;;  %v5513_v47 = vld [vmem:[#allocation7 + $0x8f8] sm:$0xf]  ;;  %v6244_v37 = vld [vmem:[#allocation7 + $0x4b0] sm:$0xf0]  ;;  %v6309_v55 = vld [vmem:[#allocation7 + $0x6b8] sm:$0xf0] }
  0x7f   : > { %v5514_v50 = vor.u32 %v6387_v48, %v5513_v47  ;;  %v4473_v48 = vld [vmem:[#allocation7 + $0xd8] sm:$0xf]  ;;  %v6114_v1 = vld [vmem:[#allocation7 + $0xa0] sm:$0xf0]  ;;  %v4837_v2 = vld [vmem:[#allocation7 + $0x3b0] sm:$0xf] }
  0x80   : > { %v6134_v6 = vld [vmem:[#allocation7 + $0x144] sm:$0xf]  ;;  %v4741_v9 = vld [vmem:[#allocation7 + $0x2e8] sm:$0xf]  ;;  %v6205_v16 = vld [vmem:[#allocation7 + $0x378] sm:$0xf0] }
  0x81   : > { %v6290_v17 = vld [vmem:[#allocation7 + $0x624] sm:$0xf]  ;;  %v5567_v22 = vld [vmem:[#allocation7 + $0x994] sm:$0xf0]  ;;  %v6121_v23 = vld [vmem:[#allocation7 + $0xdc] sm:$0xf] }
  0x82   : > { %2542 = vmatpush.bf16.msra.mxu0 %v5042_v51  ;;  %2555 = vmatpush.bf16.msra.mxu1 %v5458_v53  ;;  %v6192_v51 = vld [vmem:[#allocation7 + $0x310] sm:$0xf0]  ;;  %v6277_v31 = vld [vmem:[#allocation7 + $0x5bc] sm:$0xf]  ;;  %s4354_s15 = sshll.u32 %s7017_s23, 3  ;;  %s4215_s17 = sshll.u32 %s4211_s29, 4  ;;  %s4216_s17 = int_to_ptr.hbm [resolvable:$true] %s4215_s17 }
  0x83   : > { %v6296_v53 = vld [vmem:[#allocation7 + $0x650] sm:$0xf0]  ;;  %s353_s25 = scalar_lea.vmem [#allocation11], %s4354_s15  ;;  %s6774_s9 = sshra.s32 %s4216_s17, 4  ;;  %s6775_s9 = int_to_ptr.hbm [resolvable:$true] %s6774_s9 }
  0x84   : > { %v5150_v59 = vor.u32 %v6296_v53, %v5149_v52  ;;  %s4213_s11 = sshll.u32 %s353_s25, 4  ;;  %s6776_s28 = scalar_lea.hbm %s6775_s9, 8  ;;  %s4214_s11 = int_to_ptr.vmem [resolvable:$true] %s4213_s11 }
  0x85   : > { %p6777_p1 = scmp.ne.s32.totalorder %s6775_s9, %s6776_s28  ;;  %s6780_s13 = scalar_lea.hbm %s7582_s6, 16 }
  0x86   : > { %2543 = vmatpush.bf16.msra.mxu0 %v4990_v57  ;;  %2556 = vmatpush.bf16.msra.mxu1 %v5406_v58  ;;  %v4734_v58 = vor.u32 %v6192_v51, %v4733_v49  ;;  %v6127_v49 = vld [vmem:[#allocation7 + $0x108] sm:$0xf0]  ;;  %p6781_p7 = scmp.lt.s32.totalorder %s6775_s9, %s7582_s6  ;;  %p6782_p9 = scmp.lt.s32.totalorder %s6780_s13, %s6776_s28 }
  0x87   : > { %v6231_v51 = vld [vmem:[#allocation7 + $0x448] sm:$0xf0]  ;;  %p6778_p3 = pnand %p6777_p1, %p6960_p0 }
  0x88   : > { %p6783_p5 = por %p6782_p9, %p6781_p7 }
  0x89   : > { %p6779_p13 = pneg %p6778_p3 }
  0x8a   : > { %2544 = vmatpush.bf16.msra.mxu0 %v4938_v61  ;;  %2557 = vmatpush.bf16.msra.mxu1 %v5354_v15  ;;  %v6348_v15 = vld [vmem:[#allocation7 + $0x7f0] sm:$0xf0] }
  0x8b   : > { %v5358_v26 = vor.u32 %v6348_v15, %v5357_v14  ;;  %v6101_v14 = vld [vmem:[#allocation7 + $0x38] sm:$0xf0]  ;;  %v4785_v15 = vld [vmem:[#allocation7 + $0x348] sm:$0xf]  ;;  %p6784_p8 = pnand %p6783_p5, %p6779_p13 }
  0x8c   : > { %v4786_v28 = vor.u32 %v6205_v16, %v4785_v15  ;;  %v4481_v16 = vld [vmem:[#allocation7 + $0xe0] sm:$0xf] }
  0x8e   : > { %2545 = vmatpush.bf16.msra.mxu0 %v4886_v0  ;;  %2558 = vmatpush.bf16.msra.mxu1 %v5302_v24  ;;  %v6179_v0 = vld [vmem:[#allocation7 + $0x2a8] sm:$0xf0]  ;;  %v4993_v24 = vld [vmem:[#allocation7 + $0x4e8] sm:$0xf] }
  0x8f   : > { %v4682_v7 = vor.u32 %v6179_v0, %v4681_v60  ;;  %v4421_v60 = vld [vmem:[#allocation7 + $0x70] sm:$0xf]  ;;  %v5619_v0 = vld [vmem:[#allocation7 + $0x9fc] sm:$0xf0] }
  0x90   : > { %v4422_v11 = vor.u32 %v6114_v1, %v4421_v60  ;;  %v6355_v1 = vld [vmem:[#allocation7 + $0x82c] sm:$0xf] }
  0x92   : > { %2546 = vmatpush.bf16.msra.mxu0 %v4834_v3  ;;  %2559 = vmatpush.bf16.msra.mxu1 %v5250_v33  ;;  %v4994_v33 = vor.u32 %v6257_v25, %v4993_v24  ;;  %v4475_v24 = vld [vmem:[#allocation7 + $0x10c] sm:$0xf0]  ;;  %v4689_v25 = vld [vmem:[#allocation7 + $0x280] sm:$0xf] }
  0x96   : > { %2547 = vmatpush.bf16.msra.mxu0 %v4782_v12  ;;  %2560 = vmatpush.bf16.msra.mxu1 %v5198_v36  ;;  %v5045_v12 = vld [vmem:[#allocation7 + $0x550] sm:$0xf]  ;;  %v4941_v36 = vld [vmem:[#allocation7 + $0x480] sm:$0xf] }
  0x97   : > { %v5046_v20 = vor.u32 %v6270_v13, %v5045_v12  ;;  %v4942_v47 = vor.u32 %v6244_v37, %v4941_v36  ;;  %v4369_v13 = vld [vmem:[#allocation7 + $0x8] sm:$0xf]  ;;  %v5515_v36 = vld [vmem:[#allocation7 + $0x92c] sm:$0xf0]  ;;  %v6108_v37 = vld [vmem:[#allocation7 + $0x74] sm:$0xf] }
  0xd6   : > { %v394_v41 = vpop.f32.mrf.mxu0  ;;  %v407_v42 = vpop.f32.mrf.mxu1 }
  0xd7   : > { %v7050_v45 = vpack.c.bf16 %v394_v41, %v394_v41  ;;  %v7052_v46 = vpack.c.bf16 %v407_v42, %v407_v42  ;;  %v6322_v41 = vld [vmem:[#allocation7 + $0x720] sm:$0xf0]  ;;  %v6160_v42 = vld [vmem:[#allocation7 + $0x214] sm:$0xf] }
  0xd8   : > { %v5254_v52 = vor.u32 %v6322_v41, %v5253_v40  ;;  %v6167_v40 = vld [vmem:[#allocation7 + $0x248] sm:$0xf0] }
  0xd9   : > { %2483 = vmatmul.bf16.vlgmr.msrb.gmra.mxu0 %v7050_v45  ;;  %2496 = vmatmul.bf16.vlgmr.msrb.gmra.mxu1 %v7052_v46 }
  0xda   : > { %2605 = vmatpush.bf16.msrb.mxu0 %v5566_v43  ;;  %2625 = vmatpush.bf16.msrb.mxu1 %v5618_v44  ;;  %v4631_v43 = vld [vmem:[#allocation7 + $0x244] sm:$0xf0]  ;;  %v4526_v44 = vor.u32 %v6140_v35, %v4525_v34  ;;  %v6381_v35 = vld [vmem:[#allocation7 + $0x8fc] sm:$0xf] }
  0xdb   : > { %v4634_v53 = vor.u32 %v6160_v42, %v4631_v43  ;;  %v5518_v42 = vor.u32 %v6381_v35, %v5515_v36  ;;  %v6264_v43 = vld [vmem:[#allocation7 + $0x554] sm:$0xf]  ;;  %v4839_v35 = vld [vmem:[#allocation7 + $0x3e4] sm:$0xf0] }
  0xdc   : > { %v6316_v36 = vld [vmem:[#allocation7 + $0x6f4] sm:$0xf] }
  0xde   : > { %v420_v56 = vpop.f32.mrf.mxu2  ;;  %v433_v57 = vpop.f32.mrf.mxu3  ;;  %2606 = vmatpush.bf16.msrb.mxu0 %v5514_v50  ;;  %v4889_v50 = vld [vmem:[#allocation7 + $0x418] sm:$0xf] }
  0xdf   : > { %v7056_v61 = vpack.c.bf16 %v420_v56, %v420_v56  ;;  %v7058_v62 = vpack.c.bf16 %v433_v57, %v433_v57  ;;  %v409_v3 = vpop.f32.mrf.mxu1  ;;  %v396_v4 = vpop.f32.mrf.mxu0  ;;  %v6147_v56 = vld [vmem:[#allocation7 + $0x1ac] sm:$0xf]  ;;  %v4579_v57 = vld [vmem:[#allocation7 + $0x1dc] sm:$0xf0] }
  0xe0   : > { %v6218_v3 = vld [vmem:[#allocation7 + $0x3e0] sm:$0xf0]  ;;  %v5202_v4 = vor.u32 %v6309_v55, %v5201_v54  ;;  %v4582_v5 = vor.u32 %v6147_v56, %v4579_v57  ;;  %v5157_v55 = vld [vmem:[#allocation7 + $0x628] sm:$0xf]  ;;  %v6297_v56 = vld [vmem:[#allocation7 + $0x658] sm:$0xf0] }
  0xe1   : > { %2509 = vmatmul.bf16.vlgmr.msrb.gmra.mxu2 %v7056_v61  ;;  %5659 = vmatmul.msk.bf16.vlgmr.msrb.gmra.mxu3 %vm2471_vm2, %v7058_v62  ;;  %v4838_v12 = vor.u32 %v6218_v3, %v4837_v2  ;;  %v6154_v54 = vld [vmem:[#allocation7 + $0x1e0] sm:$0xf0]  ;;  %v5411_v2 = vld [vmem:[#allocation7 + $0x85c] sm:$0xf0]  ;;  %v5158_v3 = vor.u32 %v6297_v56, %v5157_v55  ;;  %v5573_v56 = vld [vmem:[#allocation7 + $0x968] sm:$0xf] }
  0xe2   : > { %2579 = vmatpush.bf16.msrb.mxu2 %v4734_v58  ;;  %2592 = vmatpush.bf16.msrb.mxu3 %v5150_v59  ;;  %v4474_v58 = vor.u32 %v6127_v49, %v4473_v48  ;;  %v4890_v59 = vor.u32 %v6231_v51, %v4889_v50  ;;  %v6368_v49 = vld [vmem:[#allocation7 + $0x894] sm:$0xf]  ;;  %v5463_v50 = vld [vmem:[#allocation7 + $0x8c4] sm:$0xf0]  ;;  %v6095_v51 = vld [vmem:[#allocation7 + $0xc] sm:$0xf] }
  0xe3   : > { %2607 = vmatpush.bf16.msrb.mxu0 %v5462_v63  ;;  %v6407_v63 = vld [vmem:[#allocation7 + $0x9cc] sm:$0xf] }
  0xe6   : > { %2580 = vmatpush.bf16.msrb.mxu2 %v4682_v7  ;;  %2593 = vmatpush.bf16.msrb.mxu3 %v5098_v8  ;;  %v422_v18 = vpop.f32.mrf.mxu2  ;;  %v435_v21 = vpop.f32.mrf.mxu3  ;;  %v5622_v7 = vor.u32 %v6407_v63, %v5619_v0  ;;  %v4527_v8 = vld [vmem:[#allocation7 + $0x174] sm:$0xf0]  ;;  %v4995_v0 = vld [vmem:[#allocation7 + $0x51c] sm:$0xf0] }
  0xe7   : > { %2608 = vmatpush.bf16.msrb.mxu0 %v5410_v10  ;;  %v6193_v10 = vld [vmem:[#allocation7 + $0x318] sm:$0xf0]  ;;  %v5151_v18 = vld [vmem:[#allocation7 + $0x654] sm:$0xf0]  ;;  %v6394_v21 = vld [vmem:[#allocation7 + $0x964] sm:$0xf] }
  0xe8   : > { %v5154_v29 = vor.u32 %v6290_v17, %v5151_v18  ;;  %v5570_v30 = vor.u32 %v6394_v21, %v5567_v22  ;;  %v6128_v17 = vld [vmem:[#allocation7 + $0x110] sm:$0xf0]  ;;  %v5053_v18 = vld [vmem:[#allocation7 + $0x558] sm:$0xf]  ;;  %v6225_v22 = vld [vmem:[#allocation7 + $0x41c] sm:$0xf] }
  0xe9   : > { %2548 = vmatmul.bf16.vlgmr.msra.gmra.mxu0 %v7052_v46  ;;  %2561 = vmatmul.bf16.vlgmr.msra.gmra.mxu1 %v7056_v61 }
  0xea   : > { %2581 = vmatpush.bf16.msrb.mxu2 %v4630_v19  ;;  %2594 = vmatpush.bf16.msrb.mxu3 %v5046_v20  ;;  %v4530_v19 = vor.u32 %v6134_v6, %v4527_v8  ;;  %v4742_v20 = vor.u32 %v6193_v10, %v4741_v9  ;;  %v5105_v6 = vld [vmem:[#allocation7 + $0x5c0] sm:$0xf]  ;;  %v5414_v9 = vor.u32 %v6355_v1, %v5411_v2  ;;  %v6238_v10 = vld [vmem:[#allocation7 + $0x484] sm:$0xf] }
  0xeb   : > { %2609 = vmatpush.bf16.msrb.mxu0 %v5358_v26  ;;  %2631 = vmatpush.bf16.msra.mxu1 %v4738_v27  ;;  %v6180_v26 = vld [vmem:[#allocation7 + $0x2b0] sm:$0xf0]  ;;  %v4370_v27 = vor.u32 %v6101_v14, %v4369_v13  ;;  %v5359_v13 = vld [vmem:[#allocation7 + $0x7f4] sm:$0xf0] }
  0xec   : > { %v4690_v34 = vor.u32 %v6180_v26, %v4689_v25  ;;  %v5307_v25 = vld [vmem:[#allocation7 + $0x78c] sm:$0xf0]  ;;  %v4482_v26 = vor.u32 %v6128_v17, %v4481_v16 }
  0xed   : > { %v5055_v16 = vld [vmem:[#allocation7 + $0x58c] sm:$0xf0] }
  0xee   : > { %2582 = vmatpush.bf16.msrb.mxu2 %v4578_v32  ;;  %2595 = vmatpush.bf16.msrb.mxu3 %v4994_v33  ;;  %v5099_v32 = vld [vmem:[#allocation7 + $0x5ec] sm:$0xf0]  ;;  %v4478_v33 = vor.u32 %v6121_v23, %v4475_v24  ;;  %v6329_v24 = vld [vmem:[#allocation7 + $0x75c] sm:$0xf] }
  0xef   : > { %2610 = vmatpush.bf16.msrb.mxu0 %v5306_v38  ;;  %2632 = vmatpush.bf16.msra.mxu1 %v4686_v39  ;;  %v4423_v38 = vld [vmem:[#allocation7 + $0xa4] sm:$0xf0]  ;;  %v4637_v39 = vld [vmem:[#allocation7 + $0x218] sm:$0xf]  ;;  %v5102_v41 = vor.u32 %v6277_v31, %v5099_v32  ;;  %v4891_v23 = vld [vmem:[#allocation7 + $0x44c] sm:$0xf0] }
  0xf0   : > { %v4638_v48 = vor.u32 %v6167_v40, %v4637_v39  ;;  %v6258_v31 = vld [vmem:[#allocation7 + $0x520] sm:$0xf0]  ;;  %v4894_v32 = vor.u32 %v6225_v22, %v4891_v23  ;;  %v4377_v40 = vld [vmem:[#allocation7 + $0x10] sm:$0xf]  ;;  %v5469_v22 = vld [vmem:[#allocation7 + $0x898] sm:$0xf] }
  0xf1   : > { %2535 = vmatmul.bf16.vlgmr.msra.gmra.mxu3 %v7050_v45  ;;  %5660 = vmatmul.msk.bf16.vlgmr.msra.gmra.mxu2 %vm2471_vm2, %v7058_v62  ;;  %v6375_v23 = vld [vmem:[#allocation7 + $0x8c8] sm:$0xf0] }
  0xf2   : > { %2583 = vmatpush.bf16.msrb.mxu2 %v4526_v44  ;;  %2596 = vmatpush.bf16.msrb.mxu3 %v4942_v47  ;;  %v5047_v44 = vld [vmem:[#allocation7 + $0x584] sm:$0xf0]  ;;  %v4426_v47 = vor.u32 %v6108_v37, %v4423_v38 }
  0xf3   : > { %2611 = vmatpush.bf16.msrb.mxu0 %v5254_v52  ;;  %2633 = vmatpush.bf16.msra.mxu1 %v4634_v53  ;;  %v4371_v52 = vld [vmem:[#allocation7 + $0x3c] sm:$0xf0]  ;;  %v4585_v53 = vld [vmem:[#allocation7 + $0x1b0] sm:$0xf]  ;;  %v5050_v57 = vor.u32 %v6264_v43, %v5047_v44  ;;  %v5255_v37 = vld [vmem:[#allocation7 + $0x724] sm:$0xf0] }
  0xf4   : > { %v4374_v60 = vor.u32 %v6095_v51, %v4371_v52  ;;  %v4586_v63 = vor.u32 %v6154_v54, %v4585_v53  ;;  %v6245_v43 = vld [vmem:[#allocation7 + $0x4b8] sm:$0xf0]  ;;  %v4787_v51 = vld [vmem:[#allocation7 + $0x37c] sm:$0xf0]  ;;  %v6303_v52 = vld [vmem:[#allocation7 + $0x68c] sm:$0xf] }
  0xf5   : > { %v5203_v53 = vld [vmem:[#allocation7 + $0x6bc] sm:$0xf0] }
  0xf6   : > { %2584 = vmatpush.bf16.msrb.mxu2 %v4474_v58  ;;  %2597 = vmatpush.bf16.msrb.mxu3 %v4890_v59  ;;  %v5466_v58 = vor.u32 %v6368_v49, %v5463_v50  ;;  %v6251_v59 = vld [vmem:[#allocation7 + $0x4ec] sm:$0xf]  ;;  %v5159_v49 = vld [vmem:[#allocation7 + $0x65c] sm:$0xf0]  ;;  %v5206_v2 = vor.u32 %v6303_v52, %v5203_v53  ;;  %v5365_v52 = vld [vmem:[#allocation7 + $0x7c8] sm:$0xf] }
  0xf7   : > { %2612 = vmatpush.bf16.msrb.mxu0 %v5202_v4  ;;  %2634 = vmatpush.bf16.msra.mxu1 %v4582_v5  ;;  %v4533_v4 = vld [vmem:[#allocation7 + $0x148] sm:$0xf]  ;;  %v6141_v5 = vld [vmem:[#allocation7 + $0x178] sm:$0xf0]  ;;  %v4998_v8 = vor.u32 %v6251_v59, %v4995_v0  ;;  %v6199_v50 = vld [vmem:[#allocation7 + $0x34c] sm:$0xf] }
  0xf8   : > { %v4534_v14 = vor.u32 %v6141_v5, %v4533_v4  ;;  %v6414_v0 = vld [vmem:[#allocation7 + $0xa00] sm:$0xf0]  ;;  %v4790_v1 = vor.u32 %v6199_v50, %v4787_v51  ;;  %v5107_v4 = vld [vmem:[#allocation7 + $0x5f4] sm:$0xf0]  ;;  %v6349_v53 = vld [vmem:[#allocation7 + $0x7f8] sm:$0xf0] }
  0xf9   : > { %5661 = vmatmul.msk.bf16.vlgmr.msrb.gmra.mxu1 %vm2471_vm2, %v7058_v62 }
  0xfa   : > { %2585 = vmatpush.bf16.msrb.mxu2 %v4422_v11  ;;  %2598 = vmatpush.bf16.msrb.mxu3 %v4838_v12  ;;  %v4943_v11 = vld [vmem:[#allocation7 + $0x4b4] sm:$0xf0]  ;;  %v6342_v12 = vld [vmem:[#allocation7 + $0x7c4] sm:$0xf] }
  0xfb   : > { %2677 = vmatpush.bf16.msra.mxu0 %v5622_v7  ;;  %2635 = vmatpush.bf16.msra.mxu1 %v4530_v19  ;;  %v6284_v7 = vld [vmem:[#allocation7 + $0x5f0] sm:$0xf0]  ;;  %v6271_v19 = vld [vmem:[#allocation7 + $0x588] sm:$0xf0]  ;;  %v5362_v21 = vor.u32 %v6342_v12, %v5359_v13  ;;  %v4845_v13 = vld [vmem:[#allocation7 + $0x3b8] sm:$0xf] }
  0xfc   : > { %2613 = vmatmul.bf16.vlgmr.msrb.gmra.mxu0 %v7056_v61  ;;  %v5106_v15 = vor.u32 %v6284_v7, %v5105_v6  ;;  %v6187_v6 = vld [vmem:[#allocation7 + $0x2ec] sm:$0xf] }
  0xfe   : > { %2586 = vmatpush.bf16.msrb.mxu2 %v4370_v27  ;;  %2599 = vmatpush.bf16.msrb.mxu3 %v4786_v28  ;;  %v5054_v27 = vor.u32 %v6271_v19, %v5053_v18  ;;  %v4429_v28 = vld [vmem:[#allocation7 + $0x78] sm:$0xf]  ;;  %v6174_v19 = vld [vmem:[#allocation7 + $0x284] sm:$0xf] }
  0xff   : > { %2683 = vmatpush.bf16.msrb.mxu0 %v4742_v20  ;;  %2636 = vmatpush.bf16.msra.mxu1 %v4478_v33  ;;  %v4946_v20 = vor.u32 %v6238_v10, %v4943_v11  ;;  %v5310_v33 = vor.u32 %v6329_v24, %v5307_v25  ;;  %v5521_v10 = vld [vmem:[#allocation7 + $0x900] sm:$0xf]  ;;  %v6388_v11 = vld [vmem:[#allocation7 + $0x930] sm:$0xf0]  ;;  %v4793_v25 = vld [vmem:[#allocation7 + $0x350] sm:$0xf] }
 0x100   : > { %v5522_v18 = vor.u32 %v6388_v11, %v5521_v10  ;;  %v6122_v10 = vld [vmem:[#allocation7 + $0xe4] sm:$0xf]  ;;  %v4483_v11 = vld [vmem:[#allocation7 + $0x114] sm:$0xf0] }
 0x101   : > { %2587 = vmatmul.bf16.vlgmr.msrb.gmra.mxu2 %v7050_v45  ;;  %2600 = vmatmul.bf16.vlgmr.msrb.gmra.mxu3 %v7052_v46 }
 0x102   : > { %2644 = vmatpush.bf16.msra.mxu2 %v5154_v29  ;;  %2657 = vmatpush.bf16.msra.mxu3 %v5570_v30  ;;  %v6115_v29 = vld [vmem:[#allocation7 + $0xa8] sm:$0xf0]  ;;  %v5001_v30 = vld [vmem:[#allocation7 + $0x4f0] sm:$0xf] }
 0x103   : > { %2684 = vmatpush.bf16.msrb.mxu0 %v4690_v34  ;;  %2637 = vmatpush.bf16.msra.mxu1 %v4426_v47  ;;  %v6212_v34 = vld [vmem:[#allocation7 + $0x3b4] sm:$0xf]  ;;  %v4430_v38 = vor.u32 %v6115_v29, %v4429_v28  ;;  %v5002_v39 = vor.u32 %v6258_v31, %v5001_v30  ;;  %v5258_v47 = vor.u32 %v6316_v36, %v5255_v37  ;;  %v5003_v28 = vld [vmem:[#allocation7 + $0x524] sm:$0xf0]  ;;  %v6395_v29 = vld [vmem:[#allocation7 + $0x96c] sm:$0xf] }
 0x104   : > { %v4842_v44 = vor.u32 %v6212_v34, %v4839_v35  ;;  %v5575_v30 = vld [vmem:[#allocation7 + $0x99c] sm:$0xf0]  ;;  %v6161_v34 = vld [vmem:[#allocation7 + $0x21c] sm:$0xf]  ;;  %v4639_v35 = vld [vmem:[#allocation7 + $0x24c] sm:$0xf0] }
 0x105   : > { %v5578_v37 = vor.u32 %v6395_v29, %v5575_v30  ;;  %v6310_v29 = vld [vmem:[#allocation7 + $0x6c0] sm:$0xf0] }
 0x106   : > { %2645 = vmatpush.bf16.msra.mxu2 %v5102_v41  ;;  %2658 = vmatpush.bf16.msra.mxu3 %v5518_v42  ;;  %v6102_v41 = vld [vmem:[#allocation7 + $0x40] sm:$0xf0]  ;;  %v4949_v42 = vld [vmem:[#allocation7 + $0x488] sm:$0xf] }
 0x107   : > { %2685 = vmatpush.bf16.msrb.mxu0 %v4638_v48  ;;  %2638 = vmatpush.bf16.msra.mxu1 %v4374_v60  ;;  %v6291_v48 = vld [vmem:[#allocation7 + $0x62c] sm:$0xf]  ;;  %v4378_v54 = vor.u32 %v6102_v41, %v4377_v40  ;;  %v4950_v55 = vor.u32 %v6245_v43, %v4949_v42  ;;  %v6232_v60 = vld [vmem:[#allocation7 + $0x450] sm:$0xf0]  ;;  %v4951_v41 = vld [vmem:[#allocation7 + $0x4bc] sm:$0xf0] }
 0x108   : > { %v5162_v59 = vor.u32 %v6291_v48, %v5159_v49  ;;  %v6239_v40 = vld [vmem:[#allocation7 + $0x48c] sm:$0xf]  ;;  %v6382_v42 = vld [vmem:[#allocation7 + $0x904] sm:$0xf]  ;;  %v5523_v43 = vld [vmem:[#allocation7 + $0x934] sm:$0xf0] }
 0x109   : > { %v6148_v48 = vld [vmem:[#allocation7 + $0x1b4] sm:$0xf]  ;;  %v4587_v49 = vld [vmem:[#allocation7 + $0x1e4] sm:$0xf0]  ;;  %v4954_v50 = vor.u32 %v6239_v40, %v4951_v41  ;;  %v5526_v51 = vor.u32 %v6382_v42, %v5523_v43  ;;  %v6330_v30 = vld [vmem:[#allocation7 + $0x764] sm:$0xf] }
 0x10a   : > { %2646 = vmatpush.bf16.msra.mxu2 %v5050_v57  ;;  %2659 = vmatpush.bf16.msra.mxu3 %v5466_v58  ;;  %v6401_v57 = vld [vmem:[#allocation7 + $0x998] sm:$0xf0]  ;;  %v4897_v58 = vld [vmem:[#allocation7 + $0x420] sm:$0xf]  ;;  %v4379_v40 = vld [vmem:[#allocation7 + $0x44] sm:$0xf0] }
 0x10b   : > { %2686 = vmatpush.bf16.msrb.mxu0 %v4586_v63  ;;  %2696 = vmatpush.bf16.msrb.mxu1 %v5158_v3  ;;  %v5625_v63 = vld [vmem:[#allocation7 + $0x9d0] sm:$0xf]  ;;  %v6278_v3 = vld [vmem:[#allocation7 + $0x5c4] sm:$0xf]  ;;  %v5574_v5 = vor.u32 %v6401_v57, %v5573_v56  ;;  %v4898_v7 = vor.u32 %v6232_v60, %v4897_v58  ;;  %v6369_v56 = vld [vmem:[#allocation7 + $0x89c] sm:$0xf]  ;;  %v4590_v58 = vor.u32 %v6148_v48, %v4587_v49 }
 0x10c   : > { %2639 = vmatmul.bf16.vlgmr.msra.gmra.mxu1 %v7050_v45  ;;  %5662 = vmatmul.msk.bf16.vlgmr.msra.gmra.mxu0 %vm2471_vm2, %v7058_v62  ;;  %v5110_v12 = vor.u32 %v6278_v3, %v5107_v4  ;;  %v5471_v57 = vld [vmem:[#allocation7 + $0x8cc] sm:$0xf0]  ;;  %v6135_v60 = vld [vmem:[#allocation7 + $0x14c] sm:$0xf]  ;;  %v6336_v3 = vld [vmem:[#allocation7 + $0x790] sm:$0xf0] }
 0x10d   : > { %v6213_v4 = vld [vmem:[#allocation7 + $0x3bc] sm:$0xf]  ;;  %v4749_v41 = vld [vmem:[#allocation7 + $0x2f0] sm:$0xf]  ;;  %v6298_v48 = vld [vmem:[#allocation7 + $0x660] sm:$0xf0] }
 0x10e   : > { %2647 = vmatpush.bf16.msra.mxu2 %v4998_v8  ;;  %2660 = vmatpush.bf16.msra.mxu3 %v5414_v9  ;;  %v5626_v8 = vor.u32 %v6414_v0, %v5625_v63  ;;  %v4743_v9 = vld [vmem:[#allocation7 + $0x31c] sm:$0xf0] }
 0x10f   : > { %2687 = vmatpush.bf16.msrb.mxu0 %v4534_v14  ;;  %2697 = vmatpush.bf16.msrb.mxu1 %v5106_v15  ;;  %v6219_v14 = vld [vmem:[#allocation7 + $0x3e8] sm:$0xf0]  ;;  %v6265_v15 = vld [vmem:[#allocation7 + $0x55c] sm:$0xf]  ;;  %v4746_v17 = vor.u32 %v6187_v6, %v4743_v9  ;;  %v4535_v63 = vld [vmem:[#allocation7 + $0x17c] sm:$0xf0] }
 0x110   : > { %v5058_v24 = vor.u32 %v6265_v15, %v5055_v16  ;;  %v6356_v6 = vld [vmem:[#allocation7 + $0x834] sm:$0xf]  ;;  %v6323_v15 = vld [vmem:[#allocation7 + $0x728] sm:$0xf0] }
 0x111   : > { %v6200_v16 = vld [vmem:[#allocation7 + $0x354] sm:$0xf] }
 0x112   : > { %2648 = vmatpush.bf16.msra.mxu2 %v4946_v20  ;;  %2661 = vmatpush.bf16.msra.mxu3 %v5362_v21  ;;  %v4846_v20 = vor.u32 %v6219_v14, %v4845_v13  ;;  %v4691_v21 = vld [vmem:[#allocation7 + $0x2b4] sm:$0xf0] }
 0x113   : > { %2688 = vmatpush.bf16.msrb.mxu0 %v4482_v26  ;;  %2698 = vmatpush.bf16.msrb.mxu1 %v5054_v27  ;;  %v6206_v26 = vld [vmem:[#allocation7 + $0x380] sm:$0xf0]  ;;  %v6252_v27 = vld [vmem:[#allocation7 + $0x4f4] sm:$0xf]  ;;  %v4694_v31 = vor.u32 %v6174_v19, %v4691_v21  ;;  %v5261_v14 = vld [vmem:[#allocation7 + $0x6f8] sm:$0xf] }
 0x114   : > { %v5006_v36 = vor.u32 %v6252_v27, %v5003_v28  ;;  %v5367_v19 = vld [vmem:[#allocation7 + $0x7fc] sm:$0xf0]  ;;  %v5581_v21 = vld [vmem:[#allocation7 + $0x970] sm:$0xf] }
 0x115   : > { %v5209_v28 = vld [vmem:[#allocation7 + $0x690] sm:$0xf] }
 0x116   : > { %2649 = vmatpush.bf16.msra.mxu2 %v4894_v32  ;;  %2662 = vmatpush.bf16.msra.mxu3 %v5310_v33  ;;  %v5470_v32 = vor.u32 %v6375_v23, %v5469_v22  ;;  %v4794_v33 = vor.u32 %v6206_v26, %v4793_v25  ;;  %v6402_v22 = vld [vmem:[#allocation7 + $0x9a0] sm:$0xf0]  ;;  %v5262_v23 = vor.u32 %v6323_v15, %v5261_v14  ;;  %v4431_v25 = vld [vmem:[#allocation7 + $0xac] sm:$0xf0] }
 0x117   : > { %2689 = vmatpush.bf16.msrb.mxu0 %v4430_v38  ;;  %2699 = vmatpush.bf16.msrb.mxu1 %v5002_v39  ;;  %v5417_v38 = vld [vmem:[#allocation7 + $0x830] sm:$0xf]  ;;  %v6362_v39 = vld [vmem:[#allocation7 + $0x860] sm:$0xf0] }
 0x11a   : > { %2650 = vmatpush.bf16.msra.mxu2 %v4842_v44  ;;  %2663 = vmatpush.bf16.msra.mxu3 %v5258_v47  ;;  %v4642_v44 = vor.u32 %v6161_v34, %v4639_v35  ;;  %v5418_v47 = vor.u32 %v6362_v39, %v5417_v38  ;;  %v5627_v34 = vld [vmem:[#allocation7 + $0xa04] sm:$0xf0]  ;;  %v5210_v38 = vor.u32 %v6310_v29, %v5209_v28  ;;  %v6096_v39 = vld [vmem:[#allocation7 + $0x14] sm:$0xf]  ;;  %v6337_v29 = vld [vmem:[#allocation7 + $0x798] sm:$0xf0] }
 0x11b   : > { %2690 = vmatpush.bf16.msrb.mxu0 %v4378_v54  ;;  %2700 = vmatpush.bf16.msrb.mxu1 %v4950_v55  ;;  %v6226_v54 = vld [vmem:[#allocation7 + $0x424] sm:$0xf]  ;;  %v4899_v55 = vld [vmem:[#allocation7 + $0x454] sm:$0xf0]  ;;  %v5321_v28 = vld [vmem:[#allocation7 + $0x768] sm:$0xf] }
 0x11c   : > { %v4902_v0 = vor.u32 %v6226_v54, %v4899_v55  ;;  %v6376_v54 = vld [vmem:[#allocation7 + $0x8d0] sm:$0xf0] }
 0x11e   : > { %2651 = vmatpush.bf16.msra.mxu2 %v4790_v1  ;;  %2664 = vmatpush.bf16.msra.mxu3 %v5206_v2  ;;  %v5474_v1 = vor.u32 %v6369_v56, %v5471_v57  ;;  %v5313_v2 = vld [vmem:[#allocation7 + $0x760] sm:$0xf]  ;;  %v4697_v57 = vld [vmem:[#allocation7 + $0x288] sm:$0xf] }
 0x11f   : > { %2748 = vmatpush.bf16.msra.mxu0 %v5162_v59  ;;  %2701 = vmatpush.bf16.msrb.mxu1 %v4898_v7  ;;  %v5366_v59 = vor.u32 %v6349_v53, %v5365_v52  ;;  %v5419_v7 = vld [vmem:[#allocation7 + $0x864] sm:$0xf0]  ;;  %v5314_v9 = vor.u32 %v6336_v3, %v5313_v2  ;;  %v4382_v52 = vor.u32 %v6096_v39, %v4379_v40  ;;  %v5477_v53 = vld [vmem:[#allocation7 + $0x8a0] sm:$0xf]  ;;  %v5425_v3 = vld [vmem:[#allocation7 + $0x838] sm:$0xf] }
 0x120   : > { %2691 = vmatmul.bf16.vlgmr.msrb.gmra.mxu0 %v7050_v45  ;;  %v5422_v13 = vor.u32 %v6356_v6, %v5419_v7  ;;  %v5211_v2 = vld [vmem:[#allocation7 + $0x6c4] sm:$0xf0]  ;;  %v6415_v6 = vld [vmem:[#allocation7 + $0xa08] sm:$0xf0]  ;;  %v5269_v40 = vld [vmem:[#allocation7 + $0x700] sm:$0xf] }
 0x121   : > { %2652 = vmatmul.bf16.vlgmr.msra.gmra.mxu2 %v7052_v46  ;;  %2665 = vmatmul.bf16.vlgmr.msra.gmra.mxu3 %v7056_v61 }
 0x122   : > { %2709 = vmatpush.bf16.msrb.mxu2 %v5574_v5  ;;  %2729 = vmatpush.bf16.msrb.mxu3 %v5626_v8  ;;  %v4847_v5 = vld [vmem:[#allocation7 + $0x3ec] sm:$0xf0]  ;;  %v4538_v8 = vor.u32 %v6135_v60, %v4535_v63  ;;  %v5113_v60 = vld [vmem:[#allocation7 + $0x5c8] sm:$0xf]  ;;  %v6285_v63 = vld [vmem:[#allocation7 + $0x5f8] sm:$0xf0] }
 0x123   : > { %2749 = vmatpush.bf16.msra.mxu0 %v5110_v12  ;;  %2702 = vmatpush.bf16.msrb.mxu1 %v4846_v20  ;;  %v4850_v12 = vor.u32 %v6213_v4, %v4847_v5  ;;  %v4486_v20 = vor.u32 %v6122_v10, %v4483_v11  ;;  %v6363_v4 = vld [vmem:[#allocation7 + $0x868] sm:$0xf0]  ;;  %v5633_v5 = vld [vmem:[#allocation7 + $0x9d8] sm:$0xf]  ;;  %v6168_v11 = vld [vmem:[#allocation7 + $0x250] sm:$0xf0] }
 0x124   : > { %v5426_v14 = vor.u32 %v6363_v4, %v5425_v3  ;;  %v5634_v15 = vor.u32 %v6415_v6, %v5633_v5  ;;  %v6220_v3 = vld [vmem:[#allocation7 + $0x3f0] sm:$0xf0] }
 0x125   : > { %v6136_v6 = vld [vmem:[#allocation7 + $0x154] sm:$0xf] }
 0x126   : > { %2735 = vmatpush.bf16.msra.mxu3 %v4746_v17  ;;  %2710 = vmatpush.bf16.msrb.mxu2 %v5522_v18  ;;  %v4795_v17 = vld [vmem:[#allocation7 + $0x384] sm:$0xf0]  ;;  %v6343_v18 = vld [vmem:[#allocation7 + $0x7cc] sm:$0xf] }
 0x127   : > { %2750 = vmatpush.bf16.msra.mxu0 %v5058_v24  ;;  %2703 = vmatpush.bf16.msrb.mxu1 %v4794_v33  ;;  %v6109_v24 = vld [vmem:[#allocation7 + $0x7c] sm:$0xf]  ;;  %v4798_v26 = vor.u32 %v6200_v16, %v4795_v17  ;;  %v5370_v27 = vor.u32 %v6343_v18, %v5367_v19  ;;  %v6408_v33 = vld [vmem:[#allocation7 + $0x9d4] sm:$0xf]  ;;  %v5373_v16 = vld [vmem:[#allocation7 + $0x7d0] sm:$0xf] }
 0x128   : > { %v4434_v35 = vor.u32 %v6109_v24, %v4431_v25  ;;  %v5630_v43 = vor.u32 %v6408_v33, %v5627_v34  ;;  %v6350_v17 = vld [vmem:[#allocation7 + $0x800] sm:$0xf0]  ;;  %v6188_v18 = vld [vmem:[#allocation7 + $0x2f4] sm:$0xf]  ;;  %v4751_v19 = vld [vmem:[#allocation7 + $0x324] sm:$0xf0] }
 0x129   : > { %v5009_v24 = vld [vmem:[#allocation7 + $0x4f8] sm:$0xf]  ;;  %v6259_v25 = vld [vmem:[#allocation7 + $0x528] sm:$0xf0]  ;;  %v4541_v34 = vld [vmem:[#allocation7 + $0x150] sm:$0xf] }
 0x12a   : > { %2736 = vmatpush.bf16.msra.mxu3 %v4694_v31  ;;  %2711 = vmatpush.bf16.msrb.mxu2 %v5470_v32  ;;  %v5582_v31 = vor.u32 %v6402_v22, %v5581_v21  ;;  %v5315_v32 = vld [vmem:[#allocation7 + $0x794] sm:$0xf0]  ;;  %v5010_v33 = vor.u32 %v6259_v25, %v5009_v24  ;;  %v6123_v24 = vld [vmem:[#allocation7 + $0xec] sm:$0xf]  ;;  %v4491_v25 = vld [vmem:[#allocation7 + $0x11c] sm:$0xf0] }
 0x12b   : > { %2751 = vmatpush.bf16.msra.mxu0 %v5006_v36  ;;  %2761 = vmatpush.bf16.msra.mxu1 %v5578_v37  ;;  %v5529_v36 = vld [vmem:[#allocation7 + $0x908] sm:$0xf]  ;;  %v6389_v37 = vld [vmem:[#allocation7 + $0x938] sm:$0xf0]  ;;  %v5318_v42 = vor.u32 %v6330_v30, %v5315_v32  ;;  %v4593_v22 = vld [vmem:[#allocation7 + $0x1b8] sm:$0xf] }
 0x12c   : > { %2704 = vmatmul.bf16.vlgmr.msrb.gmra.mxu1 %v7052_v46  ;;  %v5530_v49 = vor.u32 %v6389_v37, %v5529_v36  ;;  %v6175_v30 = vld [vmem:[#allocation7 + $0x28c] sm:$0xf]  ;;  %v4957_v36 = vld [vmem:[#allocation7 + $0x490] sm:$0xf]  ;;  %v6246_v37 = vld [vmem:[#allocation7 + $0x4c0] sm:$0xf0] }
 0x12e   : > { %2737 = vmatpush.bf16.msra.mxu3 %v4642_v44  ;;  %2712 = vmatpush.bf16.msrb.mxu2 %v5418_v47  ;;  %v6194_v44 = vld [vmem:[#allocation7 + $0x320] sm:$0xf0]  ;;  %v5165_v47 = vld [vmem:[#allocation7 + $0x630] sm:$0xf] }
 0x12f   : > { %2752 = vmatpush.bf16.msra.mxu0 %v4954_v50  ;;  %2762 = vmatpush.bf16.msra.mxu1 %v5526_v51  ;;  %v6317_v50 = vld [vmem:[#allocation7 + $0x6fc] sm:$0xf]  ;;  %v5263_v51 = vld [vmem:[#allocation7 + $0x72c] sm:$0xf0]  ;;  %v4750_v55 = vor.u32 %v6194_v44, %v4749_v41  ;;  %v5166_v56 = vor.u32 %v6298_v48, %v5165_v47  ;;  %v6324_v41 = vld [vmem:[#allocation7 + $0x730] sm:$0xf0]  ;;  %v4958_v47 = vor.u32 %v6246_v37, %v4957_v36 }
 0x130   : > { %v4489_v48 = vld [vmem:[#allocation7 + $0xe8] sm:$0xf]  ;;  %v4494_v37 = vor.u32 %v6123_v24, %v4491_v25  ;;  %v6344_v25 = vld [vmem:[#allocation7 + $0x7d4] sm:$0xf] }
 0x131   : > { %5663 = vmatmul.msk.bf16.vlgmr.msrb.gmra.mxu3 %vm2471_vm2, %v7058_v62 }
 0x132   : > { %2738 = vmatpush.bf16.msra.mxu3 %v4590_v58  ;;  %2713 = vmatpush.bf16.msrb.mxu2 %v5366_v59  ;;  %v5266_v58 = vor.u32 %v6317_v50, %v5263_v51  ;;  %v6181_v59 = vld [vmem:[#allocation7 + $0x2b8] sm:$0xf0]  ;;  %v4905_v50 = vld [vmem:[#allocation7 + $0x428] sm:$0xf] }
 0x133   : > { %2753 = vmatpush.bf16.msra.mxu0 %v4902_v0  ;;  %2763 = vmatpush.bf16.msra.mxu1 %v5474_v1  ;;  %v5478_v0 = vor.u32 %v6376_v54, %v5477_v53  ;;  %v6304_v1 = vld [vmem:[#allocation7 + $0x694] sm:$0xf]  ;;  %v4698_v7 = vor.u32 %v6181_v59, %v4697_v57  ;;  %v6233_v51 = vld [vmem:[#allocation7 + $0x458] sm:$0xf0]  ;;  %v5217_v54 = vld [vmem:[#allocation7 + $0x698] sm:$0xf] }
 0x134   : > { %v5214_v10 = vor.u32 %v6304_v1, %v5211_v2  ;;  %v4595_v57 = vld [vmem:[#allocation7 + $0x1ec] sm:$0xf0]  ;;  %v4906_v59 = vor.u32 %v6233_v51, %v4905_v50  ;;  %v6116_v1 = vld [vmem:[#allocation7 + $0xb0] sm:$0xf0]  ;;  %v4853_v2 = vld [vmem:[#allocation7 + $0x3c0] sm:$0xf] }
 0x135   : > { %v6266_v51 = vld [vmem:[#allocation7 + $0x564] sm:$0xf] }
 0x136   : > { %2739 = vmatpush.bf16.msra.mxu3 %v4538_v8  ;;  %2714 = vmatpush.bf16.msrb.mxu2 %v5314_v9  ;;  %v5114_v8 = vor.u32 %v6285_v63, %v5113_v60  ;;  %v4645_v9 = vld [vmem:[#allocation7 + $0x220] sm:$0xf]  ;;  %v6409_v63 = vld [vmem:[#allocation7 + $0x9dc] sm:$0xf] }
 0x137   : > { %2754 = vmatpush.bf16.msra.mxu0 %v4850_v12  ;;  %2764 = vmatpush.bf16.msra.mxu1 %v5422_v13  ;;  %v5061_v12 = vld [vmem:[#allocation7 + $0x560] sm:$0xf]  ;;  %v6272_v13 = vld [vmem:[#allocation7 + $0x590] sm:$0xf0] }
 0x138   : > { %v5062_v21 = vor.u32 %v6272_v13, %v5061_v12  ;;  %v4437_v60 = vld [vmem:[#allocation7 + $0x80] sm:$0xf]  ;;  %v6103_v12 = vld [vmem:[#allocation7 + $0x48] sm:$0xf0] }
 0x139   : > { %v4438_v13 = vor.u32 %v6116_v1, %v4437_v60  ;;  %v6156_v60 = vld [vmem:[#allocation7 + $0x1f0] sm:$0xf0] }
 0x13a   : > { %2740 = vmatpush.bf16.msra.mxu3 %v4486_v20  ;;  %2715 = vmatpush.bf16.msrb.mxu2 %v5262_v23  ;;  %v4646_v20 = vor.u32 %v6168_v11, %v4645_v9  ;;  %v6155_v23 = vld [vmem:[#allocation7 + $0x1e8] sm:$0xf0]  ;;  %v4385_v11 = vld [vmem:[#allocation7 + $0x18] sm:$0xf] }
 0x13b   : > { %2755 = vmatpush.bf16.msra.mxu0 %v4798_v26  ;;  %2765 = vmatpush.bf16.msra.mxu1 %v5370_v27  ;;  %v5374_v26 = vor.u32 %v6350_v17, %v5373_v16  ;;  %v4754_v27 = vor.u32 %v6188_v18, %v4751_v19  ;;  %v4594_v32 = vor.u32 %v6155_v23, %v4593_v22  ;;  %v6207_v16 = vld [vmem:[#allocation7 + $0x388] sm:$0xf0]  ;;  %v6292_v18 = vld [vmem:[#allocation7 + $0x634] sm:$0xf]  ;;  %v5167_v19 = vld [vmem:[#allocation7 + $0x664] sm:$0xf0] }
 0x13c   : > { %v7088_v17 = vld [vmem:[#allocation8] sm:$0xff] }
 0x13d   : > { %v5583_v23 = vld [vmem:[#allocation7 + $0x9a4] sm:$0xf0] }
 0x13e   : > { %2741 = vmatpush.bf16.msra.mxu3 %v4434_v35  ;;  %2716 = vmatpush.bf16.msrb.mxu2 %v5210_v38  ;;  %v6142_v35 = vld [vmem:[#allocation7 + $0x180] sm:$0xf0]  ;;  %v5322_v38 = vor.u32 %v6337_v29, %v5321_v28  ;;  %v4386_v29 = vor.u32 %v6103_v12, %v4385_v11  ;;  %v5427_v11 = vld [vmem:[#allocation7 + $0x86c] sm:$0xf0]  ;;  %v4549_v12 = vld [vmem:[#allocation7 + $0x158] sm:$0xf] }
 0x13f   : > { %2813 = vmatpush.bf16.msrb.mxu0 %v5582_v31  ;;  %2766 = vmatpush.bf16.msra.mxu1 %v5318_v42  ;;  %v4699_v31 = vld [vmem:[#allocation7 + $0x2bc] sm:$0xf0]  ;;  %v6162_v42 = vld [vmem:[#allocation7 + $0x224] sm:$0xf]  ;;  %v4542_v44 = vor.u32 %v6142_v35, %v4541_v34 }
 0x140   : > { %2756 = vmatmul.bf16.vlgmr.msra.gmra.mxu0 %v7052_v46  ;;  %v4702_v39 = vor.u32 %v6175_v30, %v4699_v31  ;;  %v6182_v28 = vld [vmem:[#allocation7 + $0x2c0] sm:$0xf0]  ;;  %v5170_v31 = vor.u32 %v6292_v18, %v5167_v19  ;;  %v5115_v34 = vld [vmem:[#allocation7 + $0x5fc] sm:$0xf0]  ;;  %v6240_v19 = vld [vmem:[#allocation7 + $0x494] sm:$0xf] }
 0x141   : > { %2717 = vmatmul.bf16.vlgmr.msrb.gmra.mxu2 %v7056_v61 }
 0x142   : > { %2781 = vmatpush.bf16.msra.mxu2 %v5630_v43  ;;  %2742 = vmatpush.bf16.msra.mxu3 %v4382_v52  ;;  %v4647_v43 = vld [vmem:[#allocation7 + $0x254] sm:$0xf0]  ;;  %v5270_v52 = vor.u32 %v6324_v41, %v5269_v40  ;;  %v5531_v40 = vld [vmem:[#allocation7 + $0x93c] sm:$0xf0]  ;;  %v6110_v41 = vld [vmem:[#allocation7 + $0x84] sm:$0xf] }
 0x143   : > { %2814 = vmatpush.bf16.msrb.mxu0 %v5530_v49  ;;  %2767 = vmatpush.bf16.msra.mxu1 %v5266_v58  ;;  %v6129_v49 = vld [vmem:[#allocation7 + $0x118] sm:$0xf0]  ;;  %v4650_v53 = vor.u32 %v6162_v42, %v4647_v43  ;;  %v4439_v43 = vld [vmem:[#allocation7 + $0xb4] sm:$0xf0] }
 0x144   : > { %v4490_v58 = vor.u32 %v6129_v49, %v4489_v48 }
 0x145   : > { %2743 = vmatmul.bf16.vlgmr.msra.gmra.mxu3 %v7050_v45 }
 0x146   : > { %2787 = vmatpush.bf16.msrb.mxu2 %v4750_v55  ;;  %2800 = vmatpush.bf16.msrb.mxu3 %v5166_v56  ;;  %v6311_v55 = vld [vmem:[#allocation7 + $0x6c8] sm:$0xf0]  ;;  %v6149_v56 = vld [vmem:[#allocation7 + $0x1bc] sm:$0xf] }
 0x147   : > { %2815 = vmatpush.bf16.msrb.mxu0 %v5478_v0  ;;  %2768 = vmatpush.bf16.msra.mxu1 %v5214_v10  ;;  %v5635_v0 = vld [vmem:[#allocation7 + $0xa0c] sm:$0xf0]  ;;  %v5218_v4 = vor.u32 %v6311_v55, %v5217_v54  ;;  %v4598_v5 = vor.u32 %v6149_v56, %v4595_v57  ;;  %v6195_v10 = vld [vmem:[#allocation7 + $0x328] sm:$0xf0]  ;;  %v6370_v55 = vld [vmem:[#allocation7 + $0x8a4] sm:$0xf] }
 0x148   : > { %v5638_v9 = vor.u32 %v6409_v63, %v5635_v0  ;;  %v5479_v56 = vld [vmem:[#allocation7 + $0x8d4] sm:$0xf0]  ;;  %v6097_v57 = vld [vmem:[#allocation7 + $0x1c] sm:$0xf]  ;;  %v6299_v0 = vld [vmem:[#allocation7 + $0x668] sm:$0xf0] }
 0x149   : > { %v5173_v63 = vld [vmem:[#allocation7 + $0x638] sm:$0xf] }
 0x14a   : > { %2788 = vmatpush.bf16.msrb.mxu2 %v4698_v7  ;;  %2801 = vmatpush.bf16.msrb.mxu3 %v5114_v8  ;;  %v4543_v7 = vld [vmem:[#allocation7 + $0x184] sm:$0xf0]  ;;  %v4757_v8 = vld [vmem:[#allocation7 + $0x2f8] sm:$0xf] }
 0x14b   : > { %2816 = vmatpush.bf16.msrb.mxu0 %v5426_v14  ;;  %2833 = vmatpush.bf16.msrb.mxu1 %v5634_v15  ;;  %v4854_v14 = vor.u32 %v6220_v3, %v4853_v2  ;;  %v4801_v15 = vld [vmem:[#allocation7 + $0x358] sm:$0xf]  ;;  %v4758_v22 = vor.u32 %v6195_v10, %v4757_v8  ;;  %v5482_v2 = vor.u32 %v6370_v55, %v5479_v56  ;;  %v5011_v8 = vld [vmem:[#allocation7 + $0x52c] sm:$0xf0]  ;;  %v6357_v10 = vld [vmem:[#allocation7 + $0x83c] sm:$0xf] }
 0x14c   : > { %2769 = vmatmul.bf16.vlgmr.msra.gmra.mxu1 %v7056_v61  ;;  %v4802_v30 = vor.u32 %v6207_v16, %v4801_v15  ;;  %v6286_v15 = vld [vmem:[#allocation7 + $0x600] sm:$0xf0]  ;;  %v5430_v18 = vor.u32 %v6357_v10, %v5427_v11 }
 0x14e   : > { %2789 = vmatpush.bf16.msrb.mxu2 %v4646_v20  ;;  %2802 = vmatpush.bf16.msrb.mxu3 %v5062_v21  ;;  %v6396_v20 = vld [vmem:[#allocation7 + $0x974] sm:$0xf]  ;;  %v4546_v21 = vor.u32 %v6136_v6, %v4543_v7  ;;  %v6253_v7 = vld [vmem:[#allocation7 + $0x4fc] sm:$0xf] }
 0x14f   : > { %2817 = vmatpush.bf16.msrb.mxu0 %v5374_v26  ;;  %2839 = vmatpush.bf16.msra.mxu1 %v4754_v27  ;;  %v795_v26 = vperm.slane %v7088_v17, 0  ;;  %v4705_v27 = vld [vmem:[#allocation7 + $0x290] sm:$0xf]  ;;  %v5014_v16 = vor.u32 %v6253_v7, %v5011_v8  ;;  %v6305_v7 = vld [vmem:[#allocation7 + $0x69c] sm:$0xf] }
 0x151   : > { %5664 = vmatmul.msk.bf16.vlgmr.msra.gmra.mxu2 %vm2471_vm2, %v7058_v62 }
 0x152   : > { %2790 = vmatpush.bf16.msrb.mxu2 %v4594_v32  ;;  %2803 = vmatpush.bf16.msrb.mxu3 %v5010_v33  ;;  %v5586_v32 = vor.u32 %v6396_v20, %v5583_v23  ;;  %v6279_v33 = vld [vmem:[#allocation7 + $0x5cc] sm:$0xf]  ;;  %v4959_v20 = vld [vmem:[#allocation7 + $0x4c4] sm:$0xf0] }
 0x153   : > { %2818 = vmatpush.bf16.msrb.mxu0 %v5322_v38  ;;  %2840 = vmatpush.bf16.msra.mxu1 %v4702_v39  ;;  %v4706_v38 = vor.u32 %v6182_v28, %v4705_v27  ;;  %v6383_v39 = vld [vmem:[#allocation7 + $0x90c] sm:$0xf]  ;;  %v5118_v49 = vor.u32 %v6279_v33, %v5115_v34  ;;  %v4497_v27 = vld [vmem:[#allocation7 + $0xf0] sm:$0xf] }
 0x154   : > { %v5534_v50 = vor.u32 %v6383_v39, %v5531_v40 }
 0x156   : > { %2791 = vmatpush.bf16.msrb.mxu2 %v4542_v44  ;;  %2804 = vmatpush.bf16.msrb.mxu3 %v4958_v47  ;;  %v2484_v35 = vpop.f32.mrf.mxu0  ;;  %v2497_v36 = vpop.f32.mrf.mxu1  ;;  %v4653_v44 = vld [vmem:[#allocation7 + $0x228] sm:$0xf]  ;;  %v6169_v47 = vld [vmem:[#allocation7 + $0x258] sm:$0xf0] }
 0x157   : > { %2819 = vmatpush.bf16.msrb.mxu0 %v5270_v52  ;;  %2841 = vmatpush.bf16.msra.mxu1 %v4650_v53  ;;  %v2485_v42 = vadd.f32 %v2484_v35, %v795_v26  ;;  %v5063_v52 = vld [vmem:[#allocation7 + $0x594] sm:$0xf0]  ;;  %v4442_v53 = vor.u32 %v6110_v41, %v4439_v43  ;;  %v4654_v54 = vor.u32 %v6169_v47, %v4653_v44  ;;  %v5375_v26 = vld [vmem:[#allocation7 + $0x804] sm:$0xf0]  ;;  %v6227_v35 = vld [vmem:[#allocation7 + $0x42c] sm:$0xf] }
 0x158   : > { %v5066_v1 = vor.u32 %v6266_v51, %v5063_v52  ;;  %v5378_v34 = vor.u32 %v6344_v25, %v5375_v26  ;;  %v6331_v41 = vld [vmem:[#allocation7 + $0x76c] sm:$0xf]  ;;  %v4445_v43 = vld [vmem:[#allocation7 + $0x88] sm:$0xf]  ;;  %v6117_v44 = vld [vmem:[#allocation7 + $0xb8] sm:$0xf0] }
 0x159   : > { %v2498_v48 = vadd.f32 %v2497_v36, %v2485_v42  ;;  %v4907_v36 = vld [vmem:[#allocation7 + $0x45c] sm:$0xf0]  ;;  %v6214_v51 = vld [vmem:[#allocation7 + $0x3c4] sm:$0xf]  ;;  %v4855_v52 = vld [vmem:[#allocation7 + $0x3f4] sm:$0xf0]  ;;  %v4446_v55 = vor.u32 %v6117_v44, %v4445_v43 }
 0x15a   : > { %2792 = vmatpush.bf16.msrb.mxu2 %v4490_v58  ;;  %2805 = vmatpush.bf16.msrb.mxu3 %v4906_v59  ;;  %v4387_v58 = vld [vmem:[#allocation7 + $0x4c] sm:$0xf0]  ;;  %v4601_v59 = vld [vmem:[#allocation7 + $0x1c0] sm:$0xf] }
 0x15b   : > { %2820 = vmatpush.bf16.msrb.mxu0 %v5218_v4  ;;  %2842 = vmatpush.bf16.msra.mxu1 %v4598_v5  ;;  %v4390_v5 = vor.u32 %v6097_v57, %v4387_v58  ;;  %v4602_v6 = vor.u32 %v6156_v60, %v4601_v59  ;;  %v5323_v42 = vld [vmem:[#allocation7 + $0x79c] sm:$0xf0]  ;;  %v6318_v57 = vld [vmem:[#allocation7 + $0x704] sm:$0xf]  ;;  %v5271_v58 = vld [vmem:[#allocation7 + $0x734] sm:$0xf0] }
 0x15c   : > { %5665 = vmatmul.msk.bf16.vlgmr.msrb.gmra.mxu1 %vm2471_vm2, %v7058_v62  ;;  %v5017_v47 = vld [vmem:[#allocation7 + $0x500] sm:$0xf]  ;;  %v6104_v60 = vld [vmem:[#allocation7 + $0x50] sm:$0xf0] }
 0x15d   : > { %v4393_v59 = vld [vmem:[#allocation7 + $0x20] sm:$0xf] }
 0x15e   : > { %2793 = vmatpush.bf16.msrb.mxu2 %v4438_v13  ;;  %2806 = vmatpush.bf16.msrb.mxu3 %v4854_v14  ;;  %v2486_v3 = vpop.f32.mrf.mxu0  ;;  %v2499_v4 = vpop.f32.mrf.mxu1  ;;  %v6143_v13 = vld [vmem:[#allocation7 + $0x188] sm:$0xf0]  ;;  %v5121_v14 = vld [vmem:[#allocation7 + $0x5d0] sm:$0xf]  ;;  %v4394_v10 = vor.u32 %v6104_v60, %v4393_v59  ;;  %v6254_v59 = vld [vmem:[#allocation7 + $0x504] sm:$0xf] }
 0x15f   : > { %2885 = vmatpush.bf16.msra.mxu0 %v5638_v9  ;;  %2843 = vmatpush.bf16.msra.mxu1 %v4546_v21  ;;  %v5174_v9 = vor.u32 %v6299_v0, %v5173_v63  ;;  %v4550_v23 = vor.u32 %v6143_v13, %v4549_v12  ;;  %v5122_v24 = vor.u32 %v6286_v15, %v5121_v14  ;;  %v4965_v63 = vld [vmem:[#allocation7 + $0x498] sm:$0xf]  ;;  %v6247_v0 = vld [vmem:[#allocation7 + $0x4c8] sm:$0xf0]  ;;  %v5175_v3 = vld [vmem:[#allocation7 + $0x66c] sm:$0xf0] }
 0x160   : > { %2821 = vmatmul.bf16.vlgmr.msrb.gmra.mxu0 %v7056_v61  ;;  %v5274_v4 = vor.u32 %v6318_v57, %v5271_v58  ;;  %v4966_v11 = vor.u32 %v6247_v0, %v4965_v63  ;;  %v796_v12 = vperm.slane %v7088_v17, 1  ;;  %v5219_v13 = vld [vmem:[#allocation7 + $0x6cc] sm:$0xf0]  ;;  %v5589_v14 = vld [vmem:[#allocation7 + $0x978] sm:$0xf] }
 0x161   : > { %v4809_v57 = vld [vmem:[#allocation7 + $0x360] sm:$0xf]  ;;  %v6208_v58 = vld [vmem:[#allocation7 + $0x390] sm:$0xf0]  ;;  %v5019_v60 = vld [vmem:[#allocation7 + $0x534] sm:$0xf0] }
 0x162   : > { %2794 = vmatpush.bf16.msrb.mxu2 %v4386_v29  ;;  %2807 = vmatpush.bf16.msrb.mxu3 %v4802_v30  ;;  %v6130_v29 = vld [vmem:[#allocation7 + $0x120] sm:$0xf0]  ;;  %v5069_v30 = vld [vmem:[#allocation7 + $0x568] sm:$0xf]  ;;  %v6397_v0 = vld [vmem:[#allocation7 + $0x97c] sm:$0xf] }
 0x163   : > { %2891 = vmatpush.bf16.msrb.mxu0 %v4758_v22  ;;  %2844 = vmatpush.bf16.msra.mxu1 %v4494_v37  ;;  %v4498_v39 = vor.u32 %v6130_v29, %v4497_v27  ;;  %v6416_v29 = vld [vmem:[#allocation7 + $0xa10] sm:$0xf0] }
 0x164   : > { %v2510_v21 = vpop.f32.mrf.mxu2  ;;  %v2523_v22 = vpop.f32.mrf.mxu3 }
 0x165   : > { %2795 = vmatmul.bf16.vlgmr.msrb.gmra.mxu2 %v7050_v45  ;;  %2808 = vmatmul.bf16.vlgmr.msrb.gmra.mxu3 %v7052_v46  ;;  %v2511_v28 = vadd.f32 %v2510_v21, %v2498_v48  ;;  %v6260_v48 = vld [vmem:[#allocation7 + $0x530] sm:$0xf0] }
 0x166   : > { %2852 = vmatpush.bf16.msra.mxu2 %v5170_v31  ;;  %2865 = vmatpush.bf16.msra.mxu3 %v5586_v32  ;;  %v6273_v31 = vld [vmem:[#allocation7 + $0x598] sm:$0xf0]  ;;  %v4962_v32 = vor.u32 %v6240_v19, %v4959_v20  ;;  %v7101_v37 = vpop.f32.mrf.mxu0  ;;  %v5018_v56 = vor.u32 %v6260_v48, %v5017_v47  ;;  %v6234_v19 = vld [vmem:[#allocation7 + $0x460] sm:$0xf0]  ;;  %v6280_v21 = vld [vmem:[#allocation7 + $0x5d4] sm:$0xf] }
 0x167   : > { %2892 = vmatpush.bf16.msrb.mxu0 %v4706_v38  ;;  %2845 = vmatpush.bf16.msra.mxu1 %v4442_v53  ;;  %v7097_v33 = vadd.f32 %v2523_v22, %v2511_v28  ;;  %v7103_v38 = vpop.f32.mrf.mxu1  ;;  %v5070_v40 = vor.u32 %v6273_v31, %v5069_v30  ;;  %v5123_v22 = vld [vmem:[#allocation7 + $0x604] sm:$0xf0]  ;;  %v6189_v30 = vld [vmem:[#allocation7 + $0x2fc] sm:$0xf]  ;;  %v4759_v31 = vld [vmem:[#allocation7 + $0x32c] sm:$0xf0] }
 0x16a   : > { %2853 = vmatpush.bf16.msra.mxu2 %v5118_v49  ;;  %2866 = vmatpush.bf16.msra.mxu3 %v5534_v50  ;;  %v4910_v49 = vor.u32 %v6227_v35, %v4907_v36  ;;  %v5326_v50 = vor.u32 %v6331_v41, %v5323_v42  ;;  %v5537_v35 = vld [vmem:[#allocation7 + $0x910] sm:$0xf]  ;;  %v6390_v36 = vld [vmem:[#allocation7 + $0x940] sm:$0xf0]  ;;  %v6267_v41 = vld [vmem:[#allocation7 + $0x56c] sm:$0xf] }
 0x16b   : > { %2893 = vmatpush.bf16.msrb.mxu0 %v4654_v54  ;;  %2846 = vmatpush.bf16.msra.mxu1 %v4390_v5  ;;  %v6201_v5 = vld [vmem:[#allocation7 + $0x35c] sm:$0xf]  ;;  %v5071_v42 = vld [vmem:[#allocation7 + $0x59c] sm:$0xf0] }
 0x16c   : > { %v2512_v53 = vpop.f32.mrf.mxu2  ;;  %v2525_v54 = vpop.f32.mrf.mxu3 }
 0x16d   : > { %v5074_v54 = vor.u32 %v6267_v41, %v5071_v42  ;;  %v6137_v41 = vld [vmem:[#allocation7 + $0x15c] sm:$0xf]  ;;  %v4551_v42 = vld [vmem:[#allocation7 + $0x18c] sm:$0xf0] }
 0x16e   : > { %2854 = vmatpush.bf16.msra.mxu2 %v5066_v1  ;;  %2867 = vmatpush.bf16.msra.mxu3 %v5482_v2  ;;  %v4858_v1 = vor.u32 %v6214_v51, %v4855_v52  ;;  %v6293_v2 = vld [vmem:[#allocation7 + $0x63c] sm:$0xf]  ;;  %v2551_v8 = vpop.f32.mrf.mxu0  ;;  %v6176_v51 = vld [vmem:[#allocation7 + $0x294] sm:$0xf]  ;;  %v4707_v52 = vld [vmem:[#allocation7 + $0x2c4] sm:$0xf0] }
 0x16f   : > { %2894 = vmatpush.bf16.msrb.mxu0 %v4602_v6  ;;  %2904 = vmatpush.bf16.msrb.mxu1 %v5174_v9  ;;  %v4803_v6 = vld [vmem:[#allocation7 + $0x38c] sm:$0xf0]  ;;  %v2564_v9 = vpop.f32.mrf.mxu1  ;;  %v5178_v15 = vor.u32 %v6293_v2, %v5175_v3  ;;  %v4710_v3 = vor.u32 %v6176_v51, %v4707_v52  ;;  %v4655_v8 = vld [vmem:[#allocation7 + $0x25c] sm:$0xf0] }
 0x170   : > { %2847 = vmatmul.bf16.vlgmr.msra.gmra.mxu1 %v7050_v45  ;;  %5666 = vmatmul.msk.bf16.vlgmr.msra.gmra.mxu0 %vm2471_vm2, %v7058_v62  ;;  %v4806_v20 = vor.u32 %v6201_v5, %v4803_v6  ;;  %v4810_v5 = vor.u32 %v6208_v58, %v4809_v57  ;;  %v5022_v6 = vor.u32 %v6254_v59, %v5019_v60  ;;  %v5433_v9 = vld [vmem:[#allocation7 + $0x840] sm:$0xf] }
 0x171   : > { %v4863_v51 = vld [vmem:[#allocation7 + $0x3fc] sm:$0xf0] }
 0x172   : > { %2855 = vmatpush.bf16.msra.mxu2 %v5014_v16  ;;  %2868 = vmatpush.bf16.msra.mxu3 %v5430_v18  ;;  %v6403_v16 = vld [vmem:[#allocation7 + $0x9a8] sm:$0xf0]  ;;  %v4913_v18 = vld [vmem:[#allocation7 + $0x430] sm:$0xf] }
 0x173   : > { %2895 = vmatpush.bf16.msrb.mxu0 %v4550_v23  ;;  %2905 = vmatpush.bf16.msrb.mxu1 %v5122_v24  ;;  %v5222_v23 = vor.u32 %v6305_v7, %v5219_v13  ;;  %v5641_v24 = vld [vmem:[#allocation7 + $0x9e0] sm:$0xf]  ;;  %v5590_v27 = vor.u32 %v6403_v16, %v5589_v14  ;;  %v4914_v28 = vor.u32 %v6234_v19, %v4913_v18  ;;  %v6163_v7 = vld [vmem:[#allocation7 + $0x22c] sm:$0xf]  ;;  %v4967_v13 = vld [vmem:[#allocation7 + $0x4cc] sm:$0xf0] }
 0x174   : > { %v2536_v25 = vpop.f32.mrf.mxu3  ;;  %v2575_v26 = vpop.f32.mrf.mxu2  ;;  %v5642_v44 = vor.u32 %v6416_v29, %v5641_v24  ;;  %v6384_v14 = vld [vmem:[#allocation7 + $0x914] sm:$0xf]  ;;  %v4658_v19 = vor.u32 %v6163_v7, %v4655_v8  ;;  %v4603_v24 = vld [vmem:[#allocation7 + $0x1f4] sm:$0xf0]  ;;  %v4915_v29 = vld [vmem:[#allocation7 + $0x464] sm:$0xf0] }
 0x175   : > { %v5597_v7 = vld [vmem:[#allocation7 + $0x980] sm:$0xf]  ;;  %v6404_v8 = vld [vmem:[#allocation7 + $0x9b0] sm:$0xf0] }
 0x176   : > { %2856 = vmatpush.bf16.msra.mxu2 %v4962_v32  ;;  %2869 = vmatpush.bf16.msra.mxu3 %v5378_v34  ;;  %v2537_v32 = vadd.f32 %v2536_v25, %v796_v12  ;;  %v5126_v34 = vor.u32 %v6280_v21, %v5123_v22  ;;  %v6241_v12 = vld [vmem:[#allocation7 + $0x49c] sm:$0xf]  ;;  %v5381_v25 = vld [vmem:[#allocation7 + $0x7d8] sm:$0xf] }
 0x177   : > { %2896 = vmatpush.bf16.msrb.mxu0 %v4498_v39  ;;  %2906 = vmatpush.bf16.msrb.mxu1 %v5070_v40  ;;  %v4861_v39 = vld [vmem:[#allocation7 + $0x3c8] sm:$0xf]  ;;  %v6221_v40 = vld [vmem:[#allocation7 + $0x3f8] sm:$0xf0]  ;;  %v7110_v48 = vpop.f32.mrf.mxu1  ;;  %v4970_v22 = vor.u32 %v6241_v12, %v4967_v13 }
 0x178   : > { %v2550_v43 = vadd.f32 %v7101_v37, %v2537_v32  ;;  %v4862_v37 = vor.u32 %v6221_v40, %v4861_v39 }
 0x179   : > { %v7108_v47 = vpop.f32.mrf.mxu0 }
 0x17a   : > { %2857 = vmatpush.bf16.msra.mxu2 %v4910_v49  ;;  %2870 = vmatpush.bf16.msra.mxu3 %v5326_v50  ;;  %v4762_v49 = vor.u32 %v6189_v30, %v4759_v31  ;;  %v5538_v50 = vor.u32 %v6390_v36, %v5537_v35  ;;  %v2563_v53 = vadd.f32 %v7103_v38, %v2550_v43  ;;  %v6371_v30 = vld [vmem:[#allocation7 + $0x8ac] sm:$0xf]  ;;  %v5487_v31 = vld [vmem:[#allocation7 + $0x8dc] sm:$0xf0]  ;;  %v5329_v43 = vld [vmem:[#allocation7 + $0x770] sm:$0xf] }
 0x17b   : > { %2897 = vmatpush.bf16.msrb.mxu0 %v4446_v55  ;;  %2907 = vmatpush.bf16.msrb.mxu1 %v5018_v56  ;;  %v5485_v55 = vld [vmem:[#allocation7 + $0x8a8] sm:$0xf]  ;;  %v6377_v56 = vld [vmem:[#allocation7 + $0x8d8] sm:$0xf0] }
 0x17c   : > { %v7115_v63 = vadd.f32 %v2575_v26, %v2563_v53  ;;  %v2538_v38 = vpop.f32.mrf.mxu3  ;;  %v2577_v2 = vpop.f32.mrf.mxu2  ;;  %v6358_v53 = vld [vmem:[#allocation7 + $0x844] sm:$0xf] }
 0x17d   : > { %v6325_v38 = vld [vmem:[#allocation7 + $0x738] sm:$0xf0] }
 0x17e   : > { %2858 = vmatpush.bf16.msra.mxu2 %v4858_v1  ;;  %2871 = vmatpush.bf16.msra.mxu3 %v5274_v4  ;;  %v5591_v1 = vld [vmem:[#allocation7 + $0x9ac] sm:$0xf0]  ;;  %v5486_v4 = vor.u32 %v6377_v56, %v5485_v55  ;;  %v6124_v55 = vld [vmem:[#allocation7 + $0xf4] sm:$0xf] }
 0x17f   : > { %2898 = vmatpush.bf16.msrb.mxu0 %v4394_v10  ;;  %2908 = vmatpush.bf16.msrb.mxu1 %v4966_v11  ;;  %v5594_v10 = vor.u32 %v6397_v0, %v5591_v1  ;;  %v6364_v11 = vld [vmem:[#allocation7 + $0x870] sm:$0xf0]  ;;  %v2629_v18 = vpop.f32.mrf.mxu1  ;;  %v4499_v0 = vld [vmem:[#allocation7 + $0x124] sm:$0xf0] }
 0x180   : > { %v5434_v21 = vor.u32 %v6364_v11, %v5433_v9  ;;  %v5277_v1 = vld [vmem:[#allocation7 + $0x708] sm:$0xf]  ;;  %v4502_v11 = vor.u32 %v6124_v55, %v4499_v0  ;;  %v5598_v18 = vor.u32 %v6404_v8, %v5597_v7  ;;  %v5227_v0 = vld [vmem:[#allocation7 + $0x6d4] sm:$0xf0]  ;;  %v4661_v7 = vld [vmem:[#allocation7 + $0x230] sm:$0xf] }
 0x181   : > { %v2616_v16 = vpop.f32.mrf.mxu0  ;;  %v5278_v12 = vor.u32 %v6325_v38, %v5277_v1  ;;  %v5441_v1 = vld [vmem:[#allocation7 + $0x848] sm:$0xf]  ;;  %v6365_v38 = vld [vmem:[#allocation7 + $0x878] sm:$0xf0] }
 0x182   : > { %2859 = vmatpush.bf16.msra.mxu2 %v4806_v20  ;;  %2872 = vmatpush.bf16.msra.mxu3 %v5222_v23  ;;  %v6150_v20 = vld [vmem:[#allocation7 + $0x1c4] sm:$0xf]  ;;  %v797_v23 = vperm.slane %v7088_v17, 2 }
 0x183   : > { %2956 = vmatpush.bf16.msra.mxu0 %v5178_v15  ;;  %2909 = vmatpush.bf16.msrb.mxu1 %v4914_v28  ;;  %v5539_v15 = vld [vmem:[#allocation7 + $0x944] sm:$0xf0]  ;;  %v6228_v28 = vld [vmem:[#allocation7 + $0x434] sm:$0xf]  ;;  %v4606_v35 = vor.u32 %v6150_v20, %v4603_v24 }
 0x184   : > { %2899 = vmatmul.bf16.vlgmr.msrb.gmra.mxu0 %v7050_v45  ;;  %v5542_v26 = vor.u32 %v6384_v14, %v5539_v15  ;;  %v2588_v32 = vpop.f32.mrf.mxu2  ;;  %v4918_v40 = vor.u32 %v6228_v28, %v4915_v29  ;;  %v6111_v14 = vld [vmem:[#allocation7 + $0x8c] sm:$0xf]  ;;  %v4447_v15 = vld [vmem:[#allocation7 + $0xbc] sm:$0xf0]  ;;  %v6312_v20 = vld [vmem:[#allocation7 + $0x6d0] sm:$0xf0] }
 0x185   : > { %2860 = vmatmul.bf16.vlgmr.msra.gmra.mxu2 %v7052_v46  ;;  %2873 = vmatmul.bf16.vlgmr.msra.gmra.mxu3 %v7056_v61  ;;  %v2589_v36 = vadd.f32 %v2588_v32, %v797_v23  ;;  %v6391_v23 = vld [vmem:[#allocation7 + $0x948] sm:$0xf0]  ;;  %v4450_v24 = vor.u32 %v6111_v14, %v4447_v15  ;;  %v4765_v32 = vld [vmem:[#allocation7 + $0x300] sm:$0xf]  ;;  %v6352_v15 = vld [vmem:[#allocation7 + $0x810] sm:$0xf0] }
 0x186   : > { %2917 = vmatpush.bf16.msrb.mxu2 %v5590_v27  ;;  %2937 = vmatpush.bf16.msrb.mxu3 %v5642_v44  ;;  %v6351_v27 = vld [vmem:[#allocation7 + $0x808] sm:$0xf0]  ;;  %v5490_v44 = vor.u32 %v6371_v30, %v5487_v31  ;;  %v4395_v31 = vld [vmem:[#allocation7 + $0x54] sm:$0xf0]  ;;  %v5389_v14 = vld [vmem:[#allocation7 + $0x7e0] sm:$0xf] }
 0x187   : > { %2957 = vmatpush.bf16.msra.mxu0 %v5126_v34  ;;  %2910 = vmatpush.bf16.msrb.mxu1 %v4862_v37  ;;  %v2601_v34 = vpop.f32.mrf.mxu3  ;;  %v5382_v39 = vor.u32 %v6351_v27, %v5381_v25  ;;  %v5435_v37 = vld [vmem:[#allocation7 + $0x874] sm:$0xf0]  ;;  %v6098_v25 = vld [vmem:[#allocation7 + $0x24] sm:$0xf] }
 0x188   : > { %v2602_v52 = vadd.f32 %v2601_v34, %v2589_v36  ;;  %v5438_v2 = vor.u32 %v6358_v53, %v5435_v37  ;;  %v5643_v27 = vld [vmem:[#allocation7 + $0xa14] sm:$0xf0]  ;;  %v6196_v34 = vld [vmem:[#allocation7 + $0x330] sm:$0xf0]  ;;  %v6183_v37 = vld [vmem:[#allocation7 + $0x2c8] sm:$0xf0] }
 0x189   : > { %v7120_v57 = vpop.f32.mrf.mxu1  ;;  %v7122_v58 = vpop.f32.mrf.mxu0  ;;  %v4713_v53 = vld [vmem:[#allocation7 + $0x298] sm:$0xf] }
 0x18a   : > { %2943 = vmatpush.bf16.msra.mxu3 %v4762_v49  ;;  %2918 = vmatpush.bf16.msrb.mxu2 %v5538_v50  ;;  %v6338_v49 = vld [vmem:[#allocation7 + $0x7a0] sm:$0xf0]  ;;  %v6215_v50 = vld [vmem:[#allocation7 + $0x3cc] sm:$0xf]  ;;  %v2615_v56 = vadd.f32 %v7108_v47, %v2602_v52 }
 0x18b   : > { %2958 = vmatpush.bf16.msra.mxu0 %v5074_v54  ;;  %2911 = vmatpush.bf16.msrb.mxu1 %v4810_v5  ;;  %v4554_v54 = vor.u32 %v6137_v41, %v4551_v42  ;;  %v5330_v59 = vor.u32 %v6338_v49, %v5329_v43  ;;  %v4866_v60 = vor.u32 %v6215_v50, %v4863_v51  ;;  %v6345_v5 = vld [vmem:[#allocation7 + $0x7dc] sm:$0xf]  ;;  %v6319_v41 = vld [vmem:[#allocation7 + $0x70c] sm:$0xf]  ;;  %v5279_v43 = vld [vmem:[#allocation7 + $0x73c] sm:$0xf0] }
 0x18c   : > { %v7127_v47 = vadd.f32 %v7110_v48, %v2615_v56  ;;  %v2590_v9 = vpop.f32.mrf.mxu2  ;;  %v6332_v48 = vld [vmem:[#allocation7 + $0x774] sm:$0xf]  ;;  %v6378_v49 = vld [vmem:[#allocation7 + $0x8e0] sm:$0xf0]  ;;  %v4398_v50 = vor.u32 %v6098_v25, %v4395_v31  ;;  %v4766_v51 = vor.u32 %v6196_v34, %v4765_v32  ;;  %v5129_v56 = vld [vmem:[#allocation7 + $0x5d8] sm:$0xf] }
 0x18d   : > { %v5442_v9 = vor.u32 %v6365_v38, %v5441_v1  ;;  %v6261_v25 = vld [vmem:[#allocation7 + $0x538] sm:$0xf0]  ;;  %v4715_v32 = vld [vmem:[#allocation7 + $0x2cc] sm:$0xf0] }
 0x18e   : > { %2944 = vmatpush.bf16.msra.mxu3 %v4710_v3  ;;  %2919 = vmatpush.bf16.msrb.mxu2 %v5486_v4  ;;  %v6202_v3 = vld [vmem:[#allocation7 + $0x364] sm:$0xf]  ;;  %v4811_v4 = vld [vmem:[#allocation7 + $0x394] sm:$0xf0]  ;;  %v6177_v31 = vld [vmem:[#allocation7 + $0x29c] sm:$0xf] }
 0x18f   : > { %2959 = vmatpush.bf16.msra.mxu0 %v5022_v6  ;;  %2969 = vmatpush.bf16.msra.mxu1 %v5594_v10  ;;  %v5383_v6 = vld [vmem:[#allocation7 + $0x80c] sm:$0xf0]  ;;  %v2603_v10 = vpop.f32.mrf.mxu3  ;;  %v4814_v13 = vor.u32 %v6202_v3, %v4811_v4  ;;  %v6417_v3 = vld [vmem:[#allocation7 + $0xa18] sm:$0xf0] }
 0x190   : > { %2912 = vmatmul.bf16.vlgmr.msrb.gmra.mxu1 %v7052_v46  ;;  %v5386_v16 = vor.u32 %v6345_v5, %v5383_v6  ;;  %v4714_v5 = vor.u32 %v6183_v37, %v4713_v53  ;;  %v6170_v10 = vld [vmem:[#allocation7 + $0x260] sm:$0xf0]  ;;  %v6164_v37 = vld [vmem:[#allocation7 + $0x234] sm:$0xf] }
 0x191   : > { %v2642_v28 = vpop.f32.mrf.mxu1  ;;  %v2681_v29 = vpop.f32.mrf.mxu0 }
 0x192   : > { %2945 = vmatpush.bf16.msra.mxu3 %v4658_v19  ;;  %2920 = vmatpush.bf16.msrb.mxu2 %v5434_v21  ;;  %v5225_v19 = vld [vmem:[#allocation7 + $0x6a0] sm:$0xf]  ;;  %v5331_v21 = vld [vmem:[#allocation7 + $0x7a4] sm:$0xf0]  ;;  %v6339_v28 = vld [vmem:[#allocation7 + $0x7a8] sm:$0xf0] }
 0x193   : > { %2960 = vmatpush.bf16.msra.mxu0 %v4970_v22  ;;  %2970 = vmatpush.bf16.msra.mxu1 %v5542_v26  ;;  %v5545_v22 = vld [vmem:[#allocation7 + $0x918] sm:$0xf]  ;;  %v6410_v26 = vld [vmem:[#allocation7 + $0x9e4] sm:$0xf]  ;;  %v5226_v30 = vor.u32 %v6312_v20, %v5225_v19  ;;  %v4662_v20 = vor.u32 %v6170_v10, %v4661_v7  ;;  %v6313_v7 = vld [vmem:[#allocation7 + $0x6d8] sm:$0xf0] }
 0x194   : > { %v5546_v36 = vor.u32 %v6391_v23, %v5545_v22  ;;  %v5646_v42 = vor.u32 %v6410_v26, %v5643_v27  ;;  %v4767_v19 = vld [vmem:[#allocation7 + $0x334] sm:$0xf0]  ;;  %v5390_v22 = vor.u32 %v6352_v15, %v5389_v14  ;;  %v6157_v23 = vld [vmem:[#allocation7 + $0x1f8] sm:$0xf0]  ;;  %v6411_v10 = vld [vmem:[#allocation7 + $0x9ec] sm:$0xf] }
 0x195   : > { %5667 = vmatmul.msk.bf16.vlgmr.msrb.gmra.mxu3 %vm2471_vm2, %v7058_v62  ;;  %v5337_v27 = vld [vmem:[#allocation7 + $0x778] sm:$0xf]  ;;  %v4453_v14 = vld [vmem:[#allocation7 + $0x90] sm:$0xf] }
 0x196   : > { %2946 = vmatpush.bf16.msra.mxu3 %v4606_v35  ;;  %2921 = vmatpush.bf16.msrb.mxu2 %v5382_v39  ;;  %v5334_v35 = vor.u32 %v6332_v48, %v5331_v21  ;;  %v5181_v39 = vld [vmem:[#allocation7 + $0x640] sm:$0xf]  ;;  %v4609_v21 = vld [vmem:[#allocation7 + $0x1c8] sm:$0xf] }
 0x197   : > { %2961 = vmatpush.bf16.msra.mxu0 %v4918_v40  ;;  %2971 = vmatpush.bf16.msra.mxu1 %v5490_v44  ;;  %v6300_v40 = vld [vmem:[#allocation7 + $0x670] sm:$0xf0]  ;;  %v5493_v44 = vld [vmem:[#allocation7 + $0x8b0] sm:$0xf] }
 0x198   : > { %v5182_v52 = vor.u32 %v6300_v40, %v5181_v39  ;;  %v5494_v55 = vor.u32 %v6378_v49, %v5493_v44  ;;  %v4557_v40 = vld [vmem:[#allocation7 + $0x160] sm:$0xf]  ;;  %v6144_v44 = vld [vmem:[#allocation7 + $0x190] sm:$0xf0] }
 0x199   : > { %v4973_v49 = vld [vmem:[#allocation7 + $0x4a0] sm:$0xf] }
 0x19a   : > { %2947 = vmatpush.bf16.msra.mxu3 %v4554_v54  ;;  %2922 = vmatpush.bf16.msrb.mxu2 %v5330_v59  ;;  %v5282_v54 = vor.u32 %v6319_v41, %v5279_v43  ;;  %v6287_v59 = vld [vmem:[#allocation7 + $0x608] sm:$0xf0]  ;;  %v5338_v43 = vor.u32 %v6339_v28, %v5337_v27 }
 0x19b   : > { %2962 = vmatpush.bf16.msra.mxu0 %v4866_v60  ;;  %2972 = vmatpush.bf16.msra.mxu1 %v5438_v2  ;;  %v6306_v60 = vld [vmem:[#allocation7 + $0x6a4] sm:$0xf]  ;;  %v5649_v2 = vld [vmem:[#allocation7 + $0x9e8] sm:$0xf]  ;;  %v5130_v6 = vor.u32 %v6287_v59, %v5129_v56  ;;  %v4558_v56 = vor.u32 %v6144_v44, %v4557_v40  ;;  %v4721_v44 = vld [vmem:[#allocation7 + $0x2a0] sm:$0xf] }
 0x19c   : > { %v5230_v8 = vor.u32 %v6306_v60, %v5227_v0  ;;  %v4505_v60 = vld [vmem:[#allocation7 + $0xf8] sm:$0xf]  ;;  %v6398_v40 = vld [vmem:[#allocation7 + $0x984] sm:$0xf] }
 0x19d   : > { %v2692_v4 = vpop.f32.mrf.mxu0 }
 0x19e   : > { %2948 = vmatpush.bf16.msra.mxu3 %v4502_v11  ;;  %2923 = vmatpush.bf16.msrb.mxu2 %v5278_v12  ;;  %v5077_v11 = vld [vmem:[#allocation7 + $0x570] sm:$0xf]  ;;  %v6274_v12 = vld [vmem:[#allocation7 + $0x5a0] sm:$0xf0] }
 0x19f   : > { %2963 = vmatpush.bf16.msra.mxu0 %v4814_v13  ;;  %2973 = vmatpush.bf16.msra.mxu1 %v5386_v16  ;;  %v5650_v13 = vor.u32 %v6417_v3, %v5649_v2  ;;  %v798_v16 = vperm.slane %v7088_v17, 3  ;;  %v5078_v48 = vor.u32 %v6274_v12, %v5077_v11  ;;  %v6131_v2 = vld [vmem:[#allocation7 + $0x128] sm:$0xf0]  ;;  %v4921_v3 = vld [vmem:[#allocation7 + $0x438] sm:$0xf] }
 0x1a0   : > { %v5651_v11 = vld [vmem:[#allocation7 + $0xa1c] sm:$0xf0]  ;;  %v4506_v12 = vor.u32 %v6131_v2, %v4505_v60  ;;  %v6112_v60 = vld [vmem:[#allocation7 + $0x94] sm:$0xf]  ;;  %v4669_v2 = vld [vmem:[#allocation7 + $0x238] sm:$0xf] }
 0x1a1   : > { %v2641_v29 = vadd.f32 %v7120_v57, %v798_v16  ;;  %v6248_v57 = vld [vmem:[#allocation7 + $0x4d0] sm:$0xf0] }
 0x1a2   : > { %2949 = vmatpush.bf16.msra.mxu3 %v4450_v24  ;;  %2964 = vmatmul.bf16.vlgmr.msra.gmra.mxu0 %v7052_v46  ;;  %v5025_v24 = vld [vmem:[#allocation7 + $0x508] sm:$0xf]  ;;  %v4974_v59 = vor.u32 %v6248_v57, %v4973_v49  ;;  %v6184_v49 = vld [vmem:[#allocation7 + $0x2d0] sm:$0xf0] }
 0x1a3   : > { %3021 = vmatpush.bf16.msrb.mxu0 %v5598_v18  ;;  %2924 = vmatpush.bf16.msrb.mxu2 %v5226_v30  ;;  %v6190_v18 = vld [vmem:[#allocation7 + $0x304] sm:$0xf]  ;;  %v799_v30 = vperm.slane %v7088_v17, 4  ;;  %v5026_v39 = vor.u32 %v6261_v25, %v5025_v24  ;;  %v4718_v17 = vor.u32 %v6177_v31, %v4715_v32  ;;  %v4773_v24 = vld [vmem:[#allocation7 + $0x308] sm:$0xf] }
 0x1a4   : > { %2974 = vmatpush.bf16.msra.mxu1 %v5334_v35  ;;  %v4770_v26 = vor.u32 %v6190_v18, %v4767_v19  ;;  %v2653_v34 = vpop.f32.mrf.mxu2  ;;  %v6118_v18 = vld [vmem:[#allocation7 + $0xc0] sm:$0xf0]  ;;  %v4869_v19 = vld [vmem:[#allocation7 + $0x3d0] sm:$0xf]  ;;  %v6197_v25 = vld [vmem:[#allocation7 + $0x338] sm:$0xf0] }
 0x1a5   : > { %v2694_v35 = vpop.f32.mrf.mxu0  ;;  %v2654_v41 = vadd.f32 %v2653_v34, %v2641_v29  ;;  %v4454_v27 = vor.u32 %v6118_v18, %v4453_v14  ;;  %v4401_v29 = vld [vmem:[#allocation7 + $0x28] sm:$0xf]  ;;  %v6209_v32 = vld [vmem:[#allocation7 + $0x398] sm:$0xf0]  ;;  %v6294_v34 = vld [vmem:[#allocation7 + $0x644] sm:$0xf] }
 0x1a6   : > { %2925 = vmatmul.bf16.vlgmr.msrb.gmra.mxu2 %v7056_v61  ;;  %2950 = vmatpush.bf16.msra.mxu3 %v4398_v50  ;;  %v5285_v50 = vld [vmem:[#allocation7 + $0x710] sm:$0xf]  ;;  %v4817_v31 = vld [vmem:[#allocation7 + $0x368] sm:$0xf]  ;;  %v5183_v35 = vld [vmem:[#allocation7 + $0x674] sm:$0xf0] }
 0x1a7   : > { %3022 = vmatpush.bf16.msrb.mxu0 %v5546_v36  ;;  %2989 = vmatpush.bf16.msra.mxu2 %v5646_v42  ;;  %v4610_v36 = vor.u32 %v6157_v23, %v4609_v21  ;;  %v2666_v42 = vpop.f32.mrf.mxu3  ;;  %v5654_v21 = vor.u32 %v6411_v10, %v5651_v11  ;;  %v4559_v23 = vld [vmem:[#allocation7 + $0x194] sm:$0xf0]  ;;  %v6372_v11 = vld [vmem:[#allocation7 + $0x8b4] sm:$0xf]  ;;  %v4617_v14 = vld [vmem:[#allocation7 + $0x1d0] sm:$0xf] }
 0x1a8   : > { %2975 = vmatpush.bf16.msra.mxu1 %v5282_v54  ;;  %v2667_v53 = vadd.f32 %v2666_v42, %v2654_v41  ;;  %v4663_v54 = vld [vmem:[#allocation7 + $0x264] sm:$0xf0]  ;;  %v5599_v41 = vld [vmem:[#allocation7 + $0x9b4] sm:$0xf0]  ;;  %v6125_v42 = vld [vmem:[#allocation7 + $0xfc] sm:$0xf] }
 0x1a9   : > { %2951 = vmatmul.bf16.vlgmr.msra.gmra.mxu3 %v7050_v45  ;;  %v6301_v18 = vld [vmem:[#allocation7 + $0x678] sm:$0xf0] }
 0x1aa   : > { %3008 = vmatpush.bf16.msrb.mxu3 %v5182_v52  ;;  %v2693_v52 = vadd.f32 %v2692_v4, %v799_v30  ;;  %v7137_v0 = vadd.f32 %v7122_v58, %v2667_v53  ;;  %v4666_v4 = vor.u32 %v6164_v37, %v4663_v54  ;;  %v6105_v30 = vld [vmem:[#allocation7 + $0x58] sm:$0xf0]  ;;  %v5131_v37 = vld [vmem:[#allocation7 + $0x60c] sm:$0xf0] }
 0x1ab   : > { %2995 = vmatpush.bf16.msrb.mxu2 %v4766_v51  ;;  %3023 = vmatpush.bf16.msrb.mxu0 %v5494_v55  ;;  %v6326_v51 = vld [vmem:[#allocation7 + $0x740] sm:$0xf0]  ;;  %v2705_v55 = vpop.f32.mrf.mxu1  ;;  %v4402_v57 = vor.u32 %v6105_v30, %v4401_v29  ;;  %v6281_v53 = vld [vmem:[#allocation7 + $0x5dc] sm:$0xf]  ;;  %v5137_v30 = vld [vmem:[#allocation7 + $0x5e0] sm:$0xf] }
 0x1ac   : > { %2976 = vmatpush.bf16.msra.mxu1 %v5230_v8  ;;  %v7139_v1 = vadd.f32 %v2705_v55, %v2693_v52  ;;  %v5286_v38 = vor.u32 %v6326_v51, %v5285_v50  ;;  %v6151_v8 = vld [vmem:[#allocation7 + $0x1cc] sm:$0xf]  ;;  %v2655_v58 = vpop.f32.mrf.mxu2  ;;  %v5186_v51 = vor.u32 %v6294_v34, %v5183_v35  ;;  %v5602_v52 = vor.u32 %v6398_v40, %v5599_v41  ;;  %v6145_v29 = vld [vmem:[#allocation7 + $0x198] sm:$0xf0]  ;;  %v6242_v41 = vld [vmem:[#allocation7 + $0x4a4] sm:$0xf] }
 0x1ad   : > { %v4722_v55 = vor.u32 %v6184_v49, %v4721_v44  ;;  %v5495_v58 = vld [vmem:[#allocation7 + $0x8e4] sm:$0xf0] }
 0x1ae   : > { %3009 = vmatpush.bf16.msrb.mxu3 %v5130_v6  ;;  %v5233_v6 = vld [vmem:[#allocation7 + $0x6a8] sm:$0xf] }
 0x1af   : > { %2996 = vmatpush.bf16.msrb.mxu2 %v4714_v5  ;;  %3024 = vmatpush.bf16.msrb.mxu0 %v5442_v9  ;;  %v6235_v5 = vld [vmem:[#allocation7 + $0x468] sm:$0xf0]  ;;  %v4611_v9 = vld [vmem:[#allocation7 + $0x1fc] sm:$0xf0]  ;;  %v2668_v15 = vpop.f32.mrf.mxu3  ;;  %v5234_v16 = vor.u32 %v6313_v7, %v5233_v6  ;;  %v6268_v7 = vld [vmem:[#allocation7 + $0x574] sm:$0xf] }
 0x1b0   : > { %3041 = vmatpush.bf16.msrb.mxu1 %v5650_v13  ;;  %v4922_v13 = vor.u32 %v6235_v5, %v4921_v3  ;;  %v6171_v3 = vld [vmem:[#allocation7 + $0x268] sm:$0xf0]  ;;  %v6158_v15 = vld [vmem:[#allocation7 + $0x200] sm:$0xf0] }
 0x1b1   : > { %2977 = vmatmul.bf16.vlgmr.msra.gmra.mxu1 %v7056_v61  ;;  %v4670_v10 = vor.u32 %v6171_v3, %v4669_v2  ;;  %v4923_v2 = vld [vmem:[#allocation7 + $0x46c] sm:$0xf0] }
 0x1b2   : > { %3010 = vmatpush.bf16.msrb.mxu3 %v5078_v48  ;;  %v4614_v48 = vor.u32 %v6151_v8, %v4611_v9  ;;  %v5079_v8 = vld [vmem:[#allocation7 + $0x5a4] sm:$0xf0] }
 0x1b3   : > { %2997 = vmatpush.bf16.msrb.mxu2 %v4662_v20  ;;  %3025 = vmatpush.bf16.msrb.mxu0 %v5390_v22  ;;  %v6222_v20 = vld [vmem:[#allocation7 + $0x400] sm:$0xf0] }
 0x1b4   : > { %3047 = vmatpush.bf16.msra.mxu1 %v4770_v26  ;;  %v6138_v22 = vld [vmem:[#allocation7 + $0x164] sm:$0xf]  ;;  %v2707_v26 = vpop.f32.mrf.mxu1  ;;  %v4870_v28 = vor.u32 %v6222_v20, %v4869_v19  ;;  %v5082_v20 = vor.u32 %v6268_v7, %v5079_v8  ;;  %v4461_v7 = vld [vmem:[#allocation7 + $0x98] sm:$0xf] }
 0x1b5   : > { %v6359_v26 = vld [vmem:[#allocation7 + $0x84c] sm:$0xf] }
 0x1b6   : > { %3011 = vmatpush.bf16.msrb.mxu3 %v5026_v39  ;;  %5668 = vmatmul.msk.bf16.vlgmr.msra.gmra.mxu2 %vm2471_vm2, %v7058_v62  ;;  %v4774_v39 = vor.u32 %v6197_v25, %v4773_v24  ;;  %v5027_v24 = vld [vmem:[#allocation7 + $0x53c] sm:$0xf0] }
 0x1b7   : > { %2998 = vmatpush.bf16.msrb.mxu2 %v4610_v36  ;;  %3026 = vmatpush.bf16.msrb.mxu0 %v5338_v43  ;;  %v4562_v36 = vor.u32 %v6138_v22, %v4559_v23  ;;  %v4507_v43 = vld [vmem:[#allocation7 + $0x12c] sm:$0xf0]  ;;  %v7146_v50 = vpop.f32.mrf.mxu3  ;;  %v4618_v22 = vor.u32 %v6158_v15, %v4617_v14  ;;  %v6255_v23 = vld [vmem:[#allocation7 + $0x50c] sm:$0xf]  ;;  %v6216_v15 = vld [vmem:[#allocation7 + $0x3d4] sm:$0xf] }
 0x1b8   : > { %3048 = vmatpush.bf16.msra.mxu1 %v4718_v17  ;;  %v4818_v17 = vor.u32 %v6209_v32, %v4817_v31  ;;  %v4510_v54 = vor.u32 %v6125_v42, %v4507_v43  ;;  %v6288_v31 = vld [vmem:[#allocation7 + $0x610] sm:$0xf0]  ;;  %v5030_v34 = vor.u32 %v6255_v23, %v5027_v24  ;;  %v4975_v42 = vld [vmem:[#allocation7 + $0x4d4] sm:$0xf0]  ;;  %v6249_v23 = vld [vmem:[#allocation7 + $0x4d8] sm:$0xf0] }
 0x1b9   : > { %v5138_v49 = vor.u32 %v6288_v31, %v5137_v30  ;;  %v4819_v30 = vld [vmem:[#allocation7 + $0x39c] sm:$0xf0] }
 0x1ba   : > { %3012 = vmatpush.bf16.msrb.mxu3 %v4974_v59  ;;  %v5547_v59 = vld [vmem:[#allocation7 + $0x94c] sm:$0xf0] }
 0x1bb   : > { %2999 = vmatpush.bf16.msrb.mxu2 %v4558_v56  ;;  %3027 = vmatpush.bf16.msrb.mxu0 %v5286_v38  ;;  %v6385_v56 = vld [vmem:[#allocation7 + $0x91c] sm:$0xf]  ;;  %v4455_v38 = vld [vmem:[#allocation7 + $0xc4] sm:$0xf0] }
 0x1bc   : > { %3049 = vmatpush.bf16.msra.mxu1 %v4666_v4  ;;  %v5134_v4 = vor.u32 %v6281_v53, %v5131_v37  ;;  %v5550_v6 = vor.u32 %v6385_v56, %v5547_v59  ;;  %v4458_v9 = vor.u32 %v6112_v60, %v4455_v38  ;;  %v5085_v53 = vld [vmem:[#allocation7 + $0x578] sm:$0xf]  ;;  %v6275_v37 = vld [vmem:[#allocation7 + $0x5a8] sm:$0xf0]  ;;  %v4978_v56 = vor.u32 %v6242_v41, %v4975_v42  ;;  %v6229_v38 = vld [vmem:[#allocation7 + $0x43c] sm:$0xf] }
 0x1bd   : > { %v7148_v5 = vpop.f32.mrf.mxu0  ;;  %v4929_v41 = vld [vmem:[#allocation7 + $0x440] sm:$0xf]  ;;  %v6236_v42 = vld [vmem:[#allocation7 + $0x470] sm:$0xf0] }
 0x1be   : > { %3013 = vmatpush.bf16.msrb.mxu3 %v4922_v13  ;;  %v4403_v13 = vld [vmem:[#allocation7 + $0x5c] sm:$0xf0] }
 0x1bf   : > { %3000 = vmatpush.bf16.msrb.mxu2 %v4506_v12  ;;  %3028 = vmatpush.bf16.msrb.mxu0 %v5234_v16  ;;  %v6099_v12 = vld [vmem:[#allocation7 + $0x2c] sm:$0xf]  ;;  %v5189_v16 = vld [vmem:[#allocation7 + $0x648] sm:$0xf]  ;;  %v2733_v19 = vpop.f32.mrf.mxu3 }
 0x1c0   : > { %3050 = vmatpush.bf16.msra.mxu1 %v4614_v48  ;;  %v5498_v48 = vor.u32 %v6372_v11, %v5495_v58  ;;  %v5190_v25 = vor.u32 %v6301_v18, %v5189_v16  ;;  %v6262_v11 = vld [vmem:[#allocation7 + $0x540] sm:$0xf0]  ;;  %v4926_v58 = vor.u32 %v6229_v38, %v4923_v2  ;;  %v4871_v16 = vld [vmem:[#allocation7 + $0x404] sm:$0xf0]  ;;  %v6426_v2 = vld [vmem:[%s7580_s4 + $0x38] sm:$0xff] }
 0x1c1   : > { %5669 = vmatmul.msk.bf16.vlgmr.msrb.gmra.mxu1 %vm2471_vm2, %v7058_v62 }
 0x1c2   : > { %3014 = vmatpush.bf16.msrb.mxu3 %v4870_v28  ;;  %3029 = vmatmul.bf16.vlgmr.msrb.gmra.mxu0 %v7056_v61  ;;  %v4565_v28 = vld [vmem:[#allocation7 + $0x168] sm:$0xf] }
 0x1c3   : > { %3093 = vmatpush.bf16.msra.mxu0 %v5654_v21  ;;  %3001 = vmatpush.bf16.msrb.mxu2 %v4454_v27  ;;  %v4406_v21 = vor.u32 %v6099_v12, %v4403_v13  ;;  %v5443_v27 = vld [vmem:[#allocation7 + $0x87c] sm:$0xf0]  ;;  %v4566_v44 = vor.u32 %v6145_v29, %v4565_v28  ;;  %v6434_v28 = vld [vmem:[%s7580_s4 + $0x78] sm:$0xff]  ;;  %v6203_v29 = vld [vmem:[#allocation7 + $0x36c] sm:$0xf] }
 0x1c4   : > { %3051 = vmatpush.bf16.msra.mxu1 %v4562_v36  ;;  %v2718_v35 = vpop.f32.mrf.mxu2  ;;  %v5446_v36 = vor.u32 %v6359_v26, %v5443_v27 }
 0x1c5   : > { %v2759_v32 = vpop.f32.mrf.mxu0  ;;  %v2719_v43 = vadd.f32 %v2718_v35, %v7139_v1  ;;  %v5235_v35 = vld [vmem:[#allocation7 + $0x6dc] sm:$0xf0] }
 0x1c6   : > { %3015 = vmatpush.bf16.msrb.mxu3 %v4818_v17  ;;  %v5391_v17 = vld [vmem:[#allocation7 + $0x814] sm:$0xf0] }
 0x1c7   : > { %3099 = vmatpush.bf16.msrb.mxu0 %v4774_v39  ;;  %3002 = vmatpush.bf16.msrb.mxu2 %v4402_v57  ;;  %v7152_v39 = vld [vmem:[#allocation8] sm:$0xff]  ;;  %v6346_v57 = vld [vmem:[#allocation7 + $0x7e4] sm:$0xf] }
 0x1c8   : > { %3052 = vmatpush.bf16.msra.mxu1 %v4510_v54  ;;  %v800_v40 = vperm.slane %v7152_v39, 5  ;;  %v7157_v54 = vadd.f32 %v7146_v50, %v2719_v43  ;;  %v5394_v60 = vor.u32 %v6346_v57, %v5391_v17  ;;  %v6333_v50 = vld [vmem:[#allocation7 + $0x77c] sm:$0xf]  ;;  %v4822_v43 = vor.u32 %v6203_v29, %v4819_v30  ;;  %v6440_v29 = vld [vmem:[%s7580_s4 + $0xa8] sm:$0xff] }
 0x1c9   : > { %3016 = vmatmul.bf16.vlgmr.msrb.gmra.mxu3 %v7052_v46  ;;  %v2770_v59 = vpop.f32.mrf.mxu1  ;;  %v4930_v17 = vor.u32 %v6236_v42, %v4929_v41  ;;  %v5345_v30 = vld [vmem:[#allocation7 + $0x780] sm:$0xf]  ;;  %v5293_v41 = vld [vmem:[#allocation7 + $0x718] sm:$0xf]  ;;  %v6327_v42 = vld [vmem:[#allocation7 + $0x748] sm:$0xf0] }
 0x1ca   : > { %3073 = vmatpush.bf16.msra.mxu3 %v5602_v52  ;;  %3003 = vmatmul.bf16.vlgmr.msrb.gmra.mxu2 %v7050_v45  ;;  %v6132_v52 = vld [vmem:[#allocation7 + $0x130] sm:$0xf0] }
 0x1cb   : > { %3060 = vmatpush.bf16.msra.mxu2 %v5186_v51  ;;  %3100 = vmatpush.bf16.msrb.mxu0 %v4722_v55  ;;  %v4513_v51 = vld [vmem:[#allocation7 + $0x100] sm:$0xf]  ;;  %v2744_v55 = vpop.f32.mrf.mxu3 }
 0x1cc   : > { %3053 = vmatpush.bf16.msra.mxu1 %v4458_v9  ;;  %v2745_v1 = vadd.f32 %v2744_v55, %v800_v40  ;;  %v4514_v3 = vor.u32 %v6132_v52, %v4513_v51  ;;  %v6119_v9 = vld [vmem:[#allocation7 + $0xc8] sm:$0xf0]  ;;  %v2720_v13 = vpop.f32.mrf.mxu2  ;;  %v6405_v40 = vld [vmem:[#allocation7 + $0x9b8] sm:$0xf0]  ;;  %v5657_v51 = vld [vmem:[#allocation7 + $0x9f0] sm:$0xf] }
 0x1cd   : > { %v4462_v18 = vor.u32 %v6119_v9, %v4461_v7  ;;  %v6418_v52 = vld [vmem:[#allocation7 + $0xa20] sm:$0xf0]  ;;  %v6392_v55 = vld [vmem:[#allocation7 + $0x950] sm:$0xf0]  ;;  %v4825_v7 = vld [vmem:[#allocation7 + $0x370] sm:$0xf] }
 0x1ce   : > { %3074 = vmatpush.bf16.msra.mxu3 %v5550_v6  ;;  %v5339_v6 = vld [vmem:[#allocation7 + $0x7ac] sm:$0xf0]  ;;  %v2758_v8 = vadd.f32 %v7148_v5, %v2745_v1  ;;  %v6106_v5 = vld [vmem:[#allocation7 + $0x60] sm:$0xf0]  ;;  %v6223_v1 = vld [vmem:[#allocation7 + $0x408] sm:$0xf0]  ;;  %v5658_v38 = vor.u32 %v6418_v52, %v5657_v51 }
 0x1cf   : > { %3061 = vmatpush.bf16.msra.mxu2 %v5134_v4  ;;  %3101 = vmatpush.bf16.msrb.mxu0 %v4670_v10  ;;  %v5086_v4 = vor.u32 %v6275_v37, %v5085_v53  ;;  %v5033_v10 = vld [vmem:[#allocation7 + $0x510] sm:$0xf]  ;;  %v5342_v14 = vor.u32 %v6333_v50, %v5339_v6  ;;  %v6433_v53 = vld [vmem:[%s7580_s4 + $0x70] sm:$0xff]  ;;  %v5553_v37 = vld [vmem:[#allocation7 + $0x920] sm:$0xf]  ;;  %v3152_v52 = vmax.f32 %v7115_v63, 0.0 }
 0x1d0   : > { %3054 = vmatpush.bf16.msra.mxu1 %v4406_v21  ;;  %v7163_v12 = vadd.f32 %v2770_v59, %v2758_v8  ;;  %v5034_v19 = vor.u32 %v6262_v11, %v5033_v10  ;;  %v4409_v21 = vld [vmem:[#allocation7 + $0x30] sm:$0xf]  ;;  %v5501_v50 = vld [vmem:[#allocation7 + $0x8b8] sm:$0xf]  ;;  %v6379_v6 = vld [vmem:[#allocation7 + $0x8e8] sm:$0xf0] }
 0x1d1   : > { %v2772_v26 = vpop.f32.mrf.mxu1  ;;  %v4410_v31 = vor.u32 %v6106_v5, %v4409_v21  ;;  %v6210_v8 = vld [vmem:[#allocation7 + $0x3a0] sm:$0xf0]  ;;  %v6425_v10 = vld [vmem:[%s7580_s4 + $0x30] sm:$0xff]  ;;  %v5502_v11 = vor.u32 %v6379_v6, %v5501_v50  ;;  %v6431_v13 = vld [vmem:[%s7580_s4 + $0x60] sm:$0xff]  ;;  %v3151_v6 = vmax.f32 %v7097_v33, 0.0 }
 0x1d2   : > { %3075 = vmatpush.bf16.msra.mxu3 %v5498_v48  ;;  %5670 = vmatmul.msk.bf16.vlgmr.msra.gmra.mxu0 %vm2471_vm2, %v7058_v62  ;;  %v5287_v48 = vld [vmem:[#allocation7 + $0x744] sm:$0xf0]  ;;  %v6430_v21 = vld [vmem:[%s7580_s4 + $0x58] sm:$0xff]  ;;  %v6423_v26 = vld [vmem:[%s7580_s4 + $0x20] sm:$0xff] }
 0x1d3   : > { %3062 = vmatpush.bf16.msra.mxu2 %v5082_v20  ;;  %3102 = vmatpush.bf16.msrb.mxu0 %v4618_v22  ;;  %v6320_v20 = vld [vmem:[#allocation7 + $0x714] sm:$0xf]  ;;  %v4981_v22 = vld [vmem:[#allocation7 + $0x4a8] sm:$0xf]  ;;  %v2746_v24 = vpop.f32.mrf.mxu3  ;;  %v6419_v50 = vld [vmem:[%s7580_s4] sm:$0xff] }
 0x1d4   : > { %3112 = vmatpush.bf16.msrb.mxu1 %v5190_v25  ;;  %v4874_v25 = vor.u32 %v6216_v15, %v4871_v16  ;;  %v5290_v27 = vor.u32 %v6320_v20, %v5287_v48  ;;  %v4982_v32 = vor.u32 %v6249_v23, %v4981_v22  ;;  %v5449_v15 = vld [vmem:[#allocation7 + $0x850] sm:$0xf]  ;;  %v6366_v16 = vld [vmem:[#allocation7 + $0x880] sm:$0xf0]  ;;  %v6441_v5 = vld [vmem:[%s7580_s4 + $0xb0] sm:$0xff] }
 0x1d5   : > { %3055 = vmatmul.bf16.vlgmr.msra.gmra.mxu1 %v7050_v45  ;;  %v6424_v20 = vld [vmem:[%s7580_s4 + $0x28] sm:$0xff]  ;;  %v5450_v48 = vor.u32 %v6366_v16, %v5449_v15  ;;  %v5397_v22 = vld [vmem:[#allocation7 + $0x7e8] sm:$0xf]  ;;  %v6353_v23 = vld [vmem:[#allocation7 + $0x818] sm:$0xf0] }
 0x1d6   : > { %3076 = vmatpush.bf16.msra.mxu3 %v5446_v36  ;;  %v5605_v36 = vld [vmem:[#allocation7 + $0x988] sm:$0xf]  ;;  %v6438_v51 = vld [vmem:[%s7580_s4 + $0x98] sm:$0xff]  ;;  %v6464_v33 = vld [vmem:[%s7580_s4 + $0x168] sm:$0xff] }
 0x1d7   : > { %3063 = vmatpush.bf16.msra.mxu2 %v5030_v34  ;;  %3103 = vmatpush.bf16.msrb.mxu0 %v4566_v44  ;;  %v6307_v34 = vld [vmem:[#allocation7 + $0x6ac] sm:$0xf]  ;;  %v7168_v44 = vpop.f32.mrf.mxu2  ;;  %v5606_v57 = vor.u32 %v6405_v40, %v5605_v36  ;;  %v6428_v36 = vld [vmem:[%s7580_s4 + $0x48] sm:$0xff]  ;;  %v6439_v40 = vld [vmem:[%s7580_s4 + $0xa0] sm:$0xff] }
 0x1d8   : > { %3113 = vmatpush.bf16.msrb.mxu1 %v5138_v49  ;;  %v5238_v49 = vor.u32 %v6307_v34, %v5235_v35  ;;  %v6422_v34 = vld [vmem:[%s7580_s4 + $0x18] sm:$0xff]  ;;  %v6463_v15 = vld [vmem:[%s7580_s4 + $0x160] sm:$0xff] }
 0x1d9   : > { %v6450_v63 = vld [vmem:[%s7580_s4 + $0xf8] sm:$0xff] }
 0x1da   : > { %3077 = vmatpush.bf16.msra.mxu3 %v5394_v60  ;;  %v7176_v60 = vpop.f32.mrf.mxu1  ;;  %v6474_v16 = vld [vmem:[%s7580_s4 + $0x1b8] sm:$0xff] }
 0x1db   : > { %3064 = vmatpush.bf16.msra.mxu2 %v4978_v56  ;;  %3104 = vmatpush.bf16.msrb.mxu0 %v4514_v3  ;;  %v4877_v56 = vld [vmem:[#allocation7 + $0x3d8] sm:$0xf]  ;;  %v5554_v3 = vor.u32 %v6392_v55, %v5553_v37  ;;  %v5241_v37 = vld [vmem:[#allocation7 + $0x6b0] sm:$0xf]  ;;  %v6314_v55 = vld [vmem:[#allocation7 + $0x6e0] sm:$0xf0] }
 0x1dc   : > { %3114 = vmatpush.bf16.msrb.mxu1 %v5086_v4  ;;  %v4878_v4 = vor.u32 %v6223_v1, %v4877_v56 }
 0x1dd   : > { %v7174_v59 = vpop.f32.mrf.mxu0 }
 0x1de   : > { %3078 = vmatpush.bf16.msra.mxu3 %v5342_v14  ;;  %v6442_v14 = vld [vmem:[%s7580_s4 + $0xb8] sm:$0xff] }
 0x1df   : > { %3065 = vmatpush.bf16.msra.mxu2 %v4926_v58  ;;  %3105 = vmatpush.bf16.msrb.mxu0 %v4462_v18  ;;  %v2785_v9 = vpop.f32.mrf.mxu2  ;;  %v4826_v58 = vor.u32 %v6210_v8, %v4825_v7  ;;  %v6458_v7 = vld [vmem:[%s7580_s4 + $0x138] sm:$0xff]  ;;  %v6449_v8 = vld [vmem:[%s7580_s4 + $0xf0] sm:$0xff] }
 0x1e0   : > { %3115 = vmatpush.bf16.msrb.mxu1 %v5034_v19  ;;  %v6436_v9 = vld [vmem:[%s7580_s4 + $0x88] sm:$0xff] }
 0x1e2   : > { %3079 = vmatpush.bf16.msra.mxu3 %v5290_v27  ;;  %v2837_v19 = vpop.f32.mrf.mxu1  ;;  %v5398_v27 = vor.u32 %v6353_v23, %v5397_v22  ;;  %v6455_v23 = vld [vmem:[%s7580_s4 + $0x120] sm:$0xff] }
 0x1e3   : > { %3066 = vmatpush.bf16.msra.mxu2 %v4874_v25  ;;  %3106 = vmatpush.bf16.msrb.mxu0 %v4410_v31  ;;  %v6340_v31 = vld [vmem:[#allocation7 + $0x7b0] sm:$0xf0] }
 0x1e4   : > { %3116 = vmatpush.bf16.msrb.mxu1 %v4982_v32  ;;  %v5346_v35 = vor.u32 %v6340_v31, %v5345_v30  ;;  %v6454_v31 = vld [vmem:[%s7580_s4 + $0x118] sm:$0xff] }
 0x1e5   : > { %v2824_v18 = vpop.f32.mrf.mxu0 }
 0x1e6   : > { %3080 = vmatpush.bf16.msra.mxu3 %v5238_v49  ;;  %3107 = vmatmul.bf16.vlgmr.msrb.gmra.mxu0 %v7050_v45  ;;  %v6432_v45 = vld [vmem:[%s7580_s4 + $0x68] sm:$0xff] }
 0x1e7   : > { %4022 = vmatpush.bf16.msra.mxu0 %v6434_v28  ;;  %3067 = vmatpush.bf16.msra.mxu2 %v4822_v43  ;;  %v6429_v28 = vld [vmem:[%s7580_s4 + $0x50] sm:$0xff]  ;;  %v6456_v18 = vld [vmem:[%s7580_s4 + $0x128] sm:$0xff] }
 0x1e8   : > { %3117 = vmatpush.bf16.msrb.mxu1 %v4930_v17  ;;  %v7204_v24 = vpop.f32.mrf.mxu2  ;;  %v7206_v25 = vpop.f32.mrf.mxu3  ;;  %v5294_v17 = vor.u32 %v6327_v42, %v5293_v41 }
 0x1e9   : > { %3081 = vmatmul.bf16.vlgmr.msra.gmra.mxu3 %v7056_v61 }
 0x1ea   : > { %3068 = vmatmul.bf16.vlgmr.msra.gmra.mxu2 %v7052_v46  ;;  %3145 = vmatpush.bf16.msrb.mxu3 %v5658_v38  ;;  %v6420_v38 = vld [vmem:[%s7580_s4 + $0x8] sm:$0xff] }
 0x1eb   : > { %3125 = vmatpush.bf16.msrb.mxu2 %v5606_v57  ;;  %4023 = vmatpush.bf16.msra.mxu0 %v6433_v53  ;;  %v6421_v57 = vld [vmem:[%s7580_s4 + $0x10] sm:$0xff]  ;;  %v6466_v53 = vld [vmem:[%s7580_s4 + $0x178] sm:$0xff] }
 0x1ec   : > { %3118 = vmatpush.bf16.msrb.mxu1 %v4878_v4  ;;  %v6437_v4 = vld [vmem:[%s7580_s4 + $0x90] sm:$0xff] }
 0x1ed   : > { %v7218_v32 = vpop.f32.mrf.mxu1 }
 0x1ee   : > { %4009 = vmatpush.bf16.msra.mxu3 %v6426_v2  ;;  %v5242_v2 = vor.u32 %v6314_v55, %v5241_v37  ;;  %v3154_v37 = vmax.f32 %v7137_v0, 0.0  ;;  %v6469_v55 = vld [vmem:[%s7580_s4 + $0x190] sm:$0xff] }
 0x1ef   : > { %3126 = vmatpush.bf16.msrb.mxu2 %v5554_v3  ;;  %4024 = vmatpush.bf16.msra.mxu0 %v6432_v45  ;;  %v3165_v3 = vpack.c.bf16 %v3152_v52, %v3152_v52  ;;  %v6465_v45 = vld [vmem:[%s7580_s4 + $0x170] sm:$0xff]  ;;  %v6452_v52 = vld [vmem:[%s7580_s4 + $0x108] sm:$0xff] }
 0x1f0   : > { %3119 = vmatpush.bf16.msrb.mxu1 %v4826_v58  ;;  %v2798_v43 = vpop.f32.mrf.mxu2  ;;  %v2811_v49 = vpop.f32.mrf.mxu3  ;;  %v6457_v58 = vld [vmem:[%s7580_s4 + $0x130] sm:$0xff] }
 0x1f1   : > { %v6453_v49 = vld [vmem:[%s7580_s4 + $0x110] sm:$0xff] }
 0x1f2   : > { %4010 = vmatpush.bf16.msra.mxu3 %v6425_v10 }
 0x1f3   : > { %3127 = vmatpush.bf16.msrb.mxu2 %v5502_v11  ;;  %4025 = vmatpush.bf16.msra.mxu0 %v6431_v13  ;;  %v3164_v11 = vpack.c.bf16 %v3151_v6, %v3151_v6  ;;  %v6448_v13 = vld [vmem:[%s7580_s4 + $0xe8] sm:$0xff] }
 0x1f4   : > { %4035 = vmatpush.bf16.msra.mxu1 %v6442_v14  ;;  %v6435_v14 = vld [vmem:[%s7580_s4 + $0x80] sm:$0xff] }
 0x1f5   : > { %3120 = vmatmul.bf16.vlgmr.msrb.gmra.mxu1 %v7052_v46  ;;  %v7220_v46 = vpop.f32.mrf.mxu0  ;;  %v2850_v56 = vpop.f32.mrf.mxu1 }
 0x1f6   : > { %4011 = vmatpush.bf16.msra.mxu3 %v6424_v20  ;;  %v6462_v20 = vld [vmem:[%s7580_s4 + $0x158] sm:$0xff] }
 0x1f7   : > { %3128 = vmatpush.bf16.msrb.mxu2 %v5450_v48  ;;  %4026 = vmatpush.bf16.msra.mxu0 %v6430_v21  ;;  %v6473_v48 = vld [vmem:[%s7580_s4 + $0x1b0] sm:$0xff] }
 0x1f8   : > { %4036 = vmatpush.bf16.msra.mxu1 %v6441_v5 }
 0x1f9   : > { %5671 = vmatmul.msk.bf16.vlgmr.msrb.gmra.mxu3 %vm2471_vm2, %v7058_v62  ;;  %v6427_v62 = vld [vmem:[%s7580_s4 + $0x40] sm:$0xff] }
 0x1fa   : > { %4012 = vmatpush.bf16.msra.mxu3 %v6423_v26  ;;  %v6446_v26 = vld [vmem:[%s7580_s4 + $0xd8] sm:$0xff] }
 0x1fb   : > { %3129 = vmatpush.bf16.msrb.mxu2 %v5398_v27  ;;  %4027 = vmatpush.bf16.msra.mxu0 %v6429_v28  ;;  %v6461_v27 = vld [vmem:[%s7580_s4 + $0x150] sm:$0xff]  ;;  %v6472_v28 = vld [vmem:[%s7580_s4 + $0x1a8] sm:$0xff] }
 0x1fc   : > { %4037 = vmatpush.bf16.msra.mxu1 %v6440_v29  ;;  %v801_v29 = vperm.slane %v7152_v39, 6 }
 0x1fd   : > { %v2889_v1 = vpop.f32.mrf.mxu0 }
 0x1fe   : > { %4013 = vmatpush.bf16.msra.mxu3 %v6422_v34  ;;  %v6445_v34 = vld [vmem:[%s7580_s4 + $0xd0] sm:$0xff]  ;;  %v2797_v41 = vadd.f32 %v7204_v24, %v801_v29 }
 0x1ff   : > { %3130 = vmatpush.bf16.msrb.mxu2 %v5346_v35  ;;  %4028 = vmatpush.bf16.msra.mxu0 %v6428_v36  ;;  %v6460_v35 = vld [vmem:[%s7580_s4 + $0x148] sm:$0xff]  ;;  %v6471_v36 = vld [vmem:[%s7580_s4 + $0x1a0] sm:$0xff] }
 0x200   : > { %4038 = vmatpush.bf16.msra.mxu1 %v6439_v40  ;;  %v2784_v40 = vadd.f32 %v7168_v44, %v7163_v12  ;;  %v6459_v12 = vld [vmem:[%s7580_s4 + $0x140] sm:$0xff]  ;;  %v6470_v44 = vld [vmem:[%s7580_s4 + $0x198] sm:$0xff] }
 0x202   : > { %4014 = vmatpush.bf16.msra.mxu3 %v6421_v57  ;;  %v6444_v57 = vld [vmem:[%s7580_s4 + $0xc8] sm:$0xff]  ;;  %v3156_v24 = vmax.f32 %v2784_v40, 0.0 }
 0x203   : > { %3131 = vmatpush.bf16.msrb.mxu2 %v5294_v17  ;;  %4029 = vmatpush.bf16.msra.mxu0 %v6427_v62  ;;  %v2810_v17 = vadd.f32 %v7206_v25, %v2797_v41  ;;  %v6498_v62 = vld [vmem:[%s7580_s4 + $0x278] sm:$0xff]  ;;  %v6492_v41 = vld [vmem:[%s7580_s4 + $0x248] sm:$0xff] }
 0x204   : > { %4039 = vmatpush.bf16.msra.mxu1 %v6438_v51  ;;  %v6482_v25 = vld [vmem:[%s7580_s4 + $0x1f8] sm:$0xff]  ;;  %v3169_v56 = vpack.c.bf16 %v3156_v24, %v3156_v24 }
 0x205   : > { %v7275_v10 = vpop.f32.mrf.mxu0  ;;  %v2823_v1 = vadd.f32 %v7174_v59, %v2810_v17  ;;  %v6490_v59 = vld [vmem:[%s7580_s4 + $0x238] sm:$0xff] }
 0x206   : > { %4015 = vmatpush.bf16.msra.mxu3 %v6420_v38  ;;  %4030 = vmatmul.bf16.vlgmr.msra.gmra.mxu0 %v3165_v3  ;;  %v6497_v38 = vld [vmem:[%s7580_s4 + $0x270] sm:$0xff]  ;;  %v3155_v3 = vmax.f32 %v7157_v54, 0.0  ;;  %v6496_v54 = vld [vmem:[%s7580_s4 + $0x268] sm:$0xff]  ;;  %v6502_v24 = vld [vmem:[%s7580_s4 + $0x298] sm:$0xff] }
 0x207   : > { %4074 = vmatpush.bf16.msrb.mxu0 %v6466_v53  ;;  %3132 = vmatpush.bf16.msrb.mxu2 %v5242_v2  ;;  %v6443_v53 = vld [vmem:[%s7580_s4 + $0xc0] sm:$0xff] }
 0x208   : > { %4040 = vmatpush.bf16.msra.mxu1 %v6437_v4  ;;  %v7305_v5 = vpop.f32.mrf.mxu2  ;;  %v7307_v22 = vpop.f32.mrf.mxu3  ;;  %v6451_v2 = vld [vmem:[%s7580_s4 + $0x100] sm:$0xff]  ;;  %v6481_v4 = vld [vmem:[%s7580_s4 + $0x1f0] sm:$0xff] }
 0x20a   : > { %3133 = vmatmul.bf16.vlgmr.msrb.gmra.mxu2 %v7056_v61  ;;  %4016 = vmatpush.bf16.msra.mxu3 %v6419_v50  ;;  %v3153_v61 = vmax.f32 %v7127_v47, 0.0  ;;  %v6447_v47 = vld [vmem:[%s7580_s4 + $0xe0] sm:$0xff]  ;;  %v2836_v50 = vadd.f32 %v7176_v60, %v2823_v1  ;;  %v6480_v60 = vld [vmem:[%s7580_s4 + $0x1e8] sm:$0xff] }
 0x20b   : > { %4048 = vmatpush.bf16.msra.mxu2 %v6450_v63  ;;  %4075 = vmatpush.bf16.msrb.mxu0 %v6465_v45  ;;  %v3167_v63 = vpack.c.bf16 %v3154_v37, %v3154_v37  ;;  %v6468_v45 = vld [vmem:[%s7580_s4 + $0x188] sm:$0xff]  ;;  %v6483_v1 = vld [vmem:[%s7580_s4 + $0x200] sm:$0xff] }
 0x20c   : > { %4041 = vmatpush.bf16.msra.mxu1 %v6436_v9  ;;  %v3166_v19 = vpack.c.bf16 %v3153_v61, %v3153_v61  ;;  %v6467_v9 = vld [vmem:[%s7580_s4 + $0x180] sm:$0xff]  ;;  %v6488_v61 = vld [vmem:[%s7580_s4 + $0x228] sm:$0xff] }
 0x20d   : > { %4017 = vmatmul.bf16.vlgmr.msra.gmra.mxu3 %v3164_v11  ;;  %v2902_v21 = vpop.f32.mrf.mxu0  ;;  %v7322_v30 = vpop.f32.mrf.mxu1  ;;  %v6495_v11 = vld [vmem:[%s7580_s4 + $0x260] sm:$0xff] }
 0x20e   : > { %4061 = vmatpush.bf16.msrb.mxu3 %v6458_v7  ;;  %v3168_v7 = vpack.c.bf16 %v3155_v3, %v3155_v3 }
 0x20f   : > { %4049 = vmatpush.bf16.msra.mxu2 %v6449_v8  ;;  %4076 = vmatpush.bf16.msrb.mxu0 %v6464_v33  ;;  %v6489_v8 = vld [vmem:[%s7580_s4 + $0x230] sm:$0xff]  ;;  %v3157_v33 = vmax.f32 %v2836_v50, 0.0 }
 0x210   : > { %4042 = vmatpush.bf16.msra.mxu1 %v6435_v14  ;;  %v2863_v42 = vpop.f32.mrf.mxu2  ;;  %v2876_v43 = vpop.f32.mrf.mxu3  ;;  %v802_v14 = vperm.slane %v7152_v39, 7  ;;  %v6505_v39 = vld [vmem:[%s7580_s4 + $0x2b0] sm:$0xff] }
 0x211   : > { %v6503_v42 = vld [vmem:[%s7580_s4 + $0x2a0] sm:$0xff] }
 0x212   : > { %4062 = vmatpush.bf16.msrb.mxu3 %v6457_v58  ;;  %v6506_v58 = vld [vmem:[%s7580_s4 + $0x2b8] sm:$0xff] }
 0x213   : > { %4050 = vmatpush.bf16.msra.mxu2 %v6448_v13  ;;  %4077 = vmatpush.bf16.msrb.mxu0 %v6463_v15  ;;  %v6479_v15 = vld [vmem:[%s7580_s4 + $0x1e0] sm:$0xff] }
 0x214   : > { %4087 = vmatpush.bf16.msrb.mxu1 %v6474_v16  ;;  %v3170_v16 = vpack.c.bf16 %v3157_v33, %v3157_v33 }
 0x215   : > { %4043 = vmatmul.bf16.vlgmr.msra.gmra.mxu1 %v3166_v19  ;;  %v2915_v51 = vpop.f32.mrf.mxu1 }
 0x216   : > { %4063 = vmatpush.bf16.msrb.mxu3 %v6456_v18  ;;  %v7415_v18 = vld [vmem:[#allocation8 + $0x8] sm:$0x1f]  ;;  %v6484_v51 = vld [vmem:[%s7580_s4 + $0x208] sm:$0xff] }
 0x217   : > { %4051 = vmatpush.bf16.msra.mxu2 %v6447_v47  ;;  %4078 = vmatpush.bf16.msrb.mxu0 %v6462_v20  ;;  %v6494_v47 = vld [vmem:[%s7580_s4 + $0x258] sm:$0xff]  ;;  %v2849_v20 = vadd.f32 %v7218_v32, %v802_v14  ;;  %v803_v21 = vperm.slane %v7415_v18, 0  ;;  %v6493_v32 = vld [vmem:[%s7580_s4 + $0x250] sm:$0xff]  ;;  %v804_v29 = vperm.slane %v7415_v18, 1 }
 0x218   : > { %4088 = vmatpush.bf16.msrb.mxu1 %v6473_v48  ;;  %v7372_v0 = vpop.f32.mrf.mxu3  ;;  %v6487_v48 = vld [vmem:[%s7580_s4 + $0x220] sm:$0xff] }
 0x21a   : > { %4064 = vmatpush.bf16.msrb.mxu3 %v6455_v23 }
 0x21b   : > { %4052 = vmatpush.bf16.msra.mxu2 %v6446_v26  ;;  %4079 = vmatpush.bf16.msrb.mxu0 %v6461_v27  ;;  %v6478_v26 = vld [vmem:[%s7580_s4 + $0x1d8] sm:$0xff]  ;;  %v2862_v27 = vadd.f32 %v7305_v5, %v2849_v20  ;;  %v2901_v5 = vadd.f32 %v7275_v10, %v803_v21  ;;  %v6508_v21 = vld [vmem:[%s7580_s4 + $0x2c8] sm:$0xff] }
 0x21c   : > { %4089 = vmatpush.bf16.msrb.mxu1 %v6472_v28  ;;  %v6504_v28 = vld [vmem:[%s7580_s4 + $0x2a8] sm:$0xff] }
 0x21d   : > { %v2875_v40 = vadd.f32 %v7307_v22, %v2862_v27  ;;  %v2914_v10 = vadd.f32 %v7322_v30, %v2901_v5  ;;  %v6491_v30 = vld [vmem:[%s7580_s4 + $0x240] sm:$0xff] }
 0x21e   : > { %4065 = vmatpush.bf16.msrb.mxu3 %v6454_v31 }
 0x21f   : > { %4053 = vmatpush.bf16.msra.mxu2 %v6445_v34  ;;  %4080 = vmatpush.bf16.msrb.mxu0 %v6460_v35  ;;  %v7391_v6 = vpop.f32.mrf.mxu0  ;;  %v6486_v34 = vld [vmem:[%s7580_s4 + $0x218] sm:$0xff] }
 0x220   : > { %4090 = vmatpush.bf16.msrb.mxu1 %v6471_v36  ;;  %v2941_v13 = vpop.f32.mrf.mxu3  ;;  %v6477_v36 = vld [vmem:[%s7580_s4 + $0x1d0] sm:$0xff] }
 0x221   : > { %v6510_v13 = vld [vmem:[%s7580_s4 + $0x2d8] sm:$0xff] }
 0x222   : > { %4066 = vmatpush.bf16.msrb.mxu3 %v6453_v49  ;;  %v6485_v49 = vld [vmem:[%s7580_s4 + $0x210] sm:$0xff] }
 0x223   : > { %4054 = vmatpush.bf16.msra.mxu2 %v6444_v57  ;;  %4081 = vmatpush.bf16.msrb.mxu0 %v6459_v12  ;;  %v6476_v12 = vld [vmem:[%s7580_s4 + $0x1c8] sm:$0xff] }
 0x224   : > { %4091 = vmatpush.bf16.msrb.mxu1 %v6470_v44  ;;  %v2888_v44 = vadd.f32 %v7220_v46, %v2875_v40  ;;  %v6518_v40 = vld [vmem:[%s7580_s4 + $0x318] sm:$0xff] }
 0x226   : > { %4067 = vmatpush.bf16.msrb.mxu3 %v6452_v52  ;;  %4082 = vmatmul.bf16.vlgmr.msrb.gmra.mxu0 %v3169_v56  ;;  %v3158_v37 = vmax.f32 %v2888_v44, 0.0 }
 0x227   : > { %4126 = vmatpush.bf16.msra.mxu0 %v6498_v62  ;;  %4055 = vmatpush.bf16.msra.mxu2 %v6443_v53  ;;  %v2967_v19 = vpop.f32.mrf.mxu0  ;;  %v6475_v53 = vld [vmem:[%s7580_s4 + $0x1c0] sm:$0xff] }
 0x228   : > { %4092 = vmatpush.bf16.msrb.mxu1 %v6469_v55  ;;  %v6514_v55 = vld [vmem:[%s7580_s4 + $0x2f8] sm:$0xff] }
 0x229   : > { %v2926_v23 = vpop.f32.mrf.mxu2  ;;  %v6522_v19 = vld [vmem:[%s7580_s4 + $0x338] sm:$0xff] }
 0x22a   : > { %4056 = vmatmul.bf16.vlgmr.msra.gmra.mxu2 %v3167_v63  ;;  %4068 = vmatpush.bf16.msrb.mxu3 %v6451_v2  ;;  %v2927_v57 = vadd.f32 %v2926_v23, %v2914_v10  ;;  %v3171_v2 = vpack.c.bf16 %v3158_v37, %v3158_v37  ;;  %v6513_v63 = vld [vmem:[%s7580_s4 + $0x2f0] sm:$0xff]  ;;  %v806_v10 = vperm.slane %v7415_v18, 3 }
 0x22b   : > { %4100 = vmatpush.bf16.msrb.mxu2 %v6482_v25  ;;  %4127 = vmatpush.bf16.msra.mxu0 %v6497_v38  ;;  %v6501_v25 = vld [vmem:[%s7580_s4 + $0x290] sm:$0xff] }
 0x22c   : > { %4093 = vmatpush.bf16.msrb.mxu1 %v6468_v45  ;;  %v2952_v31 = vpop.f32.mrf.mxu3  ;;  %v2940_v46 = vadd.f32 %v7372_v0, %v2927_v57 }
 0x22d   : > { %4069 = vmatmul.bf16.vlgmr.msrb.gmra.mxu3 %v3168_v7  ;;  %v2953_v43 = vadd.f32 %v2952_v31, %v804_v29  ;;  %v6499_v7 = vld [vmem:[%s7580_s4 + $0x280] sm:$0xff]  ;;  %v6520_v31 = vld [vmem:[%s7580_s4 + $0x328] sm:$0xff] }
 0x22e   : > { %4113 = vmatpush.bf16.msra.mxu3 %v6490_v59  ;;  %v2978_v35 = vpop.f32.mrf.mxu1  ;;  %v3159_v38 = vmax.f32 %v2940_v46, 0.0  ;;  %v6500_v59 = vld [vmem:[%s7580_s4 + $0x288] sm:$0xff]  ;;  %v6507_v29 = vld [vmem:[%s7580_s4 + $0x2c0] sm:$0xff] }
 0x22f   : > { %4101 = vmatpush.bf16.msrb.mxu2 %v6481_v4  ;;  %4128 = vmatpush.bf16.msra.mxu0 %v6496_v54  ;;  %v2966_v17 = vadd.f32 %v7391_v6, %v2953_v43 }
 0x230   : > { %4094 = vmatpush.bf16.msrb.mxu1 %v6467_v9  ;;  %v3172_v45 = vpack.c.bf16 %v3159_v38, %v3159_v38  ;;  %v6511_v9 = vld [vmem:[%s7580_s4 + $0x2e0] sm:$0xff] }
 0x231   : > { %v2928_v22 = vpop.f32.mrf.mxu2  ;;  %v2979_v56 = vadd.f32 %v2978_v35, %v2966_v17 }
 0x232   : > { %4114 = vmatpush.bf16.msra.mxu3 %v6489_v8  ;;  %v6512_v8 = vld [vmem:[%s7580_s4 + $0x2e8] sm:$0xff] }
 0x233   : > { %4102 = vmatpush.bf16.msrb.mxu2 %v6480_v60  ;;  %4129 = vmatpush.bf16.msra.mxu0 %v6495_v11 }
 0x234   : > { %4139 = vmatpush.bf16.msra.mxu1 %v6506_v58  ;;  %v2954_v62 = vpop.f32.mrf.mxu3  ;;  %v805_v58 = vperm.slane %v7415_v18, 2 }
 0x235   : > { %4095 = vmatmul.bf16.vlgmr.msrb.gmra.mxu1 %v3170_v16  ;;  %v6509_v16 = vld [vmem:[%s7580_s4 + $0x2d0] sm:$0xff] }
 0x236   : > { %4115 = vmatpush.bf16.msra.mxu3 %v6488_v61  ;;  %v2980_v52 = vpop.f32.mrf.mxu1 }
 0x237   : > { %4103 = vmatpush.bf16.msrb.mxu2 %v6479_v15  ;;  %4130 = vmatpush.bf16.msra.mxu0 %v6494_v47 }
 0x238   : > { %4140 = vmatpush.bf16.msra.mxu1 %v6505_v39 }
 0x239   : > { %v2991_v0 = vpop.f32.mrf.mxu2 }
 0x23a   : > { %4116 = vmatpush.bf16.msra.mxu3 %v6487_v48  ;;  %v2992_v3 = vadd.f32 %v2991_v0, %v2979_v56  ;;  %v807_v56 = vperm.slane %v7415_v18, 4 }
 0x23b   : > { %4104 = vmatpush.bf16.msrb.mxu2 %v6478_v26  ;;  %4131 = vmatpush.bf16.msra.mxu0 %v6493_v32  ;;  %v6521_v32 = vld [vmem:[%s7580_s4 + $0x330] sm:$0xff] }
 0x23c   : > { %4141 = vmatpush.bf16.msra.mxu1 %v6504_v28  ;;  %v3160_v4 = vmax.f32 %v2992_v3, 0.0 }
 0x23e   : > { %4117 = vmatpush.bf16.msra.mxu3 %v6486_v34  ;;  %v3043_v54 = vpop.f32.mrf.mxu1  ;;  %v3173_v6 = vpack.c.bf16 %v3160_v4, %v3160_v4 }
 0x23f   : > { %4105 = vmatpush.bf16.msrb.mxu2 %v6477_v36  ;;  %4132 = vmatpush.bf16.msra.mxu0 %v6492_v41  ;;  %v3030_v50 = vpop.f32.mrf.mxu0  ;;  %v6519_v36 = vld [vmem:[%s7580_s4 + $0x320] sm:$0xff] }
 0x240   : > { %4142 = vmatpush.bf16.msra.mxu1 %v6503_v42  ;;  %v6517_v42 = vld [vmem:[%s7580_s4 + $0x310] sm:$0xff] }
 0x241   : > { %v2993_v60 = vpop.f32.mrf.mxu2 }
 0x242   : > { %4118 = vmatpush.bf16.msra.mxu3 %v6485_v49  ;;  %v6516_v49 = vld [vmem:[%s7580_s4 + $0x308] sm:$0xff] }
 0x243   : > { %4106 = vmatpush.bf16.msrb.mxu2 %v6476_v12  ;;  %4133 = vmatpush.bf16.msra.mxu0 %v6491_v30 }
 0x244   : > { %4143 = vmatpush.bf16.msra.mxu1 %v6502_v24  ;;  %v6515_v24 = vld [vmem:[%s7580_s4 + $0x300] sm:$0xff] }
 0x246   : > { %4119 = vmatpush.bf16.msra.mxu3 %v6484_v51  ;;  %4134 = vmatmul.bf16.vlgmr.msra.gmra.mxu0 %v3173_v6  ;;  %v3045_v11 = vpop.f32.mrf.mxu1 }
 0x247   : > { %4107 = vmatpush.bf16.msrb.mxu2 %v6475_v53  ;;  %v3032_v33 = vpop.f32.mrf.mxu0 }
 0x248   : > { %4144 = vmatpush.bf16.msra.mxu1 %v6501_v25 }
 0x24a   : > { %4108 = vmatmul.bf16.vlgmr.msrb.gmra.mxu2 %v3171_v2  ;;  %4120 = vmatpush.bf16.msra.mxu3 %v6483_v1 }
 0x24b   : > { %4152 = vmatpush.bf16.msra.mxu2 %v6514_v55 }
 0x24c   : > { %4145 = vmatpush.bf16.msra.mxu1 %v6500_v59  ;;  %v3017_v61 = vpop.f32.mrf.mxu3 }
 0x24d   : > { %4121 = vmatmul.bf16.vlgmr.msra.gmra.mxu3 %v3172_v45  ;;  %v3004_v14 = vpop.f32.mrf.mxu2 }
 0x24e   : > { %v3005_v15 = vadd.f32 %v3004_v14, %v805_v58  ;;  %4165 = vmatpush.bf16.msrb.mxu3 %v6522_v19 }
 0x24f   : > { %4153 = vmatpush.bf16.msra.mxu2 %v6513_v63  ;;  %v3095_v48 = vpop.f32.mrf.mxu0 }
 0x250   : > { %4146 = vmatpush.bf16.msra.mxu1 %v6499_v7  ;;  %v3018_v47 = vadd.f32 %v3017_v61, %v3005_v15 }
 0x252   : > { %v3056_v39 = vpop.f32.mrf.mxu1  ;;  %v3031_v20 = vadd.f32 %v3030_v50, %v3018_v47  ;;  %4166 = vmatpush.bf16.msrb.mxu3 %v6521_v32 }
 0x253   : > { %4154 = vmatpush.bf16.msra.mxu2 %v6512_v8  ;;  %v3057_v43 = vadd.f32 %v3056_v39, %v806_v10 }
 0x254   : > { %v3044_v23 = vadd.f32 %v3043_v54, %v3031_v20  ;;  %v3019_v27 = vpop.f32.mrf.mxu3 }
 0x255   : > { %v3006_v26 = vpop.f32.mrf.mxu2 }
 0x256   : > { %v3161_v28 = vmax.f32 %v3044_v23, 0.0  ;;  %4167 = vmatpush.bf16.msrb.mxu3 %v6520_v31 }
 0x257   : > { %4155 = vmatpush.bf16.msra.mxu2 %v6511_v9  ;;  %v3097_v35 = vpop.f32.mrf.mxu0 }
 0x258   : > { %v3174_v34 = vpack.c.bf16 %v3161_v28, %v3161_v28 }
 0x25a   : > { %v3058_v5 = vpop.f32.mrf.mxu1  ;;  %4147 = vmatmul.bf16.vlgmr.msra.gmra.mxu1 %v3174_v34  ;;  %4168 = vmatpush.bf16.msrb.mxu3 %v6519_v36 }
 0x25b   : > { %4156 = vmatpush.bf16.msra.mxu2 %v6510_v13 }
 0x25e   : > { %4169 = vmatpush.bf16.msrb.mxu3 %v6518_v40 }
 0x25f   : > { %4157 = vmatpush.bf16.msra.mxu2 %v6509_v16 }
 0x262   : > { %4170 = vmatpush.bf16.msrb.mxu3 %v6517_v42 }
 0x263   : > { %4158 = vmatpush.bf16.msra.mxu2 %v6508_v21  ;;  %v3108_v41 = vpop.f32.mrf.mxu0 }
 0x264   : > { %v3109_v38 = vadd.f32 %v3108_v41, %v807_v56 }
 0x266   : > { %4171 = vmatpush.bf16.msrb.mxu3 %v6516_v49 }
 0x267   : > { %4159 = vmatpush.bf16.msra.mxu2 %v6507_v29 }
 0x26a   : > { %4172 = vmatpush.bf16.msrb.mxu3 %v6515_v24 }
 0x26b   : > { %v3110_v57 = vpop.f32.mrf.mxu0 }
 0x26c   : > { %v3082_v44 = vpop.f32.mrf.mxu3  ;;  %v6609_v57 = vld [vmem:[%s7021_s16] sm:$0xf]  ;;  %s4201_s16 = scalar_lea.sflag [#allocation4], %s7017_s23 }
 0x26d   : > { %v3069_v22 = vpop.f32.mrf.mxu2 }
 0x26e   : > { %v3070_v12 = vadd.f32 %v3069_v22, %v3057_v43  ;;  %v6607_v22 = vld [vmem:[#allocation10] ss:$0 sm:$0xff] }
 0x270   : > { %v3083_v30 = vadd.f32 %v3082_v44, %v3070_v12 }
 0x272   : > { %v3096_v17 = vadd.f32 %v3095_v48, %v3083_v30  ;;  %v3121_v62 = vpop.f32.mrf.mxu1 }
 0x273   : > { %v3122_v2 = vadd.f32 %v3121_v62, %v3109_v38 }
 0x274   : > { %v3162_v51 = vmax.f32 %v3096_v17, 0.0  ;;  %v3084_v53 = vpop.f32.mrf.mxu3 }
 0x275   : > { %v3071_v46 = vpop.f32.mrf.mxu2 }
 0x276   : > { %v3175_v52 = vpack.c.bf16 %v3162_v51, %v3162_v51 }
 0x278   : > { %4160 = vmatmul.bf16.vlgmr.msra.gmra.mxu2 %v3175_v52 }
 0x27a   : > { %v3123_v37 = vpop.f32.mrf.mxu1 }
 0x27c   : > { %v3147_v25 = vpop.f32.mrf.mxu3 }
 0x283   : > { %v4031_v55 = vpop.f32.mrf.mxu0 }
 0x284   : > { %v3149_v1 = vpop.f32.mrf.mxu3 }
 0x28b   : > { %v4033_v0 = vpop.f32.mrf.mxu0 }
 0x28d   : > { %v3134_v3 = vpop.f32.mrf.mxu2 }
 0x28e   : > { %v3135_v59 = vadd.f32 %v3134_v3, %v3122_v2 }
 0x290   : > { %v3148_v63 = vadd.f32 %v3147_v25, %v3135_v59  ;;  %v4018_v4 = vpop.f32.mrf.mxu3 }
 0x291   : > { %v4032_v50 = vadd.f32 %v4031_v55, %v4018_v4 }
 0x292   : > { %v4044_v45 = vpop.f32.mrf.mxu1  ;;  %v3163_v54 = vmax.f32 %v3148_v63, 0.0 }
 0x293   : > { %v4045_v6 = vadd.f32 %v4044_v45, %v4032_v50 }
 0x294   : > { %v3176_v7 = vpack.c.bf16 %v3163_v54, %v3163_v54 }
 0x295   : > { %v3136_v8 = vpop.f32.mrf.mxu2 }
 0x296   : > { %4173 = vmatmul.bf16.vlgmr.msrb.gmra.mxu3 %v3176_v7 }
 0x298   : > { %v4020_v60 = vpop.f32.mrf.mxu3 }
 0x29a   : > { %v4046_v9 = vpop.f32.mrf.mxu1 }
 0x2a3   : > { %v4083_v33 = vpop.f32.mrf.mxu0 }
 0x2ab   : > { %v4085_v11 = vpop.f32.mrf.mxu0 }
 0x2ad   : > { %v4057_v18 = vpop.f32.mrf.mxu2 }
 0x2ae   : > { %v4058_v58 = vadd.f32 %v4057_v18, %v4045_v6 }
 0x2b0   : > { %v4070_v13 = vpop.f32.mrf.mxu3 }
 0x2b1   : > { %v4071_v61 = vadd.f32 %v4070_v13, %v4058_v58 }
 0x2b2   : > { %v4096_v14 = vpop.f32.mrf.mxu1 }
 0x2b3   : > { %v4084_v15 = vadd.f32 %v4083_v33, %v4071_v61 }
 0x2b5   : > { %v4097_v16 = vadd.f32 %v4096_v14, %v4084_v15  ;;  %v4059_v47 = vpop.f32.mrf.mxu2 }
 0x2b8   : > { %v4072_v39 = vpop.f32.mrf.mxu3 }
 0x2ba   : > { %v4098_v19 = vpop.f32.mrf.mxu1 }
 0x2c3   : > { %v4135_v20 = vpop.f32.mrf.mxu0 }
 0x2cb   : > { %v4137_v27 = vpop.f32.mrf.mxu0 }
 0x2cd   : > { %v4109_v48 = vpop.f32.mrf.mxu2 }
 0x2ce   : > { %v4110_v21 = vadd.f32 %v4109_v48, %v4097_v16 }
 0x2d0   : > { %v4122_v23 = vpop.f32.mrf.mxu3 }
 0x2d1   : > { %v4123_v26 = vadd.f32 %v4122_v23, %v4110_v21 }
 0x2d3   : > { %v4136_v32 = vadd.f32 %v4135_v20, %v4123_v26 }
 0x2d5   : > { %v4111_v28 = vpop.f32.mrf.mxu2 }
 0x2d7   : > { %v4148_v31 = vpop.f32.mrf.mxu1 }
 0x2d8   : > { %v4124_v29 = vpop.f32.mrf.mxu3  ;;  %v4149_v36 = vadd.f32 %v4148_v31, %v4136_v32 }
 0x2df   : > { %v4150_v34 = vpop.f32.mrf.mxu1 }
 0x2fb   : > { %v4161_v5 = vpop.f32.mrf.mxu2 }
 0x2fc   : > { %v4162_v40 = vadd.f32 %v4161_v5, %v4149_v36 }
 0x303   : > { %v4163_v35 = vpop.f32.mrf.mxu2 }
 0x319   : > { %v4174_v41 = vpop.f32.mrf.mxu3 }
 0x31a   : > { %v4175_v42 = vadd.f32 %v4174_v41, %v4162_v40 }
 0x31c   : > { %v4178_v10 = vpack.c.bf16 %v4175_v42, %v4175_v42 }
 0x31e   : > { %v4184_v43 = vsel %vm372_vm0, %v4178_v10, 0 }
 0x31f   : > { %4193 = vmatpush.bf16.msrb.mxu0 %v4184_v43 }
 0x321   : > { %v4176_v49 = vpop.f32.mrf.mxu3 }
 0x322   : > { %6088 = vmatmul.msk.bf16.vlgmr.msrb.gmra.mxu0 %vm368_vm1, %v6609_v57 }
 0x39f   : > { %v4195_v12 = vpop.f32.mrf.mxu0 }
 0x3a0   : > { %v4196_v44 = vadd.f32 %v6607_v22, %v4195_v12 }
 0x3a2   : > { %4199 = vst.msk [vmem:[%s353_s25] sm:$0xff] %vm2471_vm2, %v4196_v44 }
 0x3a3   : > { %6787 = shalt.err (!%p6784_p8)
}
 0x3a4   : > { %6539 = dma.vmem_to_hbm [thread:$0]  (%p6960_p0), %s4214_s11, 128, %s4216_s17, %s4201_s16  }
 0x3a7   : > { %v4197_v30 = vpop.f32.mrf.mxu0 }
 0x3a8 PF: > { %s4227_s23 = sand.u32 1, %s6826_s21   ;;  %p7599_p10 = scmp.ge.s32.totalorder %s6838_s24, 2 }
 0x3a9   : > { %s4228_s14 = scalar_lea.sflag [#allocation4], %s4227_s23 }
 0x3aa   : > { %p6559_p11 = pnand %p7599_p10, %p6968_p6 }
 0x3ac   : > { %p6560_p12 = pneg %p6559_p11 }
 0x3ae   : > { %6821 = dma.done.wait (%p6560_p12), %s4228_s14, 128  }
 0x3af   : > { %6823 = vsyncadd (%p6560_p12), %s4228_s14, 4294967168  ;;  %s7600_s2 = sld [smem:[#allocation17_spill]]  ;;  %p23_p2 = scmp.ge.s32.totalorder %s6936_s26, 4  }
 0x3b0   : > { %s7601_s23 = sld [smem:[#allocation18_spill]]  ;;  %s7602_s21 = smov %s6830_s22 }
 0x3b1   : > { %s7604_s24 = smov %s6936_s26  ;;  %25 = sbr.rel (!%p23_p2) target bundleno = 12 (0xc), region = 114 }
 0x3b5   : > { %s7603_s22 = smov %s7600_s2 }
 0x3b6   :  { %4234 = vsyncpa [#allocation3], 1 }
 0x3b7   :  { %4236 = vsyncpa [#allocation3 + $0x1], 1 }
 0x3b8   :  { %4237 = vsyncpa [#allocation6], 1 }
 0x3b9   :  { %4239 = vsyncpa [#allocation6 + $0x1], 1 }
 0x3ba   :  { %4240 = vsyncpa [#allocation9], 1 }
 0x3bb   :  { %4241 = vsyncpa [#allocation4], 1 }
 0x3bc   :  { %4243 = vsyncpa [#allocation4 + $0x1], 1 }

</bundles_post_ra>
